<compile_context>
chip_gen: v6e
topology: v6e:2x2x1
jax: 0.10.0
libtpu: 0.0.40
codegen_flags: <defaults>
</compile_context>

<pallas_src>
import jax
import jax.numpy as jnp
from jax import lax
from jax.experimental import pallas as pl
from jax.experimental.pallas import tpu as pltpu

KSIZE = 5
PAD = 2
N_OUT = 16                    # fixed by the module: Conv3d(1, 16, ...)
N_TAP_HW = KSIZE * KSIZE      # 25 in-plane (kh, kw) taps
TAP_PAD = 32                  # tap axis padded to a sublane multiple
K_MAT = KSIZE * TAP_PAD       # 160: matmul contraction dim (zero-padded slots)
BN_EPS = 1e-5
_TILE_P_CAP = 16384           # max output lanes per grid step (~1 MiB f32 tile)
_MIN_GRID_STEPS = 4           # keep both v7x TensorCores busy and pipelined


def _pick_td(D, R, B, cap=_TILE_P_CAP, min_steps=_MIN_GRID_STEPS):
    """Depth slices per grid step: the largest divisor of D with TD*R <= cap,
    shrunk (when possible) so the grid has >= min_steps steps (v7x megacore)."""
    divs = [t for t in range(1, D + 1) if D % t == 0]
    fit = [t for t in divs if t * R <= cap] or [1]
    td = max(fit)
    if B * (D // td) < min_steps:
        better = [t for t in fit if B * (D // t) >= min_steps]
        if better:
            td = max(better)
    return td


# ---------------------------------------------------------------------------
# Fused kernel: in-kernel im2col + conv-as-MXU-matmul + BN(folded) + skip + ELU
# ---------------------------------------------------------------------------
@jax.jit
def input_transition(x, params):
    B, C_in, D, H, W = x.shape
    assert C_in == 1, "module is Conv3d(1, 16, ...)"
    R = H * W                       # positions per depth slice (lane axis)
    P = D * R
    assert R % 128 == 0, "H*W must be a multiple of 128 (lane-dense tiles)"
    TD = _pick_td(D, R, B)          # output depth slices per grid step
    TDH = TD + 2 * PAD              # haloed slab depth
    DP = D + 2 * PAD

    # ---- fold eval-mode BN into the conv weights; keep bias/shift in f32 ----
    scale = params["gamma"] * lax.rsqrt(params["run_var"] + BN_EPS)   # (16,)
    shift = params["beta"] - params["run_mean"] * scale               # (16,)
    w = params["w1"].reshape(N_OUT, KSIZE, N_TAP_HW) * scale[:, None, None]
    w2 = jnp.zeros((N_OUT, KSIZE, TAP_PAD), jnp.float32)
    w2 = w2.at[:, :, :N_TAP_HW].set(w)
    w2 = w2.reshape(N_OUT, K_MAT).astype(jnp.bfloat16)        # (16, 160) bf16
    bias = (params["b1"] * scale + shift).reshape(N_OUT, 1)   # (16, 1) f32

    # ---- boundary-mask table for the 25 in-plane taps (1 = valid tap) ------
    r = jnp.arange(R, dtype=jnp.int32)
    wq = r % W
    rows = []
    for kh in range(KSIZE):
        for kw in range(KSIZE):
            dh, dw = kh - PAD, kw - PAD
            ok = ((r + dh * W >= 0) & (r + dh * W < R)
                  & (wq + dw >= 0) & (wq + dw < W))
            rows.append(ok)
    mask = jnp.stack(rows).astype(jnp.float32)                        # (25, R)
    mask = jnp.concatenate(
        [mask, jnp.zeros((TAP_PAD - N_TAP_HW, R), jnp.float32)], axis=0)

    # ---- input: pad depth only (cheap), flatten each (H, W) plane ----------
    xf = jnp.pad(x[:, 0], ((0, 0), (PAD, PAD), (0, 0), (0, 0)))
    xf = xf.reshape(B, DP, R).astype(jnp.float32)                     # (B,DP,R)

    def kernel(w_ref, b_ref, m_ref, x_ref, o_ref, s_ref):
        dt = pl.program_id(1)
        # Haloed depth slab for this tile.  The x block (1, DP, R) keeps the
        # same block index across the depth-tile axis, so it stays resident in
        # VMEM per batch; we just slice the halo window here.
        slab = x_ref[0, pl.ds(dt * TD, TDH), :]                 # (TDH, R) f32

        # ---- in-kernel im2col: 25 masked lane-rolls into the VMEM scratch --
        s_ref[:, N_TAP_HW:, :] = jnp.zeros(
            (TDH, TAP_PAD - N_TAP_HW, R), s_ref.dtype)          # zero pad taps
        for kh in range(KSIZE):
            for kw in range(KSIZE):
                t = kh * KSIZE + kw
                shiftv = (kh - PAD) * W + (kw - PAD)
                sh = jnp.roll(slab, -shiftv, axis=1) if shiftv else slab
                s_ref[:, t, :] = (sh * m_ref[t:t + 1, :]).astype(s_ref.dtype)

        wmat = w_ref[...]                                       # (16, 160) bf16
        bvec = b_ref[...]                                       # (16, 1)   f32
        # ---- per output depth slice: MXU matmul + f32 bias + skip + ELU ----
        for i in range(TD):
            # rows [i, i+5) of the (TDH, 32, R) scratch == the (160, R) patch
            patch = s_ref[i:i + KSIZE, :, :].reshape(K_MAT, R)
            y = jnp.dot(wmat, patch, preferred_element_type=jnp.float32)
            y = y + bvec + slab[i + PAD:i + PAD + 1, :]         # bias + 16-way skip
            # ELU(alpha=1) in f32; clamp so the untaken exp branch never overflows
            y = jnp.where(y > 0.0, y, jnp.exp(jnp.minimum(y, 0.0)) - 1.0)
            o_ref[0, :, i * R:(i + 1) * R] = y.astype(o_ref.dtype)

    out = pl.pallas_call(
        kernel,
        out_shape=jax.ShapeDtypeStruct((B, N_OUT, P), jnp.float32),
        grid=(B, D // TD),
        in_specs=[
            pl.BlockSpec((N_OUT, K_MAT), lambda b, d: (0, 0)),     # weights
            pl.BlockSpec((N_OUT, 1), lambda b, d: (0, 0)),         # f32 bias
            pl.BlockSpec((TAP_PAD, R), lambda b, d: (0, 0)),       # tap masks
            pl.BlockSpec((1, DP, R), lambda b, d: (b, 0, 0)),      # padded x
        ],
        out_specs=pl.BlockSpec((1, N_OUT, TD * R), lambda b, d: (b, 0, d)),
        scratch_shapes=[pltpu.VMEM((TDH, TAP_PAD, R), jnp.bfloat16)],
        compiler_params=pltpu.CompilerParams(
            dimension_semantics=("parallel", "parallel")),
    )(w2, bias, mask, xf)

    return out.reshape(B, N_OUT, D, H, W)


# ---------------------------------------------------------------------------
# Pure-JAX reference (for correctness check)
# ---------------------------------------------------------------------------
def input_transition_ref(x, params):
    y = lax.conv_general_dilated(
        x, params["w1"], window_strides=(1, 1, 1),
        padding=((PAD, PAD), (PAD, PAD), (PAD, PAD)),
        dimension_numbers=("NCDHW", "OIDHW", "NCDHW"))
    y = y + params["b1"][None, :, None, None, None]
    mean = params["run_mean"][None, :, None, None, None]
    var = params["run_var"][None, :, None, None, None]
    gamma = params["gamma"][None, :, None, None, None]
    beta = params["beta"][None, :, None, None, None]
    y = (y - mean) / jnp.sqrt(var + BN_EPS) * gamma + beta
    x16 = jnp.concatenate([x] * N_OUT, axis=1)
    return jax.nn.elu(y + x16)


# ---------------------------------------------------------------------------
def _init_params(key):
    k = jax.random.split(key, 6)
    fan = 1 * KSIZE ** 3
    bnd = 1.0 / (fan ** 0.5)
    return {
        "w1": jax.random.uniform(k[0], (N_OUT, 1, KSIZE, KSIZE, KSIZE),
                                 jnp.float32, -bnd, bnd),
        "b1": jax.random.uniform(k[1], (N_OUT,), jnp.float32, -bnd, bnd),
        "gamma": jax.random.uniform(k[2], (N_OUT,), jnp.float32, 0.5, 1.5),
        "beta": jax.random.uniform(k[3], (N_OUT,), jnp.float32, -0.5, 0.5),
        "run_mean": 0.1 * jax.random.normal(k[4], (N_OUT,), jnp.float32),
        "run_var": 1.0 + 0.2 * jax.random.uniform(k[5], (N_OUT,), jnp.float32),
    }


if __name__ == "__main__":
    key = jax.random.PRNGKey(0)
    kx, kp = jax.random.split(key)

    B, C_in, D, H, W = 2, 1, 8, 8, 16      # R = 128, P = 1024 -> grid (2, 2)
    x = jax.random.normal(kx, (B, C_in, D, H, W), jnp.float32)
    params = _init_params(kp)

    out = jax.block_until_ready(input_transition(x, params))
    ref = jax.block_until_ready(input_transition_ref(x, params))

    assert out.shape == (B, N_OUT, D, H, W), out.shape
    max_err = float(jnp.max(jnp.abs(out - ref)))
    # bf16 conv operands (f32 accumulation, f32 bias/skip/ELU) -> loose tolerance
    assert jnp.allclose(out, ref, atol=5e-2, rtol=5e-2), max_err

    print("KERNEL_OK")
</pallas_src>

<mosaic_0001>
module attributes {stable_mosaic.version = 11 : i64} {
  func.func @kernel(%arg0: i32, %arg1: i32, %arg2: memref<16x160xbf16, #tpu.memory_space<vmem>>, %arg3: memref<16x1xf32, #tpu.memory_space<vmem>>, %arg4: memref<32x128xf32, #tpu.memory_space<vmem>>, %arg5: memref<1x12x128xf32, #tpu.memory_space<vmem>>, %arg6: memref<1x16x512xf32, #tpu.memory_space<vmem>>, %arg7: memref<8x32x128xbf16, #tpu.memory_space<vmem>>) attributes {dimension_semantics = [#tpu.dimension_semantics<parallel>, #tpu.dimension_semantics<parallel>], iteration_bounds = array<i64: 2, 2>, scalar_prefetch = 0 : i64, scratch_operands = 1 : i64, tpu.core_type = #tpu.core_type<tc>, window_params = [{pipeline_mode = #tpu.pipeline_mode<synchronous>, transform_indices = @transform_0, window_bounds = array<i64: 16, 160>}, {pipeline_mode = #tpu.pipeline_mode<synchronous>, transform_indices = @transform_1, window_bounds = array<i64: 16, 1>}, {pipeline_mode = #tpu.pipeline_mode<synchronous>, transform_indices = @transform_2, window_bounds = array<i64: 32, 128>}, {transform_indices = @transform_3, window_bounds = array<i64: 1, 12, 128>}, {transform_indices = @transform_4, window_bounds = array<i64: 1, 16, 512>}]} {
    %c4_i32 = arith.constant 4 : i32
    %0 = arith.muli %arg1, %c4_i32 : i32
    %c0 = arith.constant 0 : index
    %1 = arith.index_cast %0 : i32 to index
    %c0_0 = arith.constant 0 : index
    %2 = vector.load %arg5[%c0, %1, %c0_0] : memref<1x12x128xf32, #tpu.memory_space<vmem>>, vector<1x8x128xf32>
    %3 = vector.shape_cast %2 : vector<1x8x128xf32> to vector<8x128xf32>
    %cst = arith.constant 0.000000e+00 : bf16
    %4 = vector.broadcast %cst : bf16 to vector<8x7x128xbf16>
    %c0_1 = arith.constant 0 : index
    %c25 = arith.constant 25 : index
    %c0_2 = arith.constant 0 : index
    %5 = vector.load %arg7[%c0_1, %c25, %c0_2] : memref<8x32x128xbf16, #tpu.memory_space<vmem>>, vector<8x7x128xbf16>
    tpu.vector_store %arg7[%c0_1, %c25, %c0_2], %4 {strides = array<i32>} : memref<8x32x128xbf16, #tpu.memory_space<vmem>>, vector<8x7x128xbf16>,
    %6 = vector.extract_strided_slice %3 {offsets = [0, 94], sizes = [8, 34], strides = [1, 1]} : vector<8x128xf32> to vector<8x34xf32>
    %7 = vector.extract_strided_slice %3 {offsets = [0, 0], sizes = [8, 94], strides = [1, 1]} : vector<8x128xf32> to vector<8x94xf32>
    %8 = tpu.concatenate %6, %7 in 1 : vector<8x34xf32>, vector<8x94xf32> -> vector<8x128xf32>
    %c0_3 = arith.constant 0 : index
    %c0_4 = arith.constant 0 : index
    %9 = vector.load %arg4[%c0_3, %c0_4] : memref<32x128xf32, #tpu.memory_space<vmem>>, vector<1x128xf32>
    %10 = vector.broadcast %9 : vector<1x128xf32> to vector<8x128xf32>
    %11 = arith.mulf %8, %10 : vector<8x128xf32>
    %12 = arith.truncf %11 : vector<8x128xf32> to vector<8x128xbf16>
    %c0_5 = arith.constant 0 : index
    %c0_6 = arith.constant 0 : index
    %c0_7 = arith.constant 0 : index
    %13 = vector.load %arg7[%c0_5, %c0_6, %c0_7] : memref<8x32x128xbf16, #tpu.memory_space<vmem>>, vector<8x1x128xbf16>
    %14 = vector.shape_cast %13 : vector<8x1x128xbf16> to vector<8x128xbf16>
    %15 = vector.shape_cast %12 : vector<8x128xbf16> to vector<8x1x128xbf16>
    tpu.vector_store %arg7[%c0_5, %c0_6, %c0_7], %15 {strides = array<i32>} : memref<8x32x128xbf16, #tpu.memory_space<vmem>>, vector<8x1x128xbf16>,
    %16 = vector.extract_strided_slice %3 {offsets = [0, 95], sizes = [8, 33], strides = [1, 1]} : vector<8x128xf32> to vector<8x33xf32>
    %17 = vector.extract_strided_slice %3 {offsets = [0, 0], sizes = [8, 95], strides = [1, 1]} : vector<8x128xf32> to vector<8x95xf32>
    %18 = tpu.concatenate %16, %17 in 1 : vector<8x33xf32>, vector<8x95xf32> -> vector<8x128xf32>
    %c1 = arith.constant 1 : index
    %c0_8 = arith.constant 0 : index
    %19 = vector.load %arg4[%c1, %c0_8] : memref<32x128xf32, #tpu.memory_space<vmem>>, vector<1x128xf32>
    %20 = vector.broadcast %19 : vector<1x128xf32> to vector<8x128xf32>
    %21 = arith.mulf %18, %20 : vector<8x128xf32>
    %22 = arith.truncf %21 : vector<8x128xf32> to vector<8x128xbf16>
    %c0_9 = arith.constant 0 : index
    %c1_10 = arith.constant 1 : index
    %c0_11 = arith.constant 0 : index
    %23 = vector.load %arg7[%c0_9, %c1_10, %c0_11] : memref<8x32x128xbf16, #tpu.memory_space<vmem>>, vector<8x1x128xbf16>
    %24 = vector.shape_cast %23 : vector<8x1x128xbf16> to vector<8x128xbf16>
    %25 = vector.shape_cast %22 : vector<8x128xbf16> to vector<8x1x128xbf16>
    tpu.vector_store %arg7[%c0_9, %c1_10, %c0_11], %25 {strides = array<i32>} : memref<8x32x128xbf16, #tpu.memory_space<vmem>>, vector<8x1x128xbf16>,
    %26 = vector.extract_strided_slice %3 {offsets = [0, 96], sizes = [8, 32], strides = [1, 1]} : vector<8x128xf32> to vector<8x32xf32>
    %27 = vector.extract_strided_slice %3 {offsets = [0, 0], sizes = [8, 96], strides = [1, 1]} : vector<8x128xf32> to vector<8x96xf32>
    %28 = tpu.concatenate %26, %27 in 1 : vector<8x32xf32>, vector<8x96xf32> -> vector<8x128xf32>
    %c2 = arith.constant 2 : index
    %c0_12 = arith.constant 0 : index
    %29 = vector.load %arg4[%c2, %c0_12] : memref<32x128xf32, #tpu.memory_space<vmem>>, vector<1x128xf32>
    %30 = vector.broadcast %29 : vector<1x128xf32> to vector<8x128xf32>
    %31 = arith.mulf %28, %30 : vector<8x128xf32>
    %32 = arith.truncf %31 : vector<8x128xf32> to vector<8x128xbf16>
    %c0_13 = arith.constant 0 : index
    %c2_14 = arith.constant 2 : index
    %c0_15 = arith.constant 0 : index
    %33 = vector.load %arg7[%c0_13, %c2_14, %c0_15] : memref<8x32x128xbf16, #tpu.memory_space<vmem>>, vector<8x1x128xbf16>
    %34 = vector.shape_cast %33 : vector<8x1x128xbf16> to vector<8x128xbf16>
    %35 = vector.shape_cast %32 : vector<8x128xbf16> to vector<8x1x128xbf16>
    tpu.vector_store %arg7[%c0_13, %c2_14, %c0_15], %35 {strides = array<i32>} : memref<8x32x128xbf16, #tpu.memory_space<vmem>>, vector<8x1x128xbf16>,
    %36 = vector.extract_strided_slice %3 {offsets = [0, 97], sizes = [8, 31], strides = [1, 1]} : vector<8x128xf32> to vector<8x31xf32>
    %37 = vector.extract_strided_slice %3 {offsets = [0, 0], sizes = [8, 97], strides = [1, 1]} : vector<8x128xf32> to vector<8x97xf32>
    %38 = tpu.concatenate %36, %37 in 1 : vector<8x31xf32>, vector<8x97xf32> -> vector<8x128xf32>
    %c3 = arith.constant 3 : index
    %c0_16 = arith.constant 0 : index
    %39 = vector.load %arg4[%c3, %c0_16] : memref<32x128xf32, #tpu.memory_space<vmem>>, vector<1x128xf32>
    %40 = vector.broadcast %39 : vector<1x128xf32> to vector<8x128xf32>
    %41 = arith.mulf %38, %40 : vector<8x128xf32>
    %42 = arith.truncf %41 : vector<8x128xf32> to vector<8x128xbf16>
    %c0_17 = arith.constant 0 : index
    %c3_18 = arith.constant 3 : index
    %c0_19 = arith.constant 0 : index
    %43 = vector.load %arg7[%c0_17, %c3_18, %c0_19] : memref<8x32x128xbf16, #tpu.memory_space<vmem>>, vector<8x1x128xbf16>
    %44 = vector.shape_cast %43 : vector<8x1x128xbf16> to vector<8x128xbf16>
    %45 = vector.shape_cast %42 : vector<8x128xbf16> to vector<8x1x128xbf16>
    tpu.vector_store %arg7[%c0_17, %c3_18, %c0_19], %45 {strides = array<i32>} : memref<8x32x128xbf16, #tpu.memory_space<vmem>>, vector<8x1x128xbf16>,
    %46 = vector.extract_strided_slice %3 {offsets = [0, 98], sizes = [8, 30], strides = [1, 1]} : vector<8x128xf32> to vector<8x30xf32>
    %47 = vector.extract_strided_slice %3 {offsets = [0, 0], sizes = [8, 98], strides = [1, 1]} : vector<8x128xf32> to vector<8x98xf32>
    %48 = tpu.concatenate %46, %47 in 1 : vector<8x30xf32>, vector<8x98xf32> -> vector<8x128xf32>
    %c4 = arith.constant 4 : index
    %c0_20 = arith.constant 0 : index
    %49 = vector.load %arg4[%c4, %c0_20] : memref<32x128xf32, #tpu.memory_space<vmem>>, vector<1x128xf32>
    %50 = vector.broadcast %49 : vector<1x128xf32> to vector<8x128xf32>
    %51 = arith.mulf %48, %50 : vector<8x128xf32>
    %52 = arith.truncf %51 : vector<8x128xf32> to vector<8x128xbf16>
    %c0_21 = arith.constant 0 : index
    %c4_22 = arith.constant 4 : index
    %c0_23 = arith.constant 0 : index
    %53 = vector.load %arg7[%c0_21, %c4_22, %c0_23] : memref<8x32x128xbf16, #tpu.memory_space<vmem>>, vector<8x1x128xbf16>
    %54 = vector.shape_cast %53 : vector<8x1x128xbf16> to vector<8x128xbf16>
    %55 = vector.shape_cast %52 : vector<8x128xbf16> to vector<8x1x128xbf16>
    tpu.vector_store %arg7[%c0_21, %c4_22, %c0_23], %55 {strides = array<i32>} : memref<8x32x128xbf16, #tpu.memory_space<vmem>>, vector<8x1x128xbf16>,
    %56 = vector.extract_strided_slice %3 {offsets = [0, 110], sizes = [8, 18], strides = [1, 1]} : vector<8x128xf32> to vector<8x18xf32>
    %57 = vector.extract_strided_slice %3 {offsets = [0, 0], sizes = [8, 110], strides = [1, 1]} : vector<8x128xf32> to vector<8x110xf32>
    %58 = tpu.concatenate %56, %57 in 1 : vector<8x18xf32>, vector<8x110xf32> -> vector<8x128xf32>
    %c5 = arith.constant 5 : index
    %c0_24 = arith.constant 0 : index
    %59 = vector.load %arg4[%c5, %c0_24] : memref<32x128xf32, #tpu.memory_space<vmem>>, vector<1x128xf32>
    %60 = vector.broadcast %59 : vector<1x128xf32> to vector<8x128xf32>
    %61 = arith.mulf %58, %60 : vector<8x128xf32>
    %62 = arith.truncf %61 : vector<8x128xf32> to vector<8x128xbf16>
    %c0_25 = arith.constant 0 : index
    %c5_26 = arith.constant 5 : index
    %c0_27 = arith.constant 0 : index
    %63 = vector.load %arg7[%c0_25, %c5_26, %c0_27] : memref<8x32x128xbf16, #tpu.memory_space<vmem>>, vector<8x1x128xbf16>
    %64 = vector.shape_cast %63 : vector<8x1x128xbf16> to vector<8x128xbf16>
    %65 = vector.shape_cast %62 : vector<8x128xbf16> to vector<8x1x128xbf16>
    tpu.vector_store %arg7[%c0_25, %c5_26, %c0_27], %65 {strides = array<i32>} : memref<8x32x128xbf16, #tpu.memory_space<vmem>>, vector<8x1x128xbf16>,
    %66 = vector.extract_strided_slice %3 {offsets = [0, 111], sizes = [8, 17], strides = [1, 1]} : vector<8x128xf32> to vector<8x17xf32>
    %67 = vector.extract_strided_slice %3 {offsets = [0, 0], sizes = [8, 111], strides = [1, 1]} : vector<8x128xf32> to vector<8x111xf32>
    %68 = tpu.concatenate %66, %67 in 1 : vector<8x17xf32>, vector<8x111xf32> -> vector<8x128xf32>
    %c6 = arith.constant 6 : index
    %c0_28 = arith.constant 0 : index
    %69 = vector.load %arg4[%c6, %c0_28] : memref<32x128xf32, #tpu.memory_space<vmem>>, vector<1x128xf32>
    %70 = vector.broadcast %69 : vector<1x128xf32> to vector<8x128xf32>
    %71 = arith.mulf %68, %70 : vector<8x128xf32>
    %72 = arith.truncf %71 : vector<8x128xf32> to vector<8x128xbf16>
    %c0_29 = arith.constant 0 : index
    %c6_30 = arith.constant 6 : index
    %c0_31 = arith.constant 0 : index
    %73 = vector.load %arg7[%c0_29, %c6_30, %c0_31] : memref<8x32x128xbf16, #tpu.memory_space<vmem>>, vector<8x1x128xbf16>
    %74 = vector.shape_cast %73 : vector<8x1x128xbf16> to vector<8x128xbf16>
    %75 = vector.shape_cast %72 : vector<8x128xbf16> to vector<8x1x128xbf16>
    tpu.vector_store %arg7[%c0_29, %c6_30, %c0_31], %75 {strides = array<i32>} : memref<8x32x128xbf16, #tpu.memory_space<vmem>>, vector<8x1x128xbf16>,
    %76 = vector.extract_strided_slice %3 {offsets = [0, 112], sizes = [8, 16], strides = [1, 1]} : vector<8x128xf32> to vector<8x16xf32>
    %77 = vector.extract_strided_slice %3 {offsets = [0, 0], sizes = [8, 112], strides = [1, 1]} : vector<8x128xf32> to vector<8x112xf32>
    %78 = tpu.concatenate %76, %77 in 1 : vector<8x16xf32>, vector<8x112xf32> -> vector<8x128xf32>
    %c7 = arith.constant 7 : index
    %c0_32 = arith.constant 0 : index
    %79 = vector.load %arg4[%c7, %c0_32] : memref<32x128xf32, #tpu.memory_space<vmem>>, vector<1x128xf32>
    %80 = vector.broadcast %79 : vector<1x128xf32> to vector<8x128xf32>
    %81 = arith.mulf %78, %80 : vector<8x128xf32>
    %82 = arith.truncf %81 : vector<8x128xf32> to vector<8x128xbf16>
    %c0_33 = arith.constant 0 : index
    %c7_34 = arith.constant 7 : index
    %c0_35 = arith.constant 0 : index
    %83 = vector.load %arg7[%c0_33, %c7_34, %c0_35] : memref<8x32x128xbf16, #tpu.memory_space<vmem>>, vector<8x1x128xbf16>
    %84 = vector.shape_cast %83 : vector<8x1x128xbf16> to vector<8x128xbf16>
    %85 = vector.shape_cast %82 : vector<8x128xbf16> to vector<8x1x128xbf16>
    tpu.vector_store %arg7[%c0_33, %c7_34, %c0_35], %85 {strides = array<i32>} : memref<8x32x128xbf16, #tpu.memory_space<vmem>>, vector<8x1x128xbf16>,
    %86 = vector.extract_strided_slice %3 {offsets = [0, 113], sizes = [8, 15], strides = [1, 1]} : vector<8x128xf32> to vector<8x15xf32>
    %87 = vector.extract_strided_slice %3 {offsets = [0, 0], sizes = [8, 113], strides = [1, 1]} : vector<8x128xf32> to vector<8x113xf32>
    %88 = tpu.concatenate %86, %87 in 1 : vector<8x15xf32>, vector<8x113xf32> -> vector<8x128xf32>
    %c8 = arith.constant 8 : index
    %c0_36 = arith.constant 0 : index
    %89 = vector.load %arg4[%c8, %c0_36] : memref<32x128xf32, #tpu.memory_space<vmem>>, vector<1x128xf32>
    %90 = vector.broadcast %89 : vector<1x128xf32> to vector<8x128xf32>
    %91 = arith.mulf %88, %90 : vector<8x128xf32>
    %92 = arith.truncf %91 : vector<8x128xf32> to vector<8x128xbf16>
    %c0_37 = arith.constant 0 : index
    %c8_38 = arith.constant 8 : index
    %c0_39 = arith.constant 0 : index
    %93 = vector.load %arg7[%c0_37, %c8_38, %c0_39] : memref<8x32x128xbf16, #tpu.memory_space<vmem>>, vector<8x1x128xbf16>
    %94 = vector.shape_cast %93 : vector<8x1x128xbf16> to vector<8x128xbf16>
    %95 = vector.shape_cast %92 : vector<8x128xbf16> to vector<8x1x128xbf16>
    tpu.vector_store %arg7[%c0_37, %c8_38, %c0_39], %95 {strides = array<i32>} : memref<8x32x128xbf16, #tpu.memory_space<vmem>>, vector<8x1x128xbf16>,
    %96 = vector.extract_strided_slice %3 {offsets = [0, 114], sizes = [8, 14], strides = [1, 1]} : vector<8x128xf32> to vector<8x14xf32>
    %97 = vector.extract_strided_slice %3 {offsets = [0, 0], sizes = [8, 114], strides = [1, 1]} : vector<8x128xf32> to vector<8x114xf32>
    %98 = tpu.concatenate %96, %97 in 1 : vector<8x14xf32>, vector<8x114xf32> -> vector<8x128xf32>
    %c9 = arith.constant 9 : index
    %c0_40 = arith.constant 0 : index
    %99 = vector.load %arg4[%c9, %c0_40] : memref<32x128xf32, #tpu.memory_space<vmem>>, vector<1x128xf32>
    %100 = vector.broadcast %99 : vector<1x128xf32> to vector<8x128xf32>
    %101 = arith.mulf %98, %100 : vector<8x128xf32>
    %102 = arith.truncf %101 : vector<8x128xf32> to vector<8x128xbf16>
    %c0_41 = arith.constant 0 : index
    %c9_42 = arith.constant 9 : index
    %c0_43 = arith.constant 0 : index
    %103 = vector.load %arg7[%c0_41, %c9_42, %c0_43] : memref<8x32x128xbf16, #tpu.memory_space<vmem>>, vector<8x1x128xbf16>
    %104 = vector.shape_cast %103 : vector<8x1x128xbf16> to vector<8x128xbf16>
    %105 = vector.shape_cast %102 : vector<8x128xbf16> to vector<8x1x128xbf16>
    tpu.vector_store %arg7[%c0_41, %c9_42, %c0_43], %105 {strides = array<i32>} : memref<8x32x128xbf16, #tpu.memory_space<vmem>>, vector<8x1x128xbf16>,
    %106 = vector.extract_strided_slice %3 {offsets = [0, 126], sizes = [8, 2], strides = [1, 1]} : vector<8x128xf32> to vector<8x2xf32>
    %107 = vector.extract_strided_slice %3 {offsets = [0, 0], sizes = [8, 126], strides = [1, 1]} : vector<8x128xf32> to vector<8x126xf32>
    %108 = tpu.concatenate %106, %107 in 1 : vector<8x2xf32>, vector<8x126xf32> -> vector<8x128xf32>
    %c10 = arith.constant 10 : index
    %c0_44 = arith.constant 0 : index
    %109 = vector.load %arg4[%c10, %c0_44] : memref<32x128xf32, #tpu.memory_space<vmem>>, vector<1x128xf32>
    %110 = vector.broadcast %109 : vector<1x128xf32> to vector<8x128xf32>
    %111 = arith.mulf %108, %110 : vector<8x128xf32>
    %112 = arith.truncf %111 : vector<8x128xf32> to vector<8x128xbf16>
    %c0_45 = arith.constant 0 : index
    %c10_46 = arith.constant 10 : index
    %c0_47 = arith.constant 0 : index
    %113 = vector.load %arg7[%c0_45, %c10_46, %c0_47] : memref<8x32x128xbf16, #tpu.memory_space<vmem>>, vector<8x1x128xbf16>
    %114 = vector.shape_cast %113 : vector<8x1x128xbf16> to vector<8x128xbf16>
    %115 = vector.shape_cast %112 : vector<8x128xbf16> to vector<8x1x128xbf16>
    tpu.vector_store %arg7[%c0_45, %c10_46, %c0_47], %115 {strides = array<i32>} : memref<8x32x128xbf16, #tpu.memory_space<vmem>>, vector<8x1x128xbf16>,
    %116 = vector.extract_strided_slice %3 {offsets = [0, 127], sizes = [8, 1], strides = [1, 1]} : vector<8x128xf32> to vector<8x1xf32>
    %117 = vector.extract_strided_slice %3 {offsets = [0, 0], sizes = [8, 127], strides = [1, 1]} : vector<8x128xf32> to vector<8x127xf32>
    %118 = tpu.concatenate %116, %117 in 1 : vector<8x1xf32>, vector<8x127xf32> -> vector<8x128xf32>
    %c11 = arith.constant 11 : index
    %c0_48 = arith.constant 0 : index
    %119 = vector.load %arg4[%c11, %c0_48] : memref<32x128xf32, #tpu.memory_space<vmem>>, vector<1x128xf32>
    %120 = vector.broadcast %119 : vector<1x128xf32> to vector<8x128xf32>
    %121 = arith.mulf %118, %120 : vector<8x128xf32>
    %122 = arith.truncf %121 : vector<8x128xf32> to vector<8x128xbf16>
    %c0_49 = arith.constant 0 : index
    %c11_50 = arith.constant 11 : index
    %c0_51 = arith.constant 0 : index
    %123 = vector.load %arg7[%c0_49, %c11_50, %c0_51] : memref<8x32x128xbf16, #tpu.memory_space<vmem>>, vector<8x1x128xbf16>
    %124 = vector.shape_cast %123 : vector<8x1x128xbf16> to vector<8x128xbf16>
    %125 = vector.shape_cast %122 : vector<8x128xbf16> to vector<8x1x128xbf16>
    tpu.vector_store %arg7[%c0_49, %c11_50, %c0_51], %125 {strides = array<i32>} : memref<8x32x128xbf16, #tpu.memory_space<vmem>>, vector<8x1x128xbf16>,
    %c12 = arith.constant 12 : index
    %c0_52 = arith.constant 0 : index
    %126 = vector.load %arg4[%c12, %c0_52] : memref<32x128xf32, #tpu.memory_space<vmem>>, vector<1x128xf32>
    %127 = vector.broadcast %126 : vector<1x128xf32> to vector<8x128xf32>
    %128 = arith.mulf %3, %127 : vector<8x128xf32>
    %129 = arith.truncf %128 : vector<8x128xf32> to vector<8x128xbf16>
    %c0_53 = arith.constant 0 : index
    %c12_54 = arith.constant 12 : index
    %c0_55 = arith.constant 0 : index
    %130 = vector.load %arg7[%c0_53, %c12_54, %c0_55] : memref<8x32x128xbf16, #tpu.memory_space<vmem>>, vector<8x1x128xbf16>
    %131 = vector.shape_cast %130 : vector<8x1x128xbf16> to vector<8x128xbf16>
    %132 = vector.shape_cast %129 : vector<8x128xbf16> to vector<8x1x128xbf16>
    tpu.vector_store %arg7[%c0_53, %c12_54, %c0_55], %132 {strides = array<i32>} : memref<8x32x128xbf16, #tpu.memory_space<vmem>>, vector<8x1x128xbf16>,
    %133 = vector.extract_strided_slice %3 {offsets = [0, 1], sizes = [8, 127], strides = [1, 1]} : vector<8x128xf32> to vector<8x127xf32>
    %134 = vector.extract_strided_slice %3 {offsets = [0, 0], sizes = [8, 1], strides = [1, 1]} : vector<8x128xf32> to vector<8x1xf32>
    %135 = tpu.concatenate %133, %134 in 1 : vector<8x127xf32>, vector<8x1xf32> -> vector<8x128xf32>
    %c13 = arith.constant 13 : index
    %c0_56 = arith.constant 0 : index
    %136 = vector.load %arg4[%c13, %c0_56] : memref<32x128xf32, #tpu.memory_space<vmem>>, vector<1x128xf32>
    %137 = vector.broadcast %136 : vector<1x128xf32> to vector<8x128xf32>
    %138 = arith.mulf %135, %137 : vector<8x128xf32>
    %139 = arith.truncf %138 : vector<8x128xf32> to vector<8x128xbf16>
    %c0_57 = arith.constant 0 : index
    %c13_58 = arith.constant 13 : index
    %c0_59 = arith.constant 0 : index
    %140 = vector.load %arg7[%c0_57, %c13_58, %c0_59] : memref<8x32x128xbf16, #tpu.memory_space<vmem>>, vector<8x1x128xbf16>
    %141 = vector.shape_cast %140 : vector<8x1x128xbf16> to vector<8x128xbf16>
    %142 = vector.shape_cast %139 : vector<8x128xbf16> to vector<8x1x128xbf16>
    tpu.vector_store %arg7[%c0_57, %c13_58, %c0_59], %142 {strides = array<i32>} : memref<8x32x128xbf16, #tpu.memory_space<vmem>>, vector<8x1x128xbf16>,
    %143 = vector.extract_strided_slice %3 {offsets = [0, 2], sizes = [8, 126], strides = [1, 1]} : vector<8x128xf32> to vector<8x126xf32>
    %144 = vector.extract_strided_slice %3 {offsets = [0, 0], sizes = [8, 2], strides = [1, 1]} : vector<8x128xf32> to vector<8x2xf32>
    %145 = tpu.concatenate %143, %144 in 1 : vector<8x126xf32>, vector<8x2xf32> -> vector<8x128xf32>
    %c14 = arith.constant 14 : index
    %c0_60 = arith.constant 0 : index
    %146 = vector.load %arg4[%c14, %c0_60] : memref<32x128xf32, #tpu.memory_space<vmem>>, vector<1x128xf32>
    %147 = vector.broadcast %146 : vector<1x128xf32> to vector<8x128xf32>
    %148 = arith.mulf %145, %147 : vector<8x128xf32>
    %149 = arith.truncf %148 : vector<8x128xf32> to vector<8x128xbf16>
    %c0_61 = arith.constant 0 : index
    %c14_62 = arith.constant 14 : index
    %c0_63 = arith.constant 0 : index
    %150 = vector.load %arg7[%c0_61, %c14_62, %c0_63] : memref<8x32x128xbf16, #tpu.memory_space<vmem>>, vector<8x1x128xbf16>
    %151 = vector.shape_cast %150 : vector<8x1x128xbf16> to vector<8x128xbf16>
    %152 = vector.shape_cast %149 : vector<8x128xbf16> to vector<8x1x128xbf16>
    tpu.vector_store %arg7[%c0_61, %c14_62, %c0_63], %152 {strides = array<i32>} : memref<8x32x128xbf16, #tpu.memory_space<vmem>>, vector<8x1x128xbf16>,
    %153 = vector.extract_strided_slice %3 {offsets = [0, 14], sizes = [8, 114], strides = [1, 1]} : vector<8x128xf32> to vector<8x114xf32>
    %154 = vector.extract_strided_slice %3 {offsets = [0, 0], sizes = [8, 14], strides = [1, 1]} : vector<8x128xf32> to vector<8x14xf32>
    %155 = tpu.concatenate %153, %154 in 1 : vector<8x114xf32>, vector<8x14xf32> -> vector<8x128xf32>
    %c15 = arith.constant 15 : index
    %c0_64 = arith.constant 0 : index
    %156 = vector.load %arg4[%c15, %c0_64] : memref<32x128xf32, #tpu.memory_space<vmem>>, vector<1x128xf32>
    %157 = vector.broadcast %156 : vector<1x128xf32> to vector<8x128xf32>
    %158 = arith.mulf %155, %157 : vector<8x128xf32>
    %159 = arith.truncf %158 : vector<8x128xf32> to vector<8x128xbf16>
    %c0_65 = arith.constant 0 : index
    %c15_66 = arith.constant 15 : index
    %c0_67 = arith.constant 0 : index
    %160 = vector.load %arg7[%c0_65, %c15_66, %c0_67] : memref<8x32x128xbf16, #tpu.memory_space<vmem>>, vector<8x1x128xbf16>
    %161 = vector.shape_cast %160 : vector<8x1x128xbf16> to vector<8x128xbf16>
    %162 = vector.shape_cast %159 : vector<8x128xbf16> to vector<8x1x128xbf16>
    tpu.vector_store %arg7[%c0_65, %c15_66, %c0_67], %162 {strides = array<i32>} : memref<8x32x128xbf16, #tpu.memory_space<vmem>>, vector<8x1x128xbf16>,
    %163 = vector.extract_strided_slice %3 {offsets = [0, 15], sizes = [8, 113], strides = [1, 1]} : vector<8x128xf32> to vector<8x113xf32>
    %164 = vector.extract_strided_slice %3 {offsets = [0, 0], sizes = [8, 15], strides = [1, 1]} : vector<8x128xf32> to vector<8x15xf32>
    %165 = tpu.concatenate %163, %164 in 1 : vector<8x113xf32>, vector<8x15xf32> -> vector<8x128xf32>
    %c16 = arith.constant 16 : index
    %c0_68 = arith.constant 0 : index
    %166 = vector.load %arg4[%c16, %c0_68] : memref<32x128xf32, #tpu.memory_space<vmem>>, vector<1x128xf32>
    %167 = vector.broadcast %166 : vector<1x128xf32> to vector<8x128xf32>
    %168 = arith.mulf %165, %167 : vector<8x128xf32>
    %169 = arith.truncf %168 : vector<8x128xf32> to vector<8x128xbf16>
    %c0_69 = arith.constant 0 : index
    %c16_70 = arith.constant 16 : index
    %c0_71 = arith.constant 0 : index
    %170 = vector.load %arg7[%c0_69, %c16_70, %c0_71] : memref<8x32x128xbf16, #tpu.memory_space<vmem>>, vector<8x1x128xbf16>
    %171 = vector.shape_cast %170 : vector<8x1x128xbf16> to vector<8x128xbf16>
    %172 = vector.shape_cast %169 : vector<8x128xbf16> to vector<8x1x128xbf16>
    tpu.vector_store %arg7[%c0_69, %c16_70, %c0_71], %172 {strides = array<i32>} : memref<8x32x128xbf16, #tpu.memory_space<vmem>>, vector<8x1x128xbf16>,
    %173 = vector.extract_strided_slice %3 {offsets = [0, 16], sizes = [8, 112], strides = [1, 1]} : vector<8x128xf32> to vector<8x112xf32>
    %174 = vector.extract_strided_slice %3 {offsets = [0, 0], sizes = [8, 16], strides = [1, 1]} : vector<8x128xf32> to vector<8x16xf32>
    %175 = tpu.concatenate %173, %174 in 1 : vector<8x112xf32>, vector<8x16xf32> -> vector<8x128xf32>
    %c17 = arith.constant 17 : index
    %c0_72 = arith.constant 0 : index
    %176 = vector.load %arg4[%c17, %c0_72] : memref<32x128xf32, #tpu.memory_space<vmem>>, vector<1x128xf32>
    %177 = vector.broadcast %176 : vector<1x128xf32> to vector<8x128xf32>
    %178 = arith.mulf %175, %177 : vector<8x128xf32>
    %179 = arith.truncf %178 : vector<8x128xf32> to vector<8x128xbf16>
    %c0_73 = arith.constant 0 : index
    %c17_74 = arith.constant 17 : index
    %c0_75 = arith.constant 0 : index
    %180 = vector.load %arg7[%c0_73, %c17_74, %c0_75] : memref<8x32x128xbf16, #tpu.memory_space<vmem>>, vector<8x1x128xbf16>
    %181 = vector.shape_cast %180 : vector<8x1x128xbf16> to vector<8x128xbf16>
    %182 = vector.shape_cast %179 : vector<8x128xbf16> to vector<8x1x128xbf16>
    tpu.vector_store %arg7[%c0_73, %c17_74, %c0_75], %182 {strides = array<i32>} : memref<8x32x128xbf16, #tpu.memory_space<vmem>>, vector<8x1x128xbf16>,
    %183 = vector.extract_strided_slice %3 {offsets = [0, 17], sizes = [8, 111], strides = [1, 1]} : vector<8x128xf32> to vector<8x111xf32>
    %184 = vector.extract_strided_slice %3 {offsets = [0, 0], sizes = [8, 17], strides = [1, 1]} : vector<8x128xf32> to vector<8x17xf32>
    %185 = tpu.concatenate %183, %184 in 1 : vector<8x111xf32>, vector<8x17xf32> -> vector<8x128xf32>
    %c18 = arith.constant 18 : index
    %c0_76 = arith.constant 0 : index
    %186 = vector.load %arg4[%c18, %c0_76] : memref<32x128xf32, #tpu.memory_space<vmem>>, vector<1x128xf32>
    %187 = vector.broadcast %186 : vector<1x128xf32> to vector<8x128xf32>
    %188 = arith.mulf %185, %187 : vector<8x128xf32>
    %189 = arith.truncf %188 : vector<8x128xf32> to vector<8x128xbf16>
    %c0_77 = arith.constant 0 : index
    %c18_78 = arith.constant 18 : index
    %c0_79 = arith.constant 0 : index
    %190 = vector.load %arg7[%c0_77, %c18_78, %c0_79] : memref<8x32x128xbf16, #tpu.memory_space<vmem>>, vector<8x1x128xbf16>
    %191 = vector.shape_cast %190 : vector<8x1x128xbf16> to vector<8x128xbf16>
    %192 = vector.shape_cast %189 : vector<8x128xbf16> to vector<8x1x128xbf16>
    tpu.vector_store %arg7[%c0_77, %c18_78, %c0_79], %192 {strides = array<i32>} : memref<8x32x128xbf16, #tpu.memory_space<vmem>>, vector<8x1x128xbf16>,
    %193 = vector.extract_strided_slice %3 {offsets = [0, 18], sizes = [8, 110], strides = [1, 1]} : vector<8x128xf32> to vector<8x110xf32>
    %194 = vector.extract_strided_slice %3 {offsets = [0, 0], sizes = [8, 18], strides = [1, 1]} : vector<8x128xf32> to vector<8x18xf32>
    %195 = tpu.concatenate %193, %194 in 1 : vector<8x110xf32>, vector<8x18xf32> -> vector<8x128xf32>
    %c19 = arith.constant 19 : index
    %c0_80 = arith.constant 0 : index
    %196 = vector.load %arg4[%c19, %c0_80] : memref<32x128xf32, #tpu.memory_space<vmem>>, vector<1x128xf32>
    %197 = vector.broadcast %196 : vector<1x128xf32> to vector<8x128xf32>
    %198 = arith.mulf %195, %197 : vector<8x128xf32>
    %199 = arith.truncf %198 : vector<8x128xf32> to vector<8x128xbf16>
    %c0_81 = arith.constant 0 : index
    %c19_82 = arith.constant 19 : index
    %c0_83 = arith.constant 0 : index
    %200 = vector.load %arg7[%c0_81, %c19_82, %c0_83] : memref<8x32x128xbf16, #tpu.memory_space<vmem>>, vector<8x1x128xbf16>
    %201 = vector.shape_cast %200 : vector<8x1x128xbf16> to vector<8x128xbf16>
    %202 = vector.shape_cast %199 : vector<8x128xbf16> to vector<8x1x128xbf16>
    tpu.vector_store %arg7[%c0_81, %c19_82, %c0_83], %202 {strides = array<i32>} : memref<8x32x128xbf16, #tpu.memory_space<vmem>>, vector<8x1x128xbf16>,
    %203 = vector.extract_strided_slice %3 {offsets = [0, 30], sizes = [8, 98], strides = [1, 1]} : vector<8x128xf32> to vector<8x98xf32>
    %204 = vector.extract_strided_slice %3 {offsets = [0, 0], sizes = [8, 30], strides = [1, 1]} : vector<8x128xf32> to vector<8x30xf32>
    %205 = tpu.concatenate %203, %204 in 1 : vector<8x98xf32>, vector<8x30xf32> -> vector<8x128xf32>
    %c20 = arith.constant 20 : index
    %c0_84 = arith.constant 0 : index
    %206 = vector.load %arg4[%c20, %c0_84] : memref<32x128xf32, #tpu.memory_space<vmem>>, vector<1x128xf32>
    %207 = vector.broadcast %206 : vector<1x128xf32> to vector<8x128xf32>
    %208 = arith.mulf %205, %207 : vector<8x128xf32>
    %209 = arith.truncf %208 : vector<8x128xf32> to vector<8x128xbf16>
    %c0_85 = arith.constant 0 : index
    %c20_86 = arith.constant 20 : index
    %c0_87 = arith.constant 0 : index
    %210 = vector.load %arg7[%c0_85, %c20_86, %c0_87] : memref<8x32x128xbf16, #tpu.memory_space<vmem>>, vector<8x1x128xbf16>
    %211 = vector.shape_cast %210 : vector<8x1x128xbf16> to vector<8x128xbf16>
    %212 = vector.shape_cast %209 : vector<8x128xbf16> to vector<8x1x128xbf16>
    tpu.vector_store %arg7[%c0_85, %c20_86, %c0_87], %212 {strides = array<i32>} : memref<8x32x128xbf16, #tpu.memory_space<vmem>>, vector<8x1x128xbf16>,
    %213 = vector.extract_strided_slice %3 {offsets = [0, 31], sizes = [8, 97], strides = [1, 1]} : vector<8x128xf32> to vector<8x97xf32>
    %214 = vector.extract_strided_slice %3 {offsets = [0, 0], sizes = [8, 31], strides = [1, 1]} : vector<8x128xf32> to vector<8x31xf32>
    %215 = tpu.concatenate %213, %214 in 1 : vector<8x97xf32>, vector<8x31xf32> -> vector<8x128xf32>
    %c21 = arith.constant 21 : index
    %c0_88 = arith.constant 0 : index
    %216 = vector.load %arg4[%c21, %c0_88] : memref<32x128xf32, #tpu.memory_space<vmem>>, vector<1x128xf32>
    %217 = vector.broadcast %216 : vector<1x128xf32> to vector<8x128xf32>
    %218 = arith.mulf %215, %217 : vector<8x128xf32>
    %219 = arith.truncf %218 : vector<8x128xf32> to vector<8x128xbf16>
    %c0_89 = arith.constant 0 : index
    %c21_90 = arith.constant 21 : index
    %c0_91 = arith.constant 0 : index
    %220 = vector.load %arg7[%c0_89, %c21_90, %c0_91] : memref<8x32x128xbf16, #tpu.memory_space<vmem>>, vector<8x1x128xbf16>
    %221 = vector.shape_cast %220 : vector<8x1x128xbf16> to vector<8x128xbf16>
    %222 = vector.shape_cast %219 : vector<8x128xbf16> to vector<8x1x128xbf16>
    tpu.vector_store %arg7[%c0_89, %c21_90, %c0_91], %222 {strides = array<i32>} : memref<8x32x128xbf16, #tpu.memory_space<vmem>>, vector<8x1x128xbf16>,
    %223 = vector.extract_strided_slice %3 {offsets = [0, 32], sizes = [8, 96], strides = [1, 1]} : vector<8x128xf32> to vector<8x96xf32>
    %224 = vector.extract_strided_slice %3 {offsets = [0, 0], sizes = [8, 32], strides = [1, 1]} : vector<8x128xf32> to vector<8x32xf32>
    %225 = tpu.concatenate %223, %224 in 1 : vector<8x96xf32>, vector<8x32xf32> -> vector<8x128xf32>
    %c22 = arith.constant 22 : index
    %c0_92 = arith.constant 0 : index
    %226 = vector.load %arg4[%c22, %c0_92] : memref<32x128xf32, #tpu.memory_space<vmem>>, vector<1x128xf32>
    %227 = vector.broadcast %226 : vector<1x128xf32> to vector<8x128xf32>
    %228 = arith.mulf %225, %227 : vector<8x128xf32>
    %229 = arith.truncf %228 : vector<8x128xf32> to vector<8x128xbf16>
    %c0_93 = arith.constant 0 : index
    %c22_94 = arith.constant 22 : index
    %c0_95 = arith.constant 0 : index
    %230 = vector.load %arg7[%c0_93, %c22_94, %c0_95] : memref<8x32x128xbf16, #tpu.memory_space<vmem>>, vector<8x1x128xbf16>
    %231 = vector.shape_cast %230 : vector<8x1x128xbf16> to vector<8x128xbf16>
    %232 = vector.shape_cast %229 : vector<8x128xbf16> to vector<8x1x128xbf16>
    tpu.vector_store %arg7[%c0_93, %c22_94, %c0_95], %232 {strides = array<i32>} : memref<8x32x128xbf16, #tpu.memory_space<vmem>>, vector<8x1x128xbf16>,
    %233 = vector.extract_strided_slice %3 {offsets = [0, 33], sizes = [8, 95], strides = [1, 1]} : vector<8x128xf32> to vector<8x95xf32>
    %234 = vector.extract_strided_slice %3 {offsets = [0, 0], sizes = [8, 33], strides = [1, 1]} : vector<8x128xf32> to vector<8x33xf32>
    %235 = tpu.concatenate %233, %234 in 1 : vector<8x95xf32>, vector<8x33xf32> -> vector<8x128xf32>
    %c23 = arith.constant 23 : index
    %c0_96 = arith.constant 0 : index
    %236 = vector.load %arg4[%c23, %c0_96] : memref<32x128xf32, #tpu.memory_space<vmem>>, vector<1x128xf32>
    %237 = vector.broadcast %236 : vector<1x128xf32> to vector<8x128xf32>
    %238 = arith.mulf %235, %237 : vector<8x128xf32>
    %239 = arith.truncf %238 : vector<8x128xf32> to vector<8x128xbf16>
    %c0_97 = arith.constant 0 : index
    %c23_98 = arith.constant 23 : index
    %c0_99 = arith.constant 0 : index
    %240 = vector.load %arg7[%c0_97, %c23_98, %c0_99] : memref<8x32x128xbf16, #tpu.memory_space<vmem>>, vector<8x1x128xbf16>
    %241 = vector.shape_cast %240 : vector<8x1x128xbf16> to vector<8x128xbf16>
    %242 = vector.shape_cast %239 : vector<8x128xbf16> to vector<8x1x128xbf16>
    tpu.vector_store %arg7[%c0_97, %c23_98, %c0_99], %242 {strides = array<i32>} : memref<8x32x128xbf16, #tpu.memory_space<vmem>>, vector<8x1x128xbf16>,
    %243 = vector.extract_strided_slice %3 {offsets = [0, 34], sizes = [8, 94], strides = [1, 1]} : vector<8x128xf32> to vector<8x94xf32>
    %244 = vector.extract_strided_slice %3 {offsets = [0, 0], sizes = [8, 34], strides = [1, 1]} : vector<8x128xf32> to vector<8x34xf32>
    %245 = tpu.concatenate %243, %244 in 1 : vector<8x94xf32>, vector<8x34xf32> -> vector<8x128xf32>
    %c24 = arith.constant 24 : index
    %c0_100 = arith.constant 0 : index
    %246 = vector.load %arg4[%c24, %c0_100] : memref<32x128xf32, #tpu.memory_space<vmem>>, vector<1x128xf32>
    %247 = vector.broadcast %246 : vector<1x128xf32> to vector<8x128xf32>
    %248 = arith.mulf %245, %247 : vector<8x128xf32>
    %249 = arith.truncf %248 : vector<8x128xf32> to vector<8x128xbf16>
    %c0_101 = arith.constant 0 : index
    %c24_102 = arith.constant 24 : index
    %c0_103 = arith.constant 0 : index
    %250 = vector.load %arg7[%c0_101, %c24_102, %c0_103] : memref<8x32x128xbf16, #tpu.memory_space<vmem>>, vector<8x1x128xbf16>
    %251 = vector.shape_cast %250 : vector<8x1x128xbf16> to vector<8x128xbf16>
    %252 = vector.shape_cast %249 : vector<8x128xbf16> to vector<8x1x128xbf16>
    tpu.vector_store %arg7[%c0_101, %c24_102, %c0_103], %252 {strides = array<i32>} : memref<8x32x128xbf16, #tpu.memory_space<vmem>>, vector<8x1x128xbf16>,
    %c0_104 = arith.constant 0 : index
    %c0_105 = arith.constant 0 : index
    %253 = vector.load %arg2[%c0_104, %c0_105] : memref<16x160xbf16, #tpu.memory_space<vmem>>, vector<16x160xbf16>
    %c0_106 = arith.constant 0 : index
    %c0_107 = arith.constant 0 : index
    %254 = vector.load %arg3[%c0_106, %c0_107] : memref<16x1xf32, #tpu.memory_space<vmem>>, vector<16x1xf32>
    %c0_108 = arith.constant 0 : index
    %c0_109 = arith.constant 0 : index
    %c0_110 = arith.constant 0 : index
    %255 = vector.load %arg7[%c0_108, %c0_109, %c0_110] : memref<8x32x128xbf16, #tpu.memory_space<vmem>>, vector<5x32x128xbf16>
    %256 = vector.shape_cast %255 : vector<5x32x128xbf16> to vector<160x128xbf16>
    %cst_111 = arith.constant dense<0.000000e+00> : vector<16x128xf32>
    %257 = tpu.matmul %253, %256, %cst_111 {dimension_numbers = #tpu.dot_dimension_numbers<[1], [0], [0], [1], [0, 0, 1, 1], [], []>} : vector<16x160xbf16>, vector<160x128xbf16>, vector<16x128xf32> -> vector<16x128xf32>
    %258 = vector.broadcast %254 : vector<16x1xf32> to vector<16x128xf32>
    %259 = arith.addf %257, %258 : vector<16x128xf32>
    %260 = vector.extract_strided_slice %3 {offsets = [2, 0], sizes = [1, 128], strides = [1, 1]} : vector<8x128xf32> to vector<1x128xf32>
    %261 = vector.broadcast %260 : vector<1x128xf32> to vector<16x128xf32>
    %262 = arith.addf %259, %261 : vector<16x128xf32>
    %cst_112 = arith.constant 0.000000e+00 : f32
    %263 = vector.broadcast %cst_112 : f32 to vector<16x128xf32>
    %264 = arith.cmpf ogt, %262, %263 : vector<16x128xf32>
    %cst_113 = arith.constant 0.000000e+00 : f32
    %265 = vector.broadcast %cst_113 : f32 to vector<16x128xf32>
    %266 = arith.minimumf %262, %265 : vector<16x128xf32>
    %267 = math.exp %266 : vector<16x128xf32>
    %cst_114 = arith.constant 1.000000e+00 : f32
    %268 = vector.broadcast %cst_114 : f32 to vector<16x128xf32>
    %269 = arith.subf %267, %268 : vector<16x128xf32>
    %270 = arith.select %264, %262, %269 : vector<16x128xi1>, vector<16x128xf32>
    %c0_115 = arith.constant 0 : index
    %c0_116 = arith.constant 0 : index
    %c0_117 = arith.constant 0 : index
    %271 = vector.load %arg6[%c0_115, %c0_116, %c0_117] : memref<1x16x512xf32, #tpu.memory_space<vmem>>, vector<1x16x128xf32>
    %272 = vector.shape_cast %271 : vector<1x16x128xf32> to vector<16x128xf32>
    %273 = vector.shape_cast %270 : vector<16x128xf32> to vector<1x16x128xf32>
    tpu.vector_store %arg6[%c0_115, %c0_116, %c0_117], %273 {strides = array<i32>} : memref<1x16x512xf32, #tpu.memory_space<vmem>>, vector<1x16x128xf32>,
    %c1_118 = arith.constant 1 : index
    %c0_119 = arith.constant 0 : index
    %c0_120 = arith.constant 0 : index
    %274 = vector.load %arg7[%c1_118, %c0_119, %c0_120] : memref<8x32x128xbf16, #tpu.memory_space<vmem>>, vector<5x32x128xbf16>
    %275 = vector.shape_cast %274 : vector<5x32x128xbf16> to vector<160x128xbf16>
    %cst_121 = arith.constant dense<0.000000e+00> : vector<16x128xf32>
    %276 = tpu.matmul %253, %275, %cst_121 {dimension_numbers = #tpu.dot_dimension_numbers<[1], [0], [0], [1], [0, 0, 1, 1], [], []>} : vector<16x160xbf16>, vector<160x128xbf16>, vector<16x128xf32> -> vector<16x128xf32>
    %277 = vector.broadcast %254 : vector<16x1xf32> to vector<16x128xf32>
    %278 = arith.addf %276, %277 : vector<16x128xf32>
    %279 = vector.extract_strided_slice %3 {offsets = [3, 0], sizes = [1, 128], strides = [1, 1]} : vector<8x128xf32> to vector<1x128xf32>
    %280 = vector.broadcast %279 : vector<1x128xf32> to vector<16x128xf32>
    %281 = arith.addf %278, %280 : vector<16x128xf32>
    %cst_122 = arith.constant 0.000000e+00 : f32
    %282 = vector.broadcast %cst_122 : f32 to vector<16x128xf32>
    %283 = arith.cmpf ogt, %281, %282 : vector<16x128xf32>
    %cst_123 = arith.constant 0.000000e+00 : f32
    %284 = vector.broadcast %cst_123 : f32 to vector<16x128xf32>
    %285 = arith.minimumf %281, %284 : vector<16x128xf32>
    %286 = math.exp %285 : vector<16x128xf32>
    %cst_124 = arith.constant 1.000000e+00 : f32
    %287 = vector.broadcast %cst_124 : f32 to vector<16x128xf32>
    %288 = arith.subf %286, %287 : vector<16x128xf32>
    %289 = arith.select %283, %281, %288 : vector<16x128xi1>, vector<16x128xf32>
    %c0_125 = arith.constant 0 : index
    %c0_126 = arith.constant 0 : index
    %c128 = arith.constant 128 : index
    %290 = vector.load %arg6[%c0_125, %c0_126, %c128] : memref<1x16x512xf32, #tpu.memory_space<vmem>>, vector<1x16x128xf32>
    %291 = vector.shape_cast %290 : vector<1x16x128xf32> to vector<16x128xf32>
    %292 = vector.shape_cast %289 : vector<16x128xf32> to vector<1x16x128xf32>
    tpu.vector_store %arg6[%c0_125, %c0_126, %c128], %292 {strides = array<i32>} : memref<1x16x512xf32, #tpu.memory_space<vmem>>, vector<1x16x128xf32>,
    %c2_127 = arith.constant 2 : index
    %c0_128 = arith.constant 0 : index
    %c0_129 = arith.constant 0 : index
    %293 = vector.load %arg7[%c2_127, %c0_128, %c0_129] : memref<8x32x128xbf16, #tpu.memory_space<vmem>>, vector<5x32x128xbf16>
    %294 = vector.shape_cast %293 : vector<5x32x128xbf16> to vector<160x128xbf16>
    %cst_130 = arith.constant dense<0.000000e+00> : vector<16x128xf32>
    %295 = tpu.matmul %253, %294, %cst_130 {dimension_numbers = #tpu.dot_dimension_numbers<[1], [0], [0], [1], [0, 0, 1, 1], [], []>} : vector<16x160xbf16>, vector<160x128xbf16>, vector<16x128xf32> -> vector<16x128xf32>
    %296 = vector.broadcast %254 : vector<16x1xf32> to vector<16x128xf32>
    %297 = arith.addf %295, %296 : vector<16x128xf32>
    %298 = vector.extract_strided_slice %3 {offsets = [4, 0], sizes = [1, 128], strides = [1, 1]} : vector<8x128xf32> to vector<1x128xf32>
    %299 = vector.broadcast %298 : vector<1x128xf32> to vector<16x128xf32>
    %300 = arith.addf %297, %299 : vector<16x128xf32>
    %cst_131 = arith.constant 0.000000e+00 : f32
    %301 = vector.broadcast %cst_131 : f32 to vector<16x128xf32>
    %302 = arith.cmpf ogt, %300, %301 : vector<16x128xf32>
    %cst_132 = arith.constant 0.000000e+00 : f32
    %303 = vector.broadcast %cst_132 : f32 to vector<16x128xf32>
    %304 = arith.minimumf %300, %303 : vector<16x128xf32>
    %305 = math.exp %304 : vector<16x128xf32>
    %cst_133 = arith.constant 1.000000e+00 : f32
    %306 = vector.broadcast %cst_133 : f32 to vector<16x128xf32>
    %307 = arith.subf %305, %306 : vector<16x128xf32>
    %308 = arith.select %302, %300, %307 : vector<16x128xi1>, vector<16x128xf32>
    %c0_134 = arith.constant 0 : index
    %c0_135 = arith.constant 0 : index
    %c256 = arith.constant 256 : index
    %309 = vector.load %arg6[%c0_134, %c0_135, %c256] : memref<1x16x512xf32, #tpu.memory_space<vmem>>, vector<1x16x128xf32>
    %310 = vector.shape_cast %309 : vector<1x16x128xf32> to vector<16x128xf32>
    %311 = vector.shape_cast %308 : vector<16x128xf32> to vector<1x16x128xf32>
    tpu.vector_store %arg6[%c0_134, %c0_135, %c256], %311 {strides = array<i32>} : memref<1x16x512xf32, #tpu.memory_space<vmem>>, vector<1x16x128xf32>,
    %c3_136 = arith.constant 3 : index
    %c0_137 = arith.constant 0 : index
    %c0_138 = arith.constant 0 : index
    %312 = vector.load %arg7[%c3_136, %c0_137, %c0_138] : memref<8x32x128xbf16, #tpu.memory_space<vmem>>, vector<5x32x128xbf16>
    %313 = vector.shape_cast %312 : vector<5x32x128xbf16> to vector<160x128xbf16>
    %cst_139 = arith.constant dense<0.000000e+00> : vector<16x128xf32>
    %314 = tpu.matmul %253, %313, %cst_139 {dimension_numbers = #tpu.dot_dimension_numbers<[1], [0], [0], [1], [0, 0, 1, 1], [], []>} : vector<16x160xbf16>, vector<160x128xbf16>, vector<16x128xf32> -> vector<16x128xf32>
    %315 = vector.broadcast %254 : vector<16x1xf32> to vector<16x128xf32>
    %316 = arith.addf %314, %315 : vector<16x128xf32>
    %317 = vector.extract_strided_slice %3 {offsets = [5, 0], sizes = [1, 128], strides = [1, 1]} : vector<8x128xf32> to vector<1x128xf32>
    %318 = vector.broadcast %317 : vector<1x128xf32> to vector<16x128xf32>
    %319 = arith.addf %316, %318 : vector<16x128xf32>
    %cst_140 = arith.constant 0.000000e+00 : f32
    %320 = vector.broadcast %cst_140 : f32 to vector<16x128xf32>
    %321 = arith.cmpf ogt, %319, %320 : vector<16x128xf32>
    %cst_141 = arith.constant 0.000000e+00 : f32
    %322 = vector.broadcast %cst_141 : f32 to vector<16x128xf32>
    %323 = arith.minimumf %319, %322 : vector<16x128xf32>
    %324 = math.exp %323 : vector<16x128xf32>
    %cst_142 = arith.constant 1.000000e+00 : f32
    %325 = vector.broadcast %cst_142 : f32 to vector<16x128xf32>
    %326 = arith.subf %324, %325 : vector<16x128xf32>
    %327 = arith.select %321, %319, %326 : vector<16x128xi1>, vector<16x128xf32>
    %c0_143 = arith.constant 0 : index
    %c0_144 = arith.constant 0 : index
    %c384 = arith.constant 384 : index
    %328 = vector.load %arg6[%c0_143, %c0_144, %c384] : memref<1x16x512xf32, #tpu.memory_space<vmem>>, vector<1x16x128xf32>
    %329 = vector.shape_cast %328 : vector<1x16x128xf32> to vector<16x128xf32>
    %330 = vector.shape_cast %327 : vector<16x128xf32> to vector<1x16x128xf32>
    tpu.vector_store %arg6[%c0_143, %c0_144, %c384], %330 {strides = array<i32>} : memref<1x16x512xf32, #tpu.memory_space<vmem>>, vector<1x16x128xf32>,
    return
  }
  func.func @transform_0(%arg0: i32, %arg1: i32) -> (i32, i32) {
    %c0_i32 = arith.constant 0 : i32
    %c0_i32_0 = arith.constant 0 : i32
    %c0_i32_1 = arith.constant 0 : i32
    return %c0_i32, %c0_i32_0 : i32, i32
  }
  func.func @transform_1(%arg0: i32, %arg1: i32) -> (i32, i32) {
    %c0_i32 = arith.constant 0 : i32
    %c0_i32_0 = arith.constant 0 : i32
    %c0_i32_1 = arith.constant 0 : i32
    return %c0_i32, %c0_i32_0 : i32, i32
  }
  func.func @transform_2(%arg0: i32, %arg1: i32) -> (i32, i32) {
    %c0_i32 = arith.constant 0 : i32
    %c0_i32_0 = arith.constant 0 : i32
    %c0_i32_1 = arith.constant 0 : i32
    return %c0_i32, %c0_i32_0 : i32, i32
  }
  func.func @transform_3(%arg0: i32, %arg1: i32) -> (i32, i32, i32) {
    %c0_i32 = arith.constant 0 : i32
    %c0_i32_0 = arith.constant 0 : i32
    %c0_i32_1 = arith.constant 0 : i32
    return %arg0, %c0_i32, %c0_i32_0 : i32, i32, i32
  }
  func.func @transform_4(%arg0: i32, %arg1: i32) -> (i32, i32, i32) {
    %c0_i32 = arith.constant 0 : i32
    %c0_i32_0 = arith.constant 0 : i32
    return %arg0, %c0_i32, %arg1 : i32, i32, i32
  }
}

</mosaic_0001>

<bundles_post_ra>
// kernel: input_transition.1
= control target key start
LH: loop header
LB: loop body
LE: loop exit
PB: predicated region body
PF: predicated region fallthrough
CT: control target
= control target key end

     0   :  { %s4882_s15 = smov 0   ;;  %s4884_s16 = smov 0   ;;  %s6325_s0 = inlined_call_operand.vmem [shape: bf16[16,160], index: 0, kind: input, shape index: {}]   ;;  %s6326_s1 = inlined_call_operand.vmem [shape: f32[16,1], index: 1, kind: input, shape index: {}]   ;;  %s6327_s2 = inlined_call_operand.vmem [shape: f32[32,128], index: 2, kind: input, shape index: {}]   ;;  %s6328_s3 = inlined_call_operand.vmem [shape: f32[2,12,128], index: 3, kind: input, shape index: {}]   ;;  %s6329_s4 = inlined_call_operand.vmem [shape: f32[2,16,1024], index: 4, kind: output, shape index: {}]  }
   0x1   :  { %s4886_s17 = smov 0   ;;  %s4888_s18 = smov 0  }
   0x2   :  { %s4890_s19 = smov 0   ;;  %s4892_s20 = smov 0  }
   0x3   :  { %s4894_s21 = smov 0  }
   0x4 LB: > { %s23_s22 = sadd.s32 1, %s4820_s19  ;;  %s26_s23 = sadd.s32 1, %s4824_s20  ;;  %s4828_s21 = sphi %s4894_s21, %s14_s21   ;;  %s4824_s20 = sphi %s4892_s20, %s6354_s20   ;;  %s4820_s19 = sphi %s4890_s19, %s6353_s19   ;;  %s4816_s18 = sphi %s4888_s18, %s6352_s18   ;;  %s4812_s17 = sphi %s4886_s17, %s6351_s17   ;;  %s4808_s16 = sphi %s4884_s16, %s6350_s16   ;;  %s4804_s15 = sphi %s4882_s15, %s6349_s15  }
   0x5   : > { %p24_p0 = scmp.ge.s32.totalorder %s23_s22, 2  ;;  %s4434_s24 = sadd.s32 4294967295, %s4828_s21  }
   0x6   : > { %p134_p1 = scmp.ne.s32.totalorder %s4808_s16, %s4804_s15  ;;  %p135_p2 = scmp.eq.s32.totalorder %s4434_s24, 3 }
   0x7   : > { %s6356_s22 = smov (%p24_p0, %s23_s22), 0  ;;  %s6358_s23 = smov (!%p24_p0, %s26_s23), %s4824_s20 }
   0x8   : > { %s120_s25 = ssub.s32 %s4820_s19, %s6356_s22  ;;  %p28_p3 = scmp.ge.s32.totalorder %s6358_s23, 2 }
   0x9   : > { %p4438_p4 = scmp.ge.s32.totalorder %s4828_s21, 1  ;;  %p4928_p5 = por %p135_p2, %p134_p1 }
   0xa   : > { %p176_p6 = scmp.lt.s32.totalorder %s4828_s21, 5  ;;  %s6360_s23 = smov (%p28_p3, %s6358_s23), 0 }
   0xb   : > { %s119_s27 = ssub.s32 %s4824_s20, %s6360_s23  ;;  %s124_s29 = sadd.s32 1, %s4808_s16 }
   0xc   : > { %p177_p7 = pnand %p4438_p4, %p176_p6  ;;  %s121_s28 = sor.u32 %s120_s25, %s119_s27 }
   0xd   : > { %p122_p8 = scmp.eq.s32.totalorder %s121_s28, 0  ;;  %p201_p9 = scmp.lt.s32.totalorder (!%p177_p7), %s4816_s18, 1 }
   0xe   : > { %180 = sbr.rel (%p177_p7) target bundleno = 699 (0x2bb), region = 36  ;;  %s4442_s6 = sshll.u32 (!%p177_p7), %s4812_s17, 2 }
   0xf   : > { %s4939_s30 = scalar_select %p122_p8, %s4808_s16, %s124_s29  }
  0x10   : > { %s4830_s12 = smov (!%p177_p7), 98   ;;  %s4831_s13 = smov (!%p177_p7), 113  }
  0x11   : > { %s4832_s14 = smov (!%p177_p7), 96   ;;  %s4833_s24 = smov (!%p177_p7), 111  }
  0x12   : > { %s4834_s25 = smov (!%p177_p7), 32   ;;  %s4835_s27 = smov (!%p177_p7), 34  }
  0x13   : > { %s202_s5 = scalar_select %p201_p9, %s4816_s18, 1  ;;  %v4854_v1 = vmov 1966171168   ;;  %v253_v3 = vlaneseq  ;;  %vm212_vm0 = vsmask.f32 7938  ;;  %vm211_vm1 = vcmask 1043456  }
  0x14   : > { %s4836_s28 = smov 17   ;;  %s4837_s29 = smov 30   ;;  %v251_v2 = vunpack.c.l.s4 %v4854_v1  ;;  %vm4955_vm2 = vmand %vm211_vm1, %vm212_vm0  ;;  %v214_v7 = vld [vmem:[#allocation2 + $0xc] sm:$0xf]  ;;  %v4543_v8 = vld [vmem:[%s6327_s2 + $0x14] ss:$0 sm:$0xff] }
  0x15   : > { %s4628_s7 = sshll.u32 %s202_s5, 4  ;;  %s4838_s5 = smov 2   ;;  %v4952_v5 = vshrl.u32 %v253_v3, 7  ;;  %v4523_v9 = vld [vmem:[%s6327_s2 + $0x10] ss:$0 sm:$0xff]  ;;  %v215_v10 = vsel %vm4955_vm2, 0, %v214_v7 }
  0x16   : > { %s205_s10 = scalar_lea.vmem %s6328_s3, %s4628_s7  ;;  %s4839_s7 = smov 15   ;;  %v252_v4 = vunpack.c.0.s8 %v251_v2  ;;  %v4855_v11 = vmov 286326784   ;;  %216 = vst [vmem:[#allocation2 + $0xc] sm:$0xf] %v215_v10  ;;  %v217_v13 = vld [vmem:[#allocation2 + $0x1c] sm:$0xf] }
  0x17   : > { %s4949_s11 = scalar_lea.vmem %s205_s10, %s4442_s6  ;;  %s4840_s8 = smov 112   ;;  %v291_v12 = vunpack.c.l.s4 %v4855_v11  ;;  %v220_v14 = vld [vmem:[#allocation2 + $0x2c] sm:$0xf]  ;;  %v218_v16 = vsel %vm4955_vm2, 0, %v217_v13  ;;  %v223_v22 = vld [vmem:[#allocation2 + $0x3c] sm:$0xf] }
  0x18   : > { %v210_v0 = vld [vmem:[%s4949_s11] sm:$0xff]  ;;  %s4841_s9 = smov 126   ;;  %s4842_s10 = smov 97   ;;  %v226_v15 = vld [vmem:[#allocation2 + $0x4c] sm:$0xf]  ;;  %v221_v17 = vsel %vm4955_vm2, 0, %v220_v14  ;;  %v4974_v19 = vsub.s32 %v252_v4, %v4952_v5 }
  0x19   : > { %3036 = vrot.lane.b32.xlu1 %v210_v0, %s4830_s12  ;;  %2480 = vrot.lane.b32.xlu0 %v210_v0, %s4831_s13  ;;  %s4843_s12 = smov 110   ;;  %s4844_s13 = smov 94   ;;  %v227_v18 = vsel %vm4955_vm2, 0, %v226_v15  ;;  %219 = vst [vmem:[#allocation2 + $0x1c] sm:$0xf] %v218_v16  ;;  %v224_v28 = vsel %vm4955_vm2, 0, %v223_v22  ;;  %v292_v30 = vunpack.c.0.s8 %v291_v12 }
  0x1a   : > { %222 = vst [vmem:[#allocation2 + $0x2c] sm:$0xf] %v221_v17  ;;  %228 = vst [vmem:[#allocation2 + $0x4c] sm:$0xf] %v227_v18  ;;  %v229_v23 = vld [vmem:[#allocation2 + $0x5c] sm:$0xf] }
  0x1b   : > { %v232_v24 = vld [vmem:[#allocation2 + $0x6c] sm:$0xf]  ;;  %v4553_v27 = vld [vmem:[%s6327_s2 + $0x16] ss:$0 sm:$0xff]  ;;  %v230_v29 = vsel %vm4955_vm2, 0, %v229_v23  ;;  %v4997_v43 = vsub.s32 %v292_v30, %v4952_v5  ;;  %vm920_vm3 = vcmask 1042434  }
  0x1c   : > { %v4533_v31 = vld [vmem:[%s6327_s2 + $0x12] ss:$0 sm:$0xff]  ;;  %225 = vst [vmem:[#allocation2 + $0x3c] sm:$0xf] %v224_v28  ;;  %231 = vst [vmem:[#allocation2 + $0x5c] sm:$0xf] %v230_v29 }
  0x1d   : > { %3314 = vrot.lane.b32.xlu1 %v210_v0, %s4832_s14  ;;  %2758 = vrot.lane.b32.xlu0 %v210_v0, %s4833_s24  ;;  %s4845_s14 = smov 95   ;;  %s4846_s24 = smov 31   ;;  %v233_v32 = vsel %vm4955_vm2, 0, %v232_v24  ;;  %v235_v33 = vld [vmem:[#allocation2 + $0x7c] sm:$0xf]  ;;  %vm354_vm5 = vcmask 1040384  }
  0x1e   : > { %234 = vst [vmem:[#allocation2 + $0x6c] sm:$0xf] %v233_v32  ;;  %v236_v36 = vsel %vm4955_vm2, 0, %v235_v33  ;;  %vm921_vm4 = vsmask.f32 2304  ;;  %vm1203_vm9 = vcmask 1043459   ;;  %vm5566_vm15 = vmand %vm354_vm5, %vm212_vm0 }
  0x1f   : > { %237 = vst [vmem:[#allocation2 + $0x7c] sm:$0xf] %v236_v36  ;;  %vm355_vm6 = vsmask.f32 256  ;;  %vm5020_vm7 = vmand %vm920_vm3, %vm921_vm4  ;;  %v3151_v59 = vld [vmem:[#allocation2 + $0x8] sm:$0x4] }
  0x20   : > { %v3154_v4 = vld [vmem:[#allocation2 + $0x18] sm:$0x4]  ;;  %v3157_v6 = vld [vmem:[#allocation2 + $0x28] sm:$0x4]  ;;  %vm5057_vm8 = vmand %vm354_vm5, %vm355_vm6  ;;  %vm1204_vm10 = vsmask.f32 3328 }
  0x21   : > { %521 = vrot.lane.b32.xlu1 %v210_v0, %s4834_s25  ;;  %239 = vrot.lane.b32.xlu0 %v210_v0, %s4835_s27  ;;  %s4847_s25 = smov 33   ;;  %s4848_s27 = smov 16   ;;  %v3163_v7 = vld [vmem:[#allocation2 + $0x48] sm:$0x4]  ;;  %v3160_v12 = vld [vmem:[#allocation2 + $0x38] sm:$0x4]  ;;  %vm5153_vm13 = vmand %vm1203_vm9, %vm1204_vm10 }
  0x22   : > { %v3166_v13 = vld [vmem:[#allocation2 + $0x58] sm:$0x4]  ;;  %v3169_v14 = vld [vmem:[#allocation2 + $0x68] sm:$0x4]  ;;  %vm637_vm11 = vcmask 1041409   ;;  %vm524_vm6 = vcmask 261120  }
  0x23   : > { %v3172_v24 = vld [vmem:[#allocation2 + $0x78] sm:$0x4]  ;;  %vm638_vm12 = vsmask.f32 1280  ;;  %vm1062_vm0 = vsmask.f32 7946 }
  0x24   : > { %vm5184_vm14 = vmand %vm637_vm11, %vm638_vm12  ;;  %vm779_vm1 = vsmask.f32 7942  ;;  %vm1345_vm4 = vsmask.f32 7950 }
  0x25   : > { %1088 = vrot.lane.b32.xlu1 %v210_v0, %s4836_s28  ;;  %805 = vrot.lane.b32.xlu0 %v210_v0, %s4837_s29  ;;  %s4849_s28 = smov 18   ;;  %s4850_s29 = smov 1   ;;  %vm5646_vm2 = vmand %vm920_vm3, %vm1062_vm0 }
  0x26   : > { %vm5686_vm3 = vmand %vm637_vm11, %vm779_vm1 }
  0x27   : > { %vm5791_vm5 = vmand %vm1203_vm9, %vm1345_vm4 }
  0x29   : > { %1649 = vrot.lane.b32.xlu1 %v210_v0, %s4838_s5  ;;  %1371 = vrot.lane.b32.xlu0 %v210_v0, %s4839_s7  ;;  %s4851_s5 = smov 14   ;;  %s4852_s7 = smov 114  }
  0x2d   : > { %2619 = vrot.lane.b32.xlu1 %v210_v0, %s4840_s8  ;;  %2202 = vrot.lane.b32.xlu0 %v210_v0, %s4841_s9  ;;  %s4853_s8 = smov 127  }
  0x31   : > { %3175 = vrot.lane.b32.xlu1 %v210_v0, %s4842_s10  ;;  %2897 = vrot.lane.b32.xlu0 %v210_v0, %s4843_s12 }
  0x35   : > { %3592 = vrot.lane.b32.xlu1 %v210_v0, %s4844_s13  ;;  %3453 = vrot.lane.b32.xlu0 %v210_v0, %s4845_s14 }
  0x39   : > { %664 = vrot.lane.b32.xlu1 %v210_v0, %s4846_s24  ;;  %381 = vrot.lane.b32.xlu0 %v210_v0, %s4847_s25  ;;  %s198_s24 = sand.u32 1, %s4804_s15   ;;  %s4624_s15 = sshll.u32 (%p4928_p5), %s4816_s18, 4 }
  0x3a   : > { %s4439_s25 = sshll.u32 %s198_s24, 6 }
  0x3d   : > { %1230 = vrot.lane.b32.xlu1 %v210_v0, %s4848_s27  ;;  %947 = vrot.lane.b32.xlu0 %v210_v0, %s4849_s28  ;;  %s6272_s27 = scalar_lea.vmem [#allocation3], %s4439_s25  ;;  %s4333_s28 = sadd.s32 (%p4928_p5), %s4624_s15, %s4442_s6 }
  0x3e   : > { %s4625_s26 = sshll.u32 (%p4928_p5), %s4333_s28, 3 }
  0x41   : > { %1788 = vrot.lane.b32.xlu1 %v210_v0, %s4850_s29  ;;  %1510 = vrot.lane.b32.xlu0 %v210_v0, %s4851_s5 }
  0x45   : > { %2341 = vrot.lane.b32.xlu1 %v210_v0, %s4852_s7  ;;  %2063 = vrot.lane.b32.xlu0 %v210_v0, %s4853_s8  ;;  %s4335_s7 = scalar_lea.vmem (%p4928_p5), %s6329_s4, %s4625_s26 }
  0x8b   : > { %v3037_v20 = vpop.permute.xlu1 %3036  ;;  %v2481_v21 = vpop.permute.xlu0 %2480 }
  0x8c   : > { %v3044_v25 = vmul.f32 %v4543_v8, %v3037_v20  ;;  %v2488_v26 = vmul.f32 %v4523_v9, %v2481_v21 }
  0x8e   : > { %v3045_v34 = vpack.c.bf16 %v3044_v25, %v3044_v25  ;;  %v2489_v35 = vpack.c.bf16 %v2488_v26, %v2488_v26 }
  0x8f   : > { %v3315_v37 = vpop.permute.xlu1 %3314  ;;  %v2759_v38 = vpop.permute.xlu0 %2758 }
  0x90   : > { %v3053_v39 = vrot.slane %v3045_v34, %v4974_v19  ;;  %v2497_v40 = vrot.slane %v2489_v35, %v4974_v19  ;;  %v4992_v41 = vmul.f32 %v4553_v27, %v3315_v37  ;;  %v4994_v42 = vmul.f32 %v4533_v31, %v2759_v38 }
  0x92   : > { %v3054_v44 = vcombine.high %v3053_v39, %v3053_v39  ;;  %v3061_v45 = vrot.slane %v3053_v39, %v4974_v19  ;;  %v2498_v46 = vcombine.high %v2497_v40, %v2497_v40  ;;  %v5001_v47 = vrot.slane %v2497_v40, %v4974_v19 }
  0x93   : > { %v3323_v48 = vpack.c.bf16 %v4992_v41, %v4992_v41  ;;  %v2767_v49 = vpack.c.bf16 %v4994_v42, %v4994_v42  ;;  %v5044_v29 = vpop.permute.xlu1 %521  ;;  %v5046_v30 = vpop.permute.xlu0 %239 }
  0x94   : > { %v3068_v50 = vrot.slane %v3054_v44, %v4974_v19  ;;  %v3069_v51 = vcombine.high %v3061_v45, %v3061_v45  ;;  %v3072_v52 = vunpack.i.h.s16 %v3061_v45  ;;  %v4544_v53 = vpack.i.b16 %v3061_v45, %v3061_v45  ;;  %v2595_v44 = vld [vmem:[#allocation2 + $0x8] sm:$0x1]  ;;  %v2598_v45 = vld [vmem:[#allocation2 + $0x18] sm:$0x1] }
  0x95   : > { %v5009_v54 = vrot.slane %v2498_v46, %v4974_v19  ;;  %v5013_v55 = vcombine.high %v5001_v47, %v5001_v47  ;;  %v2516_v56 = vunpack.i.h.s16 %v5001_v47  ;;  %v4524_v57 = vpack.i.b16 %v5001_v47, %v5001_v47  ;;  %v2601_v46 = vld [vmem:[#allocation2 + $0x28] sm:$0x1] }
  0x96   : > { %v3070_v60 = vcombine.high %v3068_v50, %v3068_v50  ;;  %v3074_v61 = vunpack.i.h.s16 %v3068_v50  ;;  %v3076_v62 = vunpack.i.h.s16 %v3069_v51  ;;  %v3080_v63 = vpack.i.b16 %v3072_v52, %v3072_v52 }
  0x97   : > { %v4545_v0 = vpack.i.b16 %v3068_v50, %v3068_v50  ;;  %v4546_v1 = vpack.i.b16 %v3069_v51, %v3069_v51  ;;  %v3093_v2 = vrot.slane %v4544_v53, %v4997_v43  ;;  %v5027_v3 = vcombine.high %v5009_v54, %v5009_v54  ;;  %v2604_v53 = vld [vmem:[#allocation2 + $0x38] sm:$0x1] }
  0x98   : > { %v3078_v8 = vunpack.i.h.s16 %v3070_v60  ;;  %v3082_v9 = vpack.i.b16 %v3074_v61, %v3074_v61  ;;  %v3084_v10 = vpack.i.b16 %v3076_v62, %v3076_v62  ;;  %v4547_v11 = vpack.i.b16 %v3070_v60, %v3070_v60 }
  0x99   : > { %v3100_v15 = vrot.slane %v3080_v63, %v4997_v43  ;;  %v3107_v16 = vrot.slane %v4545_v0, %v4997_v43  ;;  %v3121_v17 = vrot.slane %v4546_v1, %v4997_v43  ;;  %v3152_v18 = vsel %vm5020_vm7, %v3093_v2, %v3151_v59  ;;  %v2613_v59 = vld [vmem:[#allocation2 + $0x68] sm:$0x1]  ;;  %v2610_v63 = vld [vmem:[#allocation2 + $0x58] sm:$0x1] }
  0x9a   : > { %v3086_v20 = vpack.i.b16 %v3078_v8, %v3078_v8  ;;  %v3114_v21 = vrot.slane %v3082_v9, %v4997_v43  ;;  %v3128_v22 = vrot.slane %v3084_v10, %v4997_v43  ;;  %v3135_v23 = vrot.slane %v4547_v11, %v4997_v43  ;;  %3153 = vst [vmem:[#allocation2 + $0x8] sm:$0x4] %v3152_v18  ;;  %v4443_v8 = vld [vmem:[%s6327_s2] ss:$0 sm:$0xff]  ;;  %v4473_v9 = vld [vmem:[%s6327_s2 + $0x6] ss:$0 sm:$0xff]  ;;  %v1089_v10 = vpop.permute.xlu1 %1088 }
  0x9b   : > { %v3155_v25 = vsel %vm5020_vm7, %v3100_v15, %v3154_v4  ;;  %v3158_v26 = vsel %vm5020_vm7, %v3107_v16, %v3157_v6  ;;  %v3164_v27 = vsel %vm5020_vm7, %v3121_v17, %v3163_v7  ;;  %v2518_v28 = vunpack.i.h.s16 %v5009_v54  ;;  %v4453_v4 = vld [vmem:[%s6327_s2 + $0x2] ss:$0 sm:$0xff]  ;;  %v4463_v11 = vld [vmem:[%s6327_s2 + $0x4] ss:$0 sm:$0xff] }
  0x9c   : > { %v3142_v31 = vrot.slane %v3086_v20, %v4997_v43  ;;  %3156 = vst [vmem:[#allocation2 + $0x18] sm:$0x4] %v3155_v25  ;;  %3159 = vst [vmem:[#allocation2 + $0x28] sm:$0x4] %v3158_v26  ;;  %v3161_v32 = vsel %vm5020_vm7, %v3114_v21, %v3160_v12  ;;  %v3167_v33 = vsel %vm5020_vm7, %v3128_v22, %v3166_v13  ;;  %v2520_v36 = vunpack.i.h.s16 %v5013_v55  ;;  %v806_v12 = vpop.permute.xlu0 %805 }
  0x9d   : > { %3165 = vst [vmem:[#allocation2 + $0x48] sm:$0x4] %v3164_v27  ;;  %v3170_v34 = vsel %vm5020_vm7, %v3135_v23, %v3169_v14  ;;  %3162 = vst [vmem:[#allocation2 + $0x38] sm:$0x4] %v3161_v32  ;;  %v2522_v37 = vunpack.i.h.s16 %v5027_v3  ;;  %v2524_v38 = vpack.i.b16 %v2516_v56, %v2516_v56  ;;  %v4525_v39 = vpack.i.b16 %v5009_v54, %v5009_v54  ;;  %v2607_v56 = vld [vmem:[#allocation2 + $0x48] sm:$0x1] }
  0x9e   : > { %3168 = vst [vmem:[#allocation2 + $0x58] sm:$0x4] %v3167_v33  ;;  %3171 = vst [vmem:[#allocation2 + $0x68] sm:$0x4] %v3170_v34  ;;  %v3173_v40 = vsel %vm5020_vm7, %v3142_v31, %v3172_v24  ;;  %v2526_v50 = vpack.i.b16 %v2518_v28, %v2518_v28  ;;  %v4526_v51 = vpack.i.b16 %v5013_v55, %v5013_v55  ;;  %v2616_v55 = vld [vmem:[#allocation2 + $0x78] sm:$0x1] }
  0x9f   : > { %v4527_v52 = vpack.i.b16 %v5027_v3, %v5027_v3  ;;  %3174 = vst [vmem:[#allocation2 + $0x78] sm:$0x4] %v3173_v40  ;;  %v2528_v54 = vpack.i.b16 %v2520_v36, %v2520_v36  ;;  %v2530_v60 = vpack.i.b16 %v2522_v37, %v2522_v37  ;;  %v2537_v61 = vrot.slane %v4524_v57, %v4997_v43  ;;  %v3429_v40 = vld [vmem:[#allocation2 + $0x8] sm:$0x8] }
  0xa0   : > { %v2544_v62 = vrot.slane %v2524_v38, %v4997_v43  ;;  %v2551_v0 = vrot.slane %v4525_v39, %v4997_v43  ;;  %v2558_v1 = vrot.slane %v2526_v50, %v4997_v43  ;;  %v2565_v2 = vrot.slane %v4526_v51, %v4997_v43 }
  0xa1   : > { %v2579_v3 = vrot.slane %v4527_v52, %v4997_v43  ;;  %v2572_v6 = vrot.slane %v2528_v54, %v4997_v43  ;;  %v2586_v47 = vrot.slane %v2530_v60, %v4997_v43  ;;  %v2596_v57 = vsel %vm5057_vm8, %v2537_v61, %v2595_v44  ;;  %v3435_v54 = vld [vmem:[#allocation2 + $0x28] sm:$0x8] }
  0xa2   : > { %v2599_v7 = vsel %vm5057_vm8, %v2544_v62, %v2598_v45  ;;  %2597 = vst [vmem:[#allocation2 + $0x8] sm:$0x1] %v2596_v57  ;;  %v2602_v13 = vsel %vm5057_vm8, %v2551_v0, %v2601_v46  ;;  %v2605_v14 = vsel %vm5057_vm8, %v2558_v1, %v2604_v53  ;;  %v2608_v15 = vsel %vm5057_vm8, %v2565_v2, %v2607_v56  ;;  %v3441_v60 = vld [vmem:[#allocation2 + $0x48] sm:$0x8]  ;;  %v3438_v0 = vld [vmem:[#allocation2 + $0x38] sm:$0x8] }
  0xa3   : > { %2600 = vst [vmem:[#allocation2 + $0x18] sm:$0x1] %v2599_v7  ;;  %v2614_v16 = vsel %vm5057_vm8, %v2579_v3, %v2613_v59  ;;  %2603 = vst [vmem:[#allocation2 + $0x28] sm:$0x1] %v2602_v13  ;;  %v2611_v17 = vsel %vm5057_vm8, %v2572_v6, %v2610_v63  ;;  %v2617_v18 = vsel %vm5057_vm8, %v2586_v47, %v2616_v55  ;;  %v3432_v59 = vld [vmem:[#allocation2 + $0x18] sm:$0x8] }
  0xa4   : > { %2606 = vst [vmem:[#allocation2 + $0x38] sm:$0x1] %v2605_v14  ;;  %2609 = vst [vmem:[#allocation2 + $0x48] sm:$0x1] %v2608_v15  ;;  %v3331_v20 = vrot.slane %v3323_v48, %v4974_v19  ;;  %v2775_v21 = vrot.slane %v2767_v49, %v4974_v19  ;;  %v5119_v22 = vmul.f32 %v4453_v4, %v5044_v29  ;;  %v3444_v1 = vld [vmem:[#allocation2 + $0x58] sm:$0x8] }
  0xa5   : > { %2615 = vst [vmem:[#allocation2 + $0x68] sm:$0x1] %v2614_v16  ;;  %2612 = vst [vmem:[#allocation2 + $0x58] sm:$0x1] %v2611_v17  ;;  %v5122_v23 = vmul.f32 %v4443_v8, %v5046_v30  ;;  %v5124_v24 = vmul.f32 %v4473_v9, %v1089_v10  ;;  %v5126_v25 = vmul.f32 %v4463_v11, %v806_v12  ;;  %v3447_v2 = vld [vmem:[#allocation2 + $0x68] sm:$0x8] }
  0xa6   : > { %2618 = vst [vmem:[#allocation2 + $0x78] sm:$0x1] %v2617_v18  ;;  %v3332_v26 = vcombine.high %v3331_v20, %v3331_v20  ;;  %v3339_v41 = vrot.slane %v3331_v20, %v4974_v19  ;;  %v2776_v48 = vcombine.high %v2775_v21, %v2775_v21  ;;  %v5130_v42 = vrot.slane %v2775_v21, %v4974_v19  ;;  %v3450_v10 = vld [vmem:[#allocation2 + $0x78] sm:$0x8]  ;;  %v1501_v20 = vld [vmem:[#allocation2 + $0x54] sm:$0x1] }
  0xa7   : > { %v531_v49 = vpack.c.bf16 %v5119_v22, %v5119_v22  ;;  %v248_v27 = vpack.c.bf16 %v5122_v23, %v5122_v23  ;;  %v1097_v28 = vpack.c.bf16 %v5124_v24, %v5124_v24  ;;  %v814_v29 = vpack.c.bf16 %v5126_v25, %v5126_v25 }
  0xa8   : > { %v3346_v30 = vrot.slane %v3332_v26, %v4974_v19  ;;  %v3347_v31 = vcombine.high %v3339_v41, %v3339_v41  ;;  %v3350_v32 = vunpack.i.h.s16 %v3339_v41  ;;  %v4554_v33 = vpack.i.b16 %v3339_v41, %v3339_v41 }
  0xa9   : > { %v5142_v34 = vrot.slane %v2776_v48, %v4974_v19  ;;  %v5146_v36 = vcombine.high %v5130_v42, %v5130_v42  ;;  %v2794_v37 = vunpack.i.h.s16 %v5130_v42  ;;  %v4534_v38 = vpack.i.b16 %v5130_v42, %v5130_v42 }
  0xaa   : > { %v3348_v44 = vcombine.high %v3346_v30, %v3346_v30  ;;  %v3352_v45 = vunpack.i.h.s16 %v3346_v30  ;;  %v3354_v46 = vunpack.i.h.s16 %v3347_v31  ;;  %v3358_v50 = vpack.i.b16 %v3350_v32, %v3350_v32  ;;  %v2876_v32 = vld [vmem:[#allocation2 + $0x18] sm:$0x2] }
  0xab   : > { %v4555_v51 = vpack.i.b16 %v3346_v30, %v3346_v30  ;;  %v4556_v52 = vpack.i.b16 %v3347_v31, %v3347_v31  ;;  %v3371_v53 = vrot.slane %v4554_v33, %v4997_v43  ;;  %v2792_v56 = vcombine.high %v5142_v34, %v5142_v34  ;;  %v2873_v31 = vld [vmem:[#allocation2 + $0x8] sm:$0x2] }
  0xac   : > { %v3356_v61 = vunpack.i.h.s16 %v3348_v44  ;;  %v3360_v62 = vpack.i.b16 %v3352_v45, %v3352_v45  ;;  %v3362_v63 = vpack.i.b16 %v3354_v46, %v3354_v46  ;;  %v4557_v55 = vpack.i.b16 %v3348_v44, %v3348_v44  ;;  %v2879_v33 = vld [vmem:[#allocation2 + $0x28] sm:$0x2]  ;;  %v2882_v46 = vld [vmem:[#allocation2 + $0x38] sm:$0x2] }
  0xad   : > { %v3378_v3 = vrot.slane %v3358_v50, %v4997_v43  ;;  %v3385_v4 = vrot.slane %v4555_v51, %v4997_v43  ;;  %v3399_v6 = vrot.slane %v4556_v52, %v4997_v43  ;;  %v3430_v47 = vsel %vm5153_vm13, %v3371_v53, %v3429_v40  ;;  %v2885_v50 = vld [vmem:[#allocation2 + $0x48] sm:$0x2] }
  0xae   : > { %v3364_v57 = vpack.i.b16 %v3356_v61, %v3356_v61  ;;  %v3392_v7 = vrot.slane %v3360_v62, %v4997_v43  ;;  %v3406_v8 = vrot.slane %v3362_v63, %v4997_v43  ;;  %v3413_v9 = vrot.slane %v4557_v55, %v4997_v43  ;;  %3431 = vst [vmem:[#allocation2 + $0x8] sm:$0x8] %v3430_v47  ;;  %v2891_v51 = vld [vmem:[#allocation2 + $0x68] sm:$0x2]  ;;  %v4493_v55 = vld [vmem:[%s6327_s2 + $0xa] ss:$0 sm:$0xff] }
  0xaf   : > { %v3433_v11 = vsel %vm5153_vm13, %v3378_v3, %v3432_v59  ;;  %v3436_v12 = vsel %vm5153_vm13, %v3385_v4, %v3435_v54  ;;  %v3442_v13 = vsel %vm5153_vm13, %v3399_v6, %v3441_v60  ;;  %v2796_v14 = vunpack.i.h.s16 %v5142_v34  ;;  %v2888_v59 = vld [vmem:[#allocation2 + $0x58] sm:$0x2] }
  0xb0   : > { %v3420_v15 = vrot.slane %v3364_v57, %v4997_v43  ;;  %3434 = vst [vmem:[#allocation2 + $0x18] sm:$0x8] %v3433_v11  ;;  %3437 = vst [vmem:[#allocation2 + $0x28] sm:$0x8] %v3436_v12  ;;  %v3439_v16 = vsel %vm5153_vm13, %v3392_v7, %v3438_v0  ;;  %v3445_v17 = vsel %vm5153_vm13, %v3406_v8, %v3444_v1  ;;  %v2798_v21 = vunpack.i.h.s16 %v5146_v36  ;;  %v2894_v54 = vld [vmem:[#allocation2 + $0x78] sm:$0x2]  ;;  %v1650_v0 = vpop.permute.xlu1 %1649 }
  0xb1   : > { %3443 = vst [vmem:[#allocation2 + $0x48] sm:$0x8] %v3442_v13  ;;  %v3448_v18 = vsel %vm5153_vm13, %v3413_v9, %v3447_v2  ;;  %3440 = vst [vmem:[#allocation2 + $0x38] sm:$0x8] %v3439_v16  ;;  %v2800_v26 = vunpack.i.h.s16 %v2792_v56  ;;  %v2802_v41 = vpack.i.b16 %v2794_v37, %v2794_v37  ;;  %v4535_v48 = vpack.i.b16 %v5142_v34, %v5142_v34  ;;  %v4483_v1 = vld [vmem:[%s6327_s2 + $0x8] ss:$0 sm:$0xff]  ;;  %v1372_v2 = vpop.permute.xlu0 %1371 }
  0xb2   : > { %3446 = vst [vmem:[#allocation2 + $0x58] sm:$0x8] %v3445_v17  ;;  %3449 = vst [vmem:[#allocation2 + $0x68] sm:$0x8] %v3448_v18  ;;  %v3451_v30 = vsel %vm5153_vm13, %v3420_v15, %v3450_v10  ;;  %v2804_v40 = vpack.i.b16 %v2796_v14, %v2796_v14  ;;  %v4536_v44 = vpack.i.b16 %v5146_v36, %v5146_v36 }
  0xb3   : > { %v4537_v45 = vpack.i.b16 %v2792_v56, %v2792_v56  ;;  %3452 = vst [vmem:[#allocation2 + $0x78] sm:$0x8] %v3451_v30  ;;  %v2806_v52 = vpack.i.b16 %v2798_v21, %v2798_v21  ;;  %v2808_v37 = vpack.i.b16 %v2800_v26, %v2800_v26  ;;  %v2815_v34 = vrot.slane %v4534_v38, %v4997_v43 }
  0xb4   : > { %v2822_v53 = vrot.slane %v2802_v41, %v4997_v43  ;;  %v2829_v60 = vrot.slane %v4535_v48, %v4997_v43  ;;  %v2836_v36 = vrot.slane %v2804_v40, %v4997_v43  ;;  %v2843_v56 = vrot.slane %v4536_v44, %v4997_v43  ;;  %v640_v48 = vld [vmem:[#allocation2] sm:$0x2] }
  0xb5   : > { %v2857_v61 = vrot.slane %v4537_v45, %v4997_v43  ;;  %v2850_v62 = vrot.slane %v2806_v52, %v4997_v43  ;;  %v2864_v63 = vrot.slane %v2808_v37, %v4997_v43  ;;  %v2874_v42 = vsel %vm5184_vm14, %v2815_v34, %v2873_v31  ;;  %v652_v52 = vld [vmem:[#allocation2 + $0x40] sm:$0x2] }
  0xb6   : > { %v2877_v38 = vsel %vm5184_vm14, %v2822_v53, %v2876_v32  ;;  %2875 = vst [vmem:[#allocation2 + $0x8] sm:$0x2] %v2874_v42  ;;  %v2880_v3 = vsel %vm5184_vm14, %v2829_v60, %v2879_v33  ;;  %v2883_v4 = vsel %vm5184_vm14, %v2836_v36, %v2882_v46  ;;  %v2886_v6 = vsel %vm5184_vm14, %v2843_v56, %v2885_v50  ;;  %v643_v50 = vld [vmem:[#allocation2 + $0x10] sm:$0x2]  ;;  %v658_v36 = vld [vmem:[#allocation2 + $0x60] sm:$0x2] }
  0xb7   : > { %2878 = vst [vmem:[#allocation2 + $0x18] sm:$0x2] %v2877_v38  ;;  %v2892_v47 = vsel %vm5184_vm14, %v2857_v61, %v2891_v51  ;;  %2881 = vst [vmem:[#allocation2 + $0x28] sm:$0x2] %v2880_v3  ;;  %v2889_v57 = vsel %vm5184_vm14, %v2850_v62, %v2888_v59  ;;  %v2895_v7 = vsel %vm5184_vm14, %v2864_v63, %v2894_v54  ;;  %v646_v51 = vld [vmem:[#allocation2 + $0x20] sm:$0x2] }
  0xb8   : > { %2884 = vst [vmem:[#allocation2 + $0x38] sm:$0x2] %v2883_v4  ;;  %2887 = vst [vmem:[#allocation2 + $0x48] sm:$0x2] %v2886_v6  ;;  %v539_v8 = vrot.slane %v531_v49, %v4974_v19  ;;  %v256_v9 = vrot.slane %v248_v27, %v4974_v19  ;;  %v5240_v10 = vrot.slane %v1097_v28, %v4974_v19  ;;  %v649_v54 = vld [vmem:[#allocation2 + $0x30] sm:$0x2] }
  0xb9   : > { %2893 = vst [vmem:[#allocation2 + $0x68] sm:$0x2] %v2892_v47  ;;  %2890 = vst [vmem:[#allocation2 + $0x58] sm:$0x2] %v2889_v57  ;;  %v5246_v11 = vrot.slane %v814_v29, %v4974_v19  ;;  %v5248_v22 = vmul.f32 %v4493_v55, %v1650_v0  ;;  %v5250_v49 = vmul.f32 %v4483_v1, %v1372_v2  ;;  %v655_v60 = vld [vmem:[#allocation2 + $0x50] sm:$0x2] }
  0xba   : > { %2896 = vst [vmem:[#allocation2 + $0x78] sm:$0x2] %v2895_v7  ;;  %v540_v23 = vcombine.high %v539_v8, %v539_v8  ;;  %v547_v27 = vrot.slane %v539_v8, %v4974_v19  ;;  %v257_v12 = vcombine.high %v256_v9, %v256_v9  ;;  %v5254_v13 = vrot.slane %v256_v9, %v4974_v19  ;;  %v661_v1 = vld [vmem:[#allocation2 + $0x70] sm:$0x2]  ;;  %v3574_v35 = vld [vmem:[#allocation2 + $0x28] sm:$0x8] }
  0xbb   : > { %v1106_v24 = vcombine.high %v5240_v10, %v5240_v10  ;;  %v5260_v28 = vrot.slane %v5240_v10, %v4974_v19  ;;  %v823_v25 = vcombine.high %v5246_v11, %v5246_v11  ;;  %v5266_v29 = vrot.slane %v5246_v11, %v4974_v19 }
  0xbc   : > { %v554_v14 = vrot.slane %v540_v23, %v4974_v19  ;;  %v555_v15 = vcombine.high %v547_v27, %v547_v27  ;;  %v558_v16 = vunpack.i.h.s16 %v547_v27  ;;  %v4454_v17 = vpack.i.b16 %v547_v27, %v547_v27 }
  0xbd   : > { %v5270_v18 = vrot.slane %v257_v12, %v4974_v19  ;;  %v5274_v21 = vcombine.high %v5254_v13, %v5254_v13  ;;  %v275_v26 = vunpack.i.h.s16 %v5254_v13  ;;  %v4444_v41 = vpack.i.b16 %v5254_v13, %v5254_v13 }
  0xbe   : > { %v556_v30 = vcombine.high %v554_v14, %v554_v14  ;;  %v560_v31 = vunpack.i.h.s16 %v554_v14  ;;  %v562_v32 = vunpack.i.h.s16 %v555_v15  ;;  %v566_v33 = vpack.i.b16 %v558_v16, %v558_v16  ;;  %v363_v16 = vld [vmem:[#allocation2 + $0x20] sm:$0x1] }
  0xbf   : > { %v4455_v40 = vpack.i.b16 %v554_v14, %v554_v14  ;;  %v4456_v44 = vpack.i.b16 %v555_v15, %v555_v15  ;;  %v579_v45 = vrot.slane %v4454_v17, %v4997_v43  ;;  %v273_v46 = vcombine.high %v5270_v18, %v5270_v18  ;;  %v357_v14 = vld [vmem:[#allocation2] sm:$0x1]  ;;  %v360_v15 = vld [vmem:[#allocation2 + $0x10] sm:$0x1] }
  0xc0   : > { %v564_v37 = vunpack.i.h.s16 %v556_v30  ;;  %v568_v34 = vpack.i.b16 %v560_v31, %v560_v31  ;;  %v570_v53 = vpack.i.b16 %v562_v32, %v562_v32  ;;  %v4457_v59 = vpack.i.b16 %v556_v30, %v556_v30  ;;  %v366_v31 = vld [vmem:[#allocation2 + $0x30] sm:$0x1]  ;;  %v369_v32 = vld [vmem:[#allocation2 + $0x40] sm:$0x1] }
  0xc1   : > { %v586_v56 = vrot.slane %v566_v33, %v4997_v43  ;;  %v593_v61 = vrot.slane %v4455_v40, %v4997_v43  ;;  %v607_v62 = vrot.slane %v4456_v44, %v4997_v43  ;;  %v641_v63 = vsel %vm5184_vm14, %v579_v45, %v640_v48  ;;  %v375_v33 = vld [vmem:[#allocation2 + $0x60] sm:$0x1]  ;;  %v372_v45 = vld [vmem:[#allocation2 + $0x50] sm:$0x1] }
  0xc2   : > { %v572_v42 = vpack.i.b16 %v564_v37, %v564_v37  ;;  %v600_v38 = vrot.slane %v568_v34, %v4997_v43  ;;  %v614_v55 = vrot.slane %v570_v53, %v4997_v43  ;;  %v621_v0 = vrot.slane %v4457_v59, %v4997_v43  ;;  %642 = vst [vmem:[#allocation2] sm:$0x2] %v641_v63 }
  0xc3   : > { %v644_v2 = vsel %vm5184_vm14, %v586_v56, %v643_v50  ;;  %v647_v3 = vsel %vm5184_vm14, %v593_v61, %v646_v51  ;;  %v653_v4 = vsel %vm5184_vm14, %v607_v62, %v652_v52  ;;  %v277_v6 = vunpack.i.h.s16 %v5270_v18  ;;  %v378_v50 = vld [vmem:[#allocation2 + $0x70] sm:$0x1] }
  0xc4   : > { %v628_v47 = vrot.slane %v572_v42, %v4997_v43  ;;  %645 = vst [vmem:[#allocation2 + $0x10] sm:$0x2] %v644_v2  ;;  %648 = vst [vmem:[#allocation2 + $0x20] sm:$0x2] %v647_v3  ;;  %v650_v57 = vsel %vm5184_vm14, %v600_v38, %v649_v54  ;;  %v656_v7 = vsel %vm5184_vm14, %v614_v55, %v655_v60  ;;  %v279_v9 = vunpack.i.h.s16 %v5274_v21 }
  0xc5   : > { %654 = vst [vmem:[#allocation2 + $0x40] sm:$0x2] %v653_v4  ;;  %v659_v8 = vsel %vm5184_vm14, %v621_v0, %v658_v36  ;;  %651 = vst [vmem:[#allocation2 + $0x30] sm:$0x2] %v650_v57  ;;  %v281_v23 = vunpack.i.h.s16 %v273_v46  ;;  %v283_v27 = vpack.i.b16 %v275_v26, %v275_v26  ;;  %v4445_v12 = vpack.i.b16 %v5270_v18, %v5270_v18  ;;  %v5354_v4 = vpop.permute.xlu1 %2619  ;;  %v1212_v57 = vld [vmem:[#allocation2 + $0x20] sm:$0x8] }
  0xc6   : > { %657 = vst [vmem:[#allocation2 + $0x50] sm:$0x2] %v656_v7  ;;  %660 = vst [vmem:[#allocation2 + $0x60] sm:$0x2] %v659_v8  ;;  %v662_v13 = vsel %vm5184_vm14, %v628_v47, %v661_v1  ;;  %v285_v17 = vpack.i.b16 %v277_v6, %v277_v6  ;;  %v4446_v48 = vpack.i.b16 %v5274_v21, %v5274_v21  ;;  %v1124_v42 = vunpack.i.h.s16 %v5260_v28  ;;  %v1218_v7 = vld [vmem:[#allocation2 + $0x40] sm:$0x8] }
  0xc7   : > { %v4447_v30 = vpack.i.b16 %v273_v46, %v273_v46  ;;  %663 = vst [vmem:[#allocation2 + $0x70] sm:$0x2] %v662_v13  ;;  %v287_v40 = vpack.i.b16 %v279_v9, %v279_v9  ;;  %v289_v26 = vpack.i.b16 %v281_v23, %v281_v23  ;;  %v296_v44 = vrot.slane %v4444_v41, %v4997_v43  ;;  %v1215_v13 = vld [vmem:[#allocation2 + $0x30] sm:$0x8] }
  0xc8   : > { %v303_v18 = vrot.slane %v283_v27, %v4997_v43  ;;  %v310_v51 = vrot.slane %v4445_v12, %v4997_v43  ;;  %v317_v52 = vrot.slane %v285_v17, %v4997_v43  ;;  %v324_v37 = vrot.slane %v4446_v48, %v4997_v43  ;;  %v5361_v12 = vpop.permute.xlu0 %2202 }
  0xc9   : > { %v338_v21 = vrot.slane %v4447_v30, %v4997_v43  ;;  %v331_v46 = vrot.slane %v287_v40, %v4997_v43  ;;  %v345_v34 = vrot.slane %v289_v26, %v4997_v43  ;;  %v358_v53 = vsel %vm5057_vm8, %v296_v44, %v357_v14  ;;  %v1221_v14 = vld [vmem:[#allocation2 + $0x50] sm:$0x8] }
  0xca   : > { %v361_v41 = vsel %vm5057_vm8, %v303_v18, %v360_v15  ;;  %359 = vst [vmem:[#allocation2] sm:$0x1] %v358_v53  ;;  %v364_v59 = vsel %vm5057_vm8, %v310_v51, %v363_v16  ;;  %v367_v54 = vsel %vm5057_vm8, %v317_v52, %v366_v31  ;;  %v370_v60 = vsel %vm5057_vm8, %v324_v37, %v369_v32  ;;  %v1224_v15 = vld [vmem:[#allocation2 + $0x60] sm:$0x8]  ;;  %v1227_v26 = vld [vmem:[#allocation2 + $0x70] sm:$0x8] }
  0xcb   : > { %362 = vst [vmem:[#allocation2 + $0x10] sm:$0x1] %v361_v41  ;;  %v376_v36 = vsel %vm5057_vm8, %v338_v21, %v375_v33  ;;  %365 = vst [vmem:[#allocation2 + $0x20] sm:$0x1] %v364_v59  ;;  %v373_v56 = vsel %vm5057_vm8, %v331_v46, %v372_v45  ;;  %v379_v61 = vsel %vm5057_vm8, %v345_v34, %v378_v50  ;;  %v841_v50 = vunpack.i.h.s16 %v5266_v29  ;;  %v3176_v46 = vpop.permute.xlu1 %3175 }
  0xcc   : > { %368 = vst [vmem:[#allocation2 + $0x30] sm:$0x1] %v367_v54  ;;  %371 = vst [vmem:[#allocation2 + $0x40] sm:$0x1] %v370_v60  ;;  %v1120_v62 = vrot.slane %v1106_v24, %v4974_v19  ;;  %v1121_v63 = vcombine.high %v5260_v28, %v5260_v28  ;;  %v4474_v38 = vpack.i.b16 %v5260_v28, %v5260_v28  ;;  %v1206_v24 = vld [vmem:[#allocation2] sm:$0x8] }
  0xcd   : > { %377 = vst [vmem:[#allocation2 + $0x60] sm:$0x1] %v376_v36  ;;  %374 = vst [vmem:[#allocation2 + $0x50] sm:$0x1] %v373_v56  ;;  %v5348_v55 = vrot.slane %v823_v25, %v4974_v19  ;;  %v5352_v10 = vcombine.high %v5266_v29, %v5266_v29  ;;  %v1132_v6 = vpack.i.b16 %v1124_v42, %v1124_v42  ;;  %v1209_v25 = vld [vmem:[#allocation2 + $0x10] sm:$0x8] }
  0xce   : > { %380 = vst [vmem:[#allocation2 + $0x70] sm:$0x1] %v379_v61  ;;  %v1122_v0 = vcombine.high %v1120_v62, %v1120_v62  ;;  %v1126_v1 = vunpack.i.h.s16 %v1120_v62  ;;  %v1128_v2 = vunpack.i.h.s16 %v1121_v63  ;;  %v4475_v3 = vpack.i.b16 %v1120_v62, %v1120_v62  ;;  %v923_v60 = vld [vmem:[#allocation2] sm:$0x4]  ;;  %v926_v36 = vld [vmem:[#allocation2 + $0x10] sm:$0x4] }
  0xcf   : > { %v4476_v47 = vpack.i.b16 %v1121_v63, %v1121_v63  ;;  %v1145_v28 = vrot.slane %v4474_v38, %v4997_v43  ;;  %v5359_v11 = vcombine.high %v5348_v55, %v5348_v55  ;;  %v1152_v16 = vrot.slane %v1132_v6, %v4997_v43  ;;  %v2898_v63 = vpop.permute.xlu0 %2897  ;;  %v929_v42 = vld [vmem:[#allocation2 + $0x20] sm:$0x4]  ;;  %v932_v38 = vld [vmem:[#allocation2 + $0x30] sm:$0x4] }
  0xd0   : > { %v1130_v8 = vunpack.i.h.s16 %v1122_v0  ;;  %v1134_v9 = vpack.i.b16 %v1126_v1, %v1126_v1  ;;  %v1136_v23 = vpack.i.b16 %v1128_v2, %v1128_v2  ;;  %v4477_v27 = vpack.i.b16 %v1122_v0, %v1122_v0  ;;  %v941_v6 = vld [vmem:[#allocation2 + $0x60] sm:$0x4] }
  0xd1   : > { %v1159_v17 = vrot.slane %v4475_v3, %v4997_v43  ;;  %v1173_v48 = vrot.slane %v4476_v47, %v4997_v43  ;;  %v1207_v30 = vsel %vm5153_vm13, %v1145_v28, %v1206_v24  ;;  %v1210_v44 = vsel %vm5153_vm13, %v1152_v16, %v1209_v25  ;;  %v935_v24 = vld [vmem:[#allocation2 + $0x40] sm:$0x4]  ;;  %v938_v3 = vld [vmem:[#allocation2 + $0x50] sm:$0x4]  ;;  %v4548_v16 = vld [vmem:[%s6327_s2 + $0x15] ss:$0 sm:$0xff] }
  0xd2   : > { %v1138_v31 = vpack.i.b16 %v1130_v8, %v1130_v8  ;;  %v1166_v32 = vrot.slane %v1134_v9, %v4997_v43  ;;  %v1180_v33 = vrot.slane %v1136_v23, %v4997_v43  ;;  %v1187_v40 = vrot.slane %v4477_v27, %v4997_v43  ;;  %1208 = vst [vmem:[#allocation2] sm:$0x8] %v1207_v30  ;;  %v944_v47 = vld [vmem:[#allocation2 + $0x70] sm:$0x4]  ;;  %v4528_v9 = vld [vmem:[%s6327_s2 + $0x11] ss:$0 sm:$0xff]  ;;  %v3593_v30 = vpop.permute.xlu1 %3592 }
  0xd3   : > { %v1213_v18 = vsel %vm5153_vm13, %v1159_v17, %v1212_v57  ;;  %v1219_v45 = vsel %vm5153_vm13, %v1173_v48, %v1218_v7  ;;  %1211 = vst [vmem:[#allocation2 + $0x10] sm:$0x8] %v1210_v44  ;;  %v843_v34 = vunpack.i.h.s16 %v5348_v55  ;;  %v845_v53 = vunpack.i.h.s16 %v5352_v10  ;;  %v4513_v23 = vld [vmem:[%s6327_s2 + $0xe] ss:$0 sm:$0xff]  ;;  %v4538_v17 = vld [vmem:[%s6327_s2 + $0x13] ss:$0 sm:$0xff] }
  0xd4   : > { %v1194_v51 = vrot.slane %v1138_v31, %v4997_v43  ;;  %1214 = vst [vmem:[#allocation2 + $0x20] sm:$0x8] %v1213_v18  ;;  %v1216_v52 = vsel %vm5153_vm13, %v1166_v32, %v1215_v13  ;;  %1220 = vst [vmem:[#allocation2 + $0x40] sm:$0x8] %v1219_v45  ;;  %v1222_v37 = vsel %vm5153_vm13, %v1180_v33, %v1221_v14  ;;  %v847_v41 = vunpack.i.h.s16 %v5359_v11  ;;  %v4563_v48 = vld [vmem:[%s6327_s2 + $0x18] ss:$0 sm:$0xff] }
  0xd5   : > { %v1225_v21 = vsel %vm5153_vm13, %v1187_v40, %v1224_v15  ;;  %1217 = vst [vmem:[#allocation2 + $0x30] sm:$0x8] %v1216_v52  ;;  %1223 = vst [vmem:[#allocation2 + $0x50] sm:$0x8] %v1222_v37  ;;  %v4464_v59 = vpack.i.b16 %v5266_v29, %v5266_v29  ;;  %v849_v56 = vpack.i.b16 %v841_v50, %v841_v50  ;;  %v4558_v50 = vld [vmem:[%s6327_s2 + $0x17] ss:$0 sm:$0xff] }
  0xd6   : > { %1226 = vst [vmem:[#allocation2 + $0x60] sm:$0x8] %v1225_v21  ;;  %v1228_v54 = vsel %vm5153_vm13, %v1194_v51, %v1227_v26  ;;  %v4465_v61 = vpack.i.b16 %v5348_v55, %v5348_v55  ;;  %v4466_v62 = vpack.i.b16 %v5352_v10, %v5352_v10  ;;  %v851_v0 = vpack.i.b16 %v843_v34, %v843_v34  ;;  %v3454_v51 = vpop.permute.xlu0 %3453 }
  0xd7   : > { %1229 = vst [vmem:[#allocation2 + $0x70] sm:$0x8] %v1228_v54  ;;  %v853_v1 = vpack.i.b16 %v845_v53, %v845_v53  ;;  %v4467_v29 = vpack.i.b16 %v5359_v11, %v5359_v11  ;;  %v855_v2 = vpack.i.b16 %v847_v41, %v847_v41  ;;  %v862_v28 = vrot.slane %v4464_v59, %v4997_v43 }
  0xd8   : > { %v869_v55 = vrot.slane %v849_v56, %v4997_v43  ;;  %v876_v10 = vrot.slane %v4465_v61, %v4997_v43  ;;  %v890_v25 = vrot.slane %v4466_v62, %v4997_v43  ;;  %v883_v57 = vrot.slane %v851_v0, %v4997_v43 }
  0xd9   : > { %v897_v7 = vrot.slane %v853_v1, %v4997_v43  ;;  %v904_v8 = vrot.slane %v4467_v29, %v4997_v43  ;;  %v911_v11 = vrot.slane %v855_v2, %v4997_v43  ;;  %v924_v27 = vsel %vm5020_vm7, %v862_v28, %v923_v60 }
  0xda   : > { %v927_v13 = vsel %vm5020_vm7, %v869_v55, %v926_v36  ;;  %v930_v14 = vsel %vm5020_vm7, %v876_v10, %v929_v42  ;;  %v936_v15 = vsel %vm5020_vm7, %v890_v25, %v935_v24  ;;  %925 = vst [vmem:[#allocation2] sm:$0x4] %v924_v27  ;;  %v933_v31 = vsel %vm5020_vm7, %v883_v57, %v932_v38 }
  0xdb   : > { %928 = vst [vmem:[#allocation2 + $0x10] sm:$0x4] %v927_v13  ;;  %931 = vst [vmem:[#allocation2 + $0x20] sm:$0x4] %v930_v14  ;;  %v939_v32 = vsel %vm5020_vm7, %v897_v7, %v938_v3  ;;  %v942_v33 = vsel %vm5020_vm7, %v904_v8, %v941_v6  ;;  %v945_v40 = vsel %vm5020_vm7, %v911_v11, %v944_v47  ;;  %v1764_v6 = vld [vmem:[#allocation2 + $0x4] sm:$0x2] }
  0xdc   : > { %937 = vst [vmem:[#allocation2 + $0x40] sm:$0x4] %v936_v15  ;;  %934 = vst [vmem:[#allocation2 + $0x30] sm:$0x4] %v933_v31  ;;  %v1658_v26 = vpack.c.bf16 %v5248_v22, %v5248_v22  ;;  %v1380_v44 = vpack.c.bf16 %v5250_v49, %v5250_v49  ;;  %v2627_v18 = vmul.f32 %v4528_v9, %v5354_v4  ;;  %v1767_v11 = vld [vmem:[#allocation2 + $0x14] sm:$0x2] }
  0xdd   : > { %940 = vst [vmem:[#allocation2 + $0x50] sm:$0x4] %v939_v32  ;;  %943 = vst [vmem:[#allocation2 + $0x60] sm:$0x4] %v942_v33  ;;  %v2210_v45 = vmul.f32 %v4513_v23, %v5361_v12  ;;  %v3183_v52 = vmul.f32 %v4548_v16, %v3176_v46  ;;  %v2905_v37 = vmul.f32 %v4538_v17, %v2898_v63  ;;  %v1770_v9 = vld [vmem:[#allocation2 + $0x24] sm:$0x2] }
  0xde   : > { %946 = vst [vmem:[#allocation2 + $0x70] sm:$0x4] %v945_v40  ;;  %v5446_v21 = vmul.f32 %v4563_v48, %v3593_v30  ;;  %v1666_v34 = vrot.slane %v1658_v26, %v4974_v19  ;;  %v1388_v22 = vrot.slane %v1380_v44, %v4974_v19  ;;  %v2628_v53 = vpack.c.bf16 %v2627_v18, %v2627_v18  ;;  %v1776_v23 = vld [vmem:[#allocation2 + $0x44] sm:$0x2]  ;;  %v1773_v16 = vld [vmem:[#allocation2 + $0x34] sm:$0x2] }
  0xdf   : > { %v2211_v41 = vpack.c.bf16 %v2210_v45, %v2210_v45  ;;  %v3184_v49 = vpack.c.bf16 %v3183_v52, %v3183_v52  ;;  %v2906_v59 = vpack.c.bf16 %v2905_v37, %v2905_v37  ;;  %v5452_v12 = vmul.f32 %v4558_v50, %v3454_v51  ;;  %v1779_v17 = vld [vmem:[#allocation2 + $0x54] sm:$0x2]  ;;  %v1782_v48 = vld [vmem:[#allocation2 + $0x64] sm:$0x2] }
  0xe0   : > { %v3601_v4 = vpack.c.bf16 %v5446_v21, %v5446_v21  ;;  %v1667_v54 = vcombine.high %v1666_v34, %v1666_v34  ;;  %v1674_v60 = vrot.slane %v1666_v34, %v4974_v19  ;;  %v1389_v46 = vcombine.high %v1388_v22, %v1388_v22  ;;  %v1785_v45 = vld [vmem:[#allocation2 + $0x74] sm:$0x2] }
  0xe1   : > { %v5456_v36 = vrot.slane %v1388_v22, %v4974_v19  ;;  %v5459_v56 = vrot.slane %v2628_v53, %v4974_v19  ;;  %v5462_v61 = vrot.slane %v2211_v41, %v4974_v19  ;;  %v5465_v62 = vrot.slane %v3184_v49, %v4974_v19 }
  0xe2   : > { %v5468_v63 = vrot.slane %v2906_v59, %v4974_v19  ;;  %v1681_v42 = vrot.slane %v1667_v54, %v4974_v19  ;;  %v1682_v38 = vcombine.high %v1674_v60, %v1674_v60  ;;  %v1685_v24 = vunpack.i.h.s16 %v1674_v60 }
  0xe3   : > { %v4494_v0 = vpack.i.b16 %v1674_v60, %v1674_v60  ;;  %v5472_v1 = vrot.slane %v1389_v46, %v4974_v19  ;;  %v5476_v29 = vcombine.high %v5456_v36, %v5456_v36  ;;  %v1407_v2 = vunpack.i.h.s16 %v5456_v36 }
  0xe4   : > { %v4484_v3 = vpack.i.b16 %v5456_v36, %v5456_v36  ;;  %v1683_v47 = vcombine.high %v1681_v42, %v1681_v42  ;;  %v1687_v28 = vunpack.i.h.s16 %v1681_v42  ;;  %v1689_v55 = vunpack.i.h.s16 %v1682_v38  ;;  %v1486_v36 = vld [vmem:[#allocation2 + $0x4] sm:$0x1] }
  0xe5   : > { %v1693_v10 = vpack.i.b16 %v1685_v24, %v1685_v24  ;;  %v4495_v25 = vpack.i.b16 %v1681_v42, %v1681_v42  ;;  %v4496_v57 = vpack.i.b16 %v1682_v38, %v1682_v38  ;;  %v1706_v7 = vrot.slane %v4494_v0, %v4997_v43  ;;  %v1489_v42 = vld [vmem:[#allocation2 + $0x14] sm:$0x1]  ;;  %v1492_v38 = vld [vmem:[#allocation2 + $0x24] sm:$0x1] }
  0xe6   : > { %v1405_v8 = vcombine.high %v5472_v1, %v5472_v1  ;;  %v1691_v27 = vunpack.i.h.s16 %v1683_v47  ;;  %v1695_v13 = vpack.i.b16 %v1687_v28, %v1687_v28  ;;  %v1697_v14 = vpack.i.b16 %v1689_v55, %v1689_v55  ;;  %v1498_v28 = vld [vmem:[#allocation2 + $0x44] sm:$0x1] }
  0xe7   : > { %v4497_v15 = vpack.i.b16 %v1683_v47, %v1683_v47  ;;  %v1713_v30 = vrot.slane %v1693_v10, %v4997_v43  ;;  %v1720_v31 = vrot.slane %v4495_v25, %v4997_v43  ;;  %v1734_v32 = vrot.slane %v4496_v57, %v4997_v43  ;;  %v1495_v47 = vld [vmem:[#allocation2 + $0x34] sm:$0x1]  ;;  %v1504_v55 = vld [vmem:[#allocation2 + $0x64] sm:$0x1] }
  0xe8   : > { %v1765_v33 = vsel %vm5184_vm14, %v1706_v7, %v1764_v6  ;;  %v1699_v40 = vpack.i.b16 %v1691_v27, %v1691_v27  ;;  %v1727_v26 = vrot.slane %v1695_v13, %v4997_v43  ;;  %v1741_v44 = vrot.slane %v1697_v14, %v4997_v43  ;;  %v1507_v57 = vld [vmem:[#allocation2 + $0x74] sm:$0x1] }
  0xe9   : > { %v1748_v18 = vrot.slane %v4497_v15, %v4997_v43  ;;  %1766 = vst [vmem:[#allocation2 + $0x4] sm:$0x2] %v1765_v33  ;;  %v1768_v50 = vsel %vm5184_vm14, %v1713_v30, %v1767_v11  ;;  %v1771_v51 = vsel %vm5184_vm14, %v1720_v31, %v1770_v9  ;;  %v1777_v52 = vsel %vm5184_vm14, %v1734_v32, %v1776_v23 }
  0xea   : > { %v1409_v37 = vunpack.i.h.s16 %v5472_v1  ;;  %v1755_v34 = vrot.slane %v1699_v40, %v4997_v43  ;;  %1769 = vst [vmem:[#allocation2 + $0x14] sm:$0x2] %v1768_v50  ;;  %1772 = vst [vmem:[#allocation2 + $0x24] sm:$0x2] %v1771_v51  ;;  %v1774_v22 = vsel %vm5184_vm14, %v1727_v26, %v1773_v16  ;;  %v1780_v53 = vsel %vm5184_vm14, %v1741_v44, %v1779_v17 }
  0xeb   : > { %1778 = vst [vmem:[#allocation2 + $0x44] sm:$0x2] %v1777_v52  ;;  %v1783_v41 = vsel %vm5184_vm14, %v1748_v18, %v1782_v48  ;;  %1775 = vst [vmem:[#allocation2 + $0x34] sm:$0x2] %v1774_v22  ;;  %v1411_v49 = vunpack.i.h.s16 %v5476_v29  ;;  %v1413_v59 = vunpack.i.h.s16 %v1405_v8  ;;  %v1415_v54 = vpack.i.b16 %v1407_v2, %v1407_v2 }
  0xec   : > { %1781 = vst [vmem:[#allocation2 + $0x54] sm:$0x2] %v1780_v53  ;;  %1784 = vst [vmem:[#allocation2 + $0x64] sm:$0x2] %v1783_v41  ;;  %v4485_v60 = vpack.i.b16 %v5472_v1, %v5472_v1  ;;  %v1786_v46 = vsel %vm5184_vm14, %v1755_v34, %v1785_v45  ;;  %v1417_v24 = vpack.i.b16 %v1409_v37, %v1409_v37 }
  0xed   : > { %v4486_v0 = vpack.i.b16 %v5476_v29, %v5476_v29  ;;  %v4487_v6 = vpack.i.b16 %v1405_v8, %v1405_v8  ;;  %1787 = vst [vmem:[#allocation2 + $0x74] sm:$0x2] %v1786_v46  ;;  %v1419_v10 = vpack.i.b16 %v1411_v49, %v1411_v49  ;;  %v1421_v2 = vpack.i.b16 %v1413_v59, %v1413_v59 }
  0xee   : > { %v1428_v25 = vrot.slane %v4484_v3, %v4997_v43  ;;  %v1435_v1 = vrot.slane %v1415_v54, %v4997_v43  ;;  %v1442_v7 = vrot.slane %v4485_v60, %v4997_v43  ;;  %v1449_v11 = vrot.slane %v1417_v24, %v4997_v43  ;;  %v2734_v24 = vld [vmem:[#allocation2 + $0x8] sm:$0x1] }
  0xef   : > { %v1456_v9 = vrot.slane %v4486_v0, %v4997_v43  ;;  %v1470_v29 = vrot.slane %v4487_v6, %v4997_v43  ;;  %v1463_v8 = vrot.slane %v1419_v10, %v4997_v43  ;;  %v1477_v23 = vrot.slane %v1421_v2, %v4997_v43 }
  0xf0   : > { %v1487_v27 = vsel %vm5057_vm8, %v1428_v25, %v1486_v36  ;;  %v1490_v3 = vsel %vm5057_vm8, %v1435_v1, %v1489_v42  ;;  %v1493_v13 = vsel %vm5057_vm8, %v1442_v7, %v1492_v38  ;;  %v1496_v14 = vsel %vm5057_vm8, %v1449_v11, %v1495_v47  ;;  %v2737_v1 = vld [vmem:[#allocation2 + $0x18] sm:$0x1] }
  0xf1   : > { %1488 = vst [vmem:[#allocation2 + $0x4] sm:$0x1] %v1487_v27  ;;  %1491 = vst [vmem:[#allocation2 + $0x14] sm:$0x1] %v1490_v3  ;;  %v1499_v15 = vsel %vm5057_vm8, %v1456_v9, %v1498_v28  ;;  %v1505_v16 = vsel %vm5057_vm8, %v1470_v29, %v1504_v55  ;;  %v1502_v17 = vsel %vm5057_vm8, %v1463_v8, %v1501_v20  ;;  %v2740_v20 = vld [vmem:[#allocation2 + $0x28] sm:$0x1] }
  0xf2   : > { %1494 = vst [vmem:[#allocation2 + $0x24] sm:$0x1] %v1493_v13  ;;  %1497 = vst [vmem:[#allocation2 + $0x34] sm:$0x1] %v1496_v14  ;;  %v1508_v48 = vsel %vm5057_vm8, %v1477_v23, %v1507_v57  ;;  %v2637_v30 = vcombine.high %v5459_v56, %v5459_v56  ;;  %v2644_v31 = vrot.slane %v5459_v56, %v4974_v19  ;;  %v2746_v57 = vld [vmem:[#allocation2 + $0x48] sm:$0x1] }
  0xf3   : > { %1500 = vst [vmem:[#allocation2 + $0x44] sm:$0x1] %v1499_v15  ;;  %1506 = vst [vmem:[#allocation2 + $0x64] sm:$0x1] %v1505_v16  ;;  %v2220_v32 = vcombine.high %v5462_v61, %v5462_v61  ;;  %v5545_v33 = vrot.slane %v5462_v61, %v4974_v19  ;;  %v3193_v40 = vcombine.high %v5465_v62, %v5465_v62  ;;  %v2743_v9 = vld [vmem:[#allocation2 + $0x38] sm:$0x1] }
  0xf4   : > { %1503 = vst [vmem:[#allocation2 + $0x54] sm:$0x1] %v1502_v17  ;;  %1509 = vst [vmem:[#allocation2 + $0x74] sm:$0x1] %v1508_v48  ;;  %v5551_v26 = vrot.slane %v5465_v62, %v4974_v19  ;;  %v2651_v44 = vrot.slane %v2637_v30, %v4974_v19  ;;  %v2652_v18 = vcombine.high %v2644_v31, %v2644_v31  ;;  %v2655_v56 = vunpack.i.h.s16 %v2644_v31  ;;  %v2749_v8 = vld [vmem:[#allocation2 + $0x58] sm:$0x1] }
  0xf5   : > { %v4529_v45 = vpack.i.b16 %v2644_v31, %v2644_v31  ;;  %v5555_v50 = vrot.slane %v2220_v32, %v4974_v19  ;;  %v5559_v51 = vcombine.high %v5545_v33, %v5545_v33  ;;  %v2238_v61 = vunpack.i.h.s16 %v5545_v33  ;;  %v2752_v23 = vld [vmem:[#allocation2 + $0x68] sm:$0x1]  ;;  %v2755_v16 = vld [vmem:[#allocation2 + $0x78] sm:$0x1] }
  0xf6   : > { %v4514_v52 = vpack.i.b16 %v5545_v33, %v5545_v33  ;;  %v2653_v34 = vcombine.high %v2651_v44, %v2651_v44  ;;  %v2657_v22 = vunpack.i.h.s16 %v2651_v44  ;;  %v2659_v53 = vunpack.i.h.s16 %v2652_v18 }
  0xf7   : > { %v2663_v41 = vpack.i.b16 %v2655_v56, %v2655_v56  ;;  %v4530_v49 = vpack.i.b16 %v2651_v44, %v2651_v44  ;;  %v4531_v59 = vpack.i.b16 %v2652_v18, %v2652_v18  ;;  %v2676_v54 = vrot.slane %v4529_v45, %v4997_v43  ;;  %v2317_v44 = vld [vmem:[#allocation2 + $0x4] sm:$0x8]  ;;  %v2320_v18 = vld [vmem:[#allocation2 + $0x14] sm:$0x8] }
  0xf8   : > { %v2236_v60 = vcombine.high %v5555_v50, %v5555_v50  ;;  %v2661_v46 = vunpack.i.h.s16 %v2653_v34  ;;  %v2665_v36 = vpack.i.b16 %v2657_v22, %v2657_v22  ;;  %v2667_v42 = vpack.i.b16 %v2659_v53, %v2659_v53  ;;  %v2323_v56 = vld [vmem:[#allocation2 + $0x24] sm:$0x8]  ;;  %v2326_v53 = vld [vmem:[#allocation2 + $0x34] sm:$0x8] }
  0xf9   : > { %v4532_v38 = vpack.i.b16 %v2653_v34, %v2653_v34  ;;  %v2683_v0 = vrot.slane %v2663_v41, %v4997_v43  ;;  %v2690_v6 = vrot.slane %v4530_v49, %v4997_v43  ;;  %v2704_v47 = vrot.slane %v4531_v59, %v4997_v43  ;;  %v2329_v41 = vld [vmem:[#allocation2 + $0x44] sm:$0x8] }
  0xfa   : > { %v2735_v28 = vsel %vm5566_vm15, %v2676_v54, %v2734_v24  ;;  %v2669_v55 = vpack.i.b16 %v2661_v46, %v2661_v46  ;;  %v2697_v10 = vrot.slane %v2665_v36, %v4997_v43  ;;  %v2711_v2 = vrot.slane %v2667_v42, %v4997_v43  ;;  %v2335_v49 = vld [vmem:[#allocation2 + $0x64] sm:$0x8]  ;;  %v2332_v46 = vld [vmem:[#allocation2 + $0x54] sm:$0x8] }
  0xfb   : > { %v2718_v25 = vrot.slane %v4532_v38, %v4997_v43  ;;  %2736 = vst [vmem:[#allocation2 + $0x8] sm:$0x1] %v2735_v28  ;;  %v2738_v7 = vsel %vm5566_vm15, %v2683_v0, %v2737_v1  ;;  %v2741_v11 = vsel %vm5566_vm15, %v2690_v6, %v2740_v20  ;;  %v2747_v29 = vsel %vm5566_vm15, %v2704_v47, %v2746_v57  ;;  %v2338_v36 = vld [vmem:[#allocation2 + $0x74] sm:$0x8] }
  0xfc   : > { %v2240_v27 = vunpack.i.h.s16 %v5555_v50  ;;  %v2725_v3 = vrot.slane %v2669_v55, %v4997_v43  ;;  %2739 = vst [vmem:[#allocation2 + $0x18] sm:$0x1] %v2738_v7  ;;  %2742 = vst [vmem:[#allocation2 + $0x28] sm:$0x1] %v2741_v11  ;;  %v2744_v13 = vsel %vm5566_vm15, %v2697_v10, %v2743_v9  ;;  %v2750_v14 = vsel %vm5566_vm15, %v2711_v2, %v2749_v8 }
  0xfd   : > { %2748 = vst [vmem:[#allocation2 + $0x48] sm:$0x1] %v2747_v29  ;;  %v2753_v15 = vsel %vm5566_vm15, %v2718_v25, %v2752_v23  ;;  %2745 = vst [vmem:[#allocation2 + $0x38] sm:$0x1] %v2744_v13  ;;  %v2242_v17 = vunpack.i.h.s16 %v5559_v51  ;;  %v2244_v48 = vunpack.i.h.s16 %v2236_v60  ;;  %v2246_v30 = vpack.i.b16 %v2238_v61, %v2238_v61 }
  0xfe   : > { %2751 = vst [vmem:[#allocation2 + $0x58] sm:$0x1] %v2750_v14  ;;  %2754 = vst [vmem:[#allocation2 + $0x68] sm:$0x1] %v2753_v15  ;;  %v4515_v31 = vpack.i.b16 %v5555_v50, %v5555_v50  ;;  %v2756_v32 = vsel %vm5566_vm15, %v2725_v3, %v2755_v16  ;;  %v2248_v45 = vpack.i.b16 %v2240_v27, %v2240_v27  ;;  %v3211_v20 = vunpack.i.h.s16 %v5551_v26  ;;  %v3290_v3 = vld [vmem:[#allocation2 + $0x8] sm:$0x4]  ;;  %v5652_v16 = vpop.permute.xlu1 %664 }
  0xff   : > { %v4516_v34 = vpack.i.b16 %v5559_v51, %v5559_v51  ;;  %v4517_v22 = vpack.i.b16 %v2236_v60, %v2236_v60  ;;  %2757 = vst [vmem:[#allocation2 + $0x78] sm:$0x1] %v2756_v32  ;;  %v2250_v59 = vpack.i.b16 %v2242_v17, %v2242_v17  ;;  %v2252_v61 = vpack.i.b16 %v2244_v48, %v2244_v48  ;;  %v3293_v32 = vld [vmem:[#allocation2 + $0x18] sm:$0x4] }
 0x100   : > { %v2259_v50 = vrot.slane %v4514_v52, %v4997_v43  ;;  %v2266_v54 = vrot.slane %v2246_v30, %v4997_v43  ;;  %v2273_v42 = vrot.slane %v4515_v31, %v4997_v43  ;;  %v2280_v51 = vrot.slane %v2248_v45, %v4997_v43 }
 0x101   : > { %v2287_v60 = vrot.slane %v4516_v34, %v4997_v43  ;;  %v2301_v38 = vrot.slane %v4517_v22, %v4997_v43  ;;  %v2294_v24 = vrot.slane %v2250_v59, %v4997_v43  ;;  %v2308_v0 = vrot.slane %v2252_v61, %v4997_v43 }
 0x102   : > { %v2318_v33 = vsel %vm5153_vm13, %v2259_v50, %v2317_v44  ;;  %v2321_v52 = vsel %vm5153_vm13, %v2266_v54, %v2320_v18  ;;  %v2324_v6 = vsel %vm5153_vm13, %v2273_v42, %v2323_v56  ;;  %v2327_v47 = vsel %vm5153_vm13, %v2280_v51, %v2326_v53  ;;  %v3296_v44 = vld [vmem:[#allocation2 + $0x28] sm:$0x4]  ;;  %v3299_v53 = vld [vmem:[#allocation2 + $0x38] sm:$0x4] }
 0x103   : > { %2319 = vst [vmem:[#allocation2 + $0x4] sm:$0x8] %v2318_v33  ;;  %2322 = vst [vmem:[#allocation2 + $0x14] sm:$0x8] %v2321_v52  ;;  %v2330_v28 = vsel %vm5153_vm13, %v2287_v60, %v2329_v41  ;;  %v2336_v55 = vsel %vm5153_vm13, %v2301_v38, %v2335_v49  ;;  %v2333_v10 = vsel %vm5153_vm13, %v2294_v24, %v2332_v46  ;;  %v3302_v18 = vld [vmem:[#allocation2 + $0x48] sm:$0x4]  ;;  %v5677_v60 = vpop.permute.xlu0 %381 }
 0x104   : > { %2325 = vst [vmem:[#allocation2 + $0x24] sm:$0x8] %v2324_v6  ;;  %2328 = vst [vmem:[#allocation2 + $0x34] sm:$0x8] %v2327_v47  ;;  %v2339_v2 = vsel %vm5153_vm13, %v2308_v0, %v2338_v36  ;;  %v3207_v25 = vrot.slane %v3193_v40, %v4974_v19  ;;  %v3208_v1 = vcombine.high %v5551_v26, %v5551_v26  ;;  %v3305_v41 = vld [vmem:[#allocation2 + $0x58] sm:$0x4] }
 0x105   : > { %2331 = vst [vmem:[#allocation2 + $0x44] sm:$0x8] %v2330_v28  ;;  %2337 = vst [vmem:[#allocation2 + $0x64] sm:$0x8] %v2336_v55  ;;  %v4549_v57 = vpack.i.b16 %v5551_v26, %v5551_v26  ;;  %v2915_v39 = vcombine.high %v5468_v63, %v5468_v63  ;;  %v5642_v7 = vrot.slane %v5468_v63, %v4974_v19  ;;  %v3308_v49 = vld [vmem:[#allocation2 + $0x68] sm:$0x4] }
 0x106   : > { %2334 = vst [vmem:[#allocation2 + $0x54] sm:$0x8] %v2333_v10  ;;  %2340 = vst [vmem:[#allocation2 + $0x74] sm:$0x8] %v2339_v2  ;;  %v3209_v40 = vcombine.high %v3207_v25, %v3207_v25  ;;  %v3213_v11 = vunpack.i.h.s16 %v3207_v25  ;;  %v3215_v9 = vunpack.i.h.s16 %v3208_v1  ;;  %v4550_v29 = vpack.i.b16 %v3207_v25, %v3207_v25  ;;  %v3311_v38 = vld [vmem:[#allocation2 + $0x78] sm:$0x4]  ;;  %v1231_v10 = vpop.permute.xlu1 %1230 }
 0x107   : > { %v3219_v8 = vpack.i.b16 %v3211_v20, %v3211_v20  ;;  %v4551_v23 = vpack.i.b16 %v3208_v1, %v3208_v1  ;;  %v3232_v26 = vrot.slane %v4549_v57, %v4997_v43  ;;  %v2929_v27 = vrot.slane %v2915_v39, %v4974_v19  ;;  %v4458_v39 = vld [vmem:[%s6327_s2 + $0x3] ss:$0 sm:$0xff]  ;;  %v1631_v2 = vld [vmem:[#allocation2 + $0x24] sm:$0x1] }
 0x108   : > { %v3217_v13 = vunpack.i.h.s16 %v3209_v40  ;;  %v3221_v63 = vpack.i.b16 %v3213_v11, %v3213_v11  ;;  %v3223_v14 = vpack.i.b16 %v3215_v9, %v3215_v9  ;;  %v4552_v15 = vpack.i.b16 %v3209_v40, %v3209_v40 }
 0x109   : > { %v3239_v17 = vrot.slane %v3219_v8, %v4997_v43  ;;  %v3246_v48 = vrot.slane %v4550_v29, %v4997_v43  ;;  %v3260_v30 = vrot.slane %v4551_v23, %v4997_v43  ;;  %v3291_v31 = vsel %vm5646_vm2, %v3232_v26, %v3290_v3  ;;  %v4448_v29 = vld [vmem:[%s6327_s2 + $0x1] ss:$0 sm:$0xff]  ;;  %v4478_v8 = vld [vmem:[%s6327_s2 + $0x7] ss:$0 sm:$0xff]  ;;  %v4468_v23 = vld [vmem:[%s6327_s2 + $0x5] ss:$0 sm:$0xff] }
 0x10a   : > { %v3225_v56 = vpack.i.b16 %v3217_v13, %v3217_v13  ;;  %v3253_v45 = vrot.slane %v3221_v63, %v4997_v43  ;;  %v3267_v34 = vrot.slane %v3223_v14, %v4997_v43  ;;  %v3274_v22 = vrot.slane %v4552_v15, %v4997_v43  ;;  %3292 = vst [vmem:[#allocation2 + $0x8] sm:$0x4] %v3291_v31  ;;  %v3012_v26 = vld [vmem:[#allocation2 + $0x8] sm:$0x2] }
 0x10b   : > { %v3294_v59 = vsel %vm5646_vm2, %v3239_v17, %v3293_v32  ;;  %v3297_v61 = vsel %vm5646_vm2, %v3246_v48, %v3296_v44  ;;  %v3303_v50 = vsel %vm5646_vm2, %v3260_v30, %v3302_v18  ;;  %v2930_v54 = vcombine.high %v5642_v7, %v5642_v7  ;;  %v3024_v3 = vld [vmem:[#allocation2 + $0x48] sm:$0x2]  ;;  %v3015_v17 = vld [vmem:[#allocation2 + $0x18] sm:$0x2] }
 0x10c   : > { %v3281_v46 = vrot.slane %v3225_v56, %v4997_v43  ;;  %3295 = vst [vmem:[#allocation2 + $0x18] sm:$0x4] %v3294_v59  ;;  %3298 = vst [vmem:[#allocation2 + $0x28] sm:$0x4] %v3297_v61  ;;  %v3300_v36 = vsel %vm5646_vm2, %v3253_v45, %v3299_v53  ;;  %v3306_v42 = vsel %vm5646_vm2, %v3267_v34, %v3305_v41  ;;  %v2933_v0 = vunpack.i.h.s16 %v5642_v7  ;;  %v3021_v48 = vld [vmem:[#allocation2 + $0x38] sm:$0x2]  ;;  %v948_v56 = vpop.permute.xlu0 %947 }
 0x10d   : > { %3304 = vst [vmem:[#allocation2 + $0x48] sm:$0x4] %v3303_v50  ;;  %v3309_v51 = vsel %vm5646_vm2, %v3274_v22, %v3308_v49  ;;  %3301 = vst [vmem:[#allocation2 + $0x38] sm:$0x4] %v3300_v36  ;;  %v2931_v24 = vcombine.high %v2929_v27, %v2929_v27  ;;  %v2935_v33 = vunpack.i.h.s16 %v2929_v27  ;;  %v2937_v52 = vunpack.i.h.s16 %v2930_v54  ;;  %v3027_v30 = vld [vmem:[#allocation2 + $0x58] sm:$0x2]  ;;  %v1789_v36 = vpop.permute.xlu1 %1788 }
 0x10e   : > { %3307 = vst [vmem:[#allocation2 + $0x58] sm:$0x4] %v3306_v42  ;;  %3310 = vst [vmem:[#allocation2 + $0x68] sm:$0x4] %v3309_v51  ;;  %v3312_v6 = vsel %vm5646_vm2, %v3281_v46, %v3311_v38  ;;  %v4539_v47 = vpack.i.b16 %v5642_v7, %v5642_v7  ;;  %v4540_v28 = vpack.i.b16 %v2929_v27, %v2929_v27  ;;  %v3018_v27 = vld [vmem:[#allocation2 + $0x28] sm:$0x2] }
 0x10f   : > { %v4541_v55 = vpack.i.b16 %v2930_v54, %v2930_v54  ;;  %3313 = vst [vmem:[#allocation2 + $0x78] sm:$0x4] %v3312_v6  ;;  %v2939_v25 = vunpack.i.h.s16 %v2931_v24  ;;  %v2941_v1 = vpack.i.b16 %v2933_v0, %v2933_v0  ;;  %v2943_v20 = vpack.i.b16 %v2935_v33, %v2935_v33  ;;  %v3030_v45 = vld [vmem:[#allocation2 + $0x68] sm:$0x2]  ;;  %v3033_v49 = vld [vmem:[#allocation2 + $0x78] sm:$0x2] }
 0x110   : > { %v2945_v57 = vpack.i.b16 %v2937_v52, %v2937_v52  ;;  %v4542_v40 = vpack.i.b16 %v2931_v24, %v2931_v24  ;;  %v2954_v7 = vrot.slane %v4539_v47, %v4997_v43  ;;  %v2968_v11 = vrot.slane %v4540_v28, %v4997_v43  ;;  %v4498_v46 = vld [vmem:[%s6327_s2 + $0xb] ss:$0 sm:$0xff] }
 0x111   : > { %v2982_v9 = vrot.slane %v4541_v55, %v4997_v43  ;;  %v2947_v13 = vpack.i.b16 %v2939_v25, %v2939_v25  ;;  %v2961_v63 = vrot.slane %v2941_v1, %v4997_v43  ;;  %v2975_v14 = vrot.slane %v2943_v20, %v4997_v43 }
 0x112   : > { %v2989_v15 = vrot.slane %v2945_v57, %v4997_v43  ;;  %v2996_v31 = vrot.slane %v4542_v40, %v4997_v43  ;;  %v3013_v32 = vsel %vm5686_vm3, %v2954_v7, %v3012_v26  ;;  %v3019_v44 = vsel %vm5686_vm3, %v2968_v11, %v3018_v27  ;;  %v3707_v57 = vld [vmem:[#allocation2 + $0xc] sm:$0x1]  ;;  %v3710_v26 = vld [vmem:[#allocation2 + $0x1c] sm:$0x1] }
 0x113   : > { %v3025_v18 = vsel %vm5686_vm3, %v2982_v9, %v3024_v3  ;;  %v3003_v34 = vrot.slane %v2947_v13, %v4997_v43  ;;  %3014 = vst [vmem:[#allocation2 + $0x8] sm:$0x2] %v3013_v32  ;;  %v3016_v22 = vsel %vm5686_vm3, %v2961_v63, %v3015_v17  ;;  %3020 = vst [vmem:[#allocation2 + $0x28] sm:$0x2] %v3019_v44  ;;  %v3713_v27 = vld [vmem:[#allocation2 + $0x2c] sm:$0x1] }
 0x114   : > { %v3022_v53 = vsel %vm5686_vm3, %v2975_v14, %v3021_v48  ;;  %3026 = vst [vmem:[#allocation2 + $0x48] sm:$0x2] %v3025_v18  ;;  %v3028_v41 = vsel %vm5686_vm3, %v2989_v15, %v3027_v30  ;;  %3017 = vst [vmem:[#allocation2 + $0x18] sm:$0x2] %v3016_v22  ;;  %v3031_v59 = vsel %vm5686_vm3, %v2996_v31, %v3030_v45  ;;  %v3719_v3 = vld [vmem:[#allocation2 + $0x4c] sm:$0x1] }
 0x115   : > { %3023 = vst [vmem:[#allocation2 + $0x38] sm:$0x2] %v3022_v53  ;;  %3029 = vst [vmem:[#allocation2 + $0x58] sm:$0x2] %v3028_v41  ;;  %v3609_v61 = vrot.slane %v3601_v4, %v4974_v19  ;;  %v3462_v50 = vpack.c.bf16 %v5452_v12, %v5452_v12  ;;  %v672_v54 = vmul.f32 %v4458_v39, %v5652_v16  ;;  %v3716_v17 = vld [vmem:[#allocation2 + $0x3c] sm:$0x1] }
 0x116   : > { %3032 = vst [vmem:[#allocation2 + $0x68] sm:$0x2] %v3031_v59  ;;  %v3034_v42 = vsel %vm5686_vm3, %v3003_v34, %v3033_v49  ;;  %v389_v51 = vmul.f32 %v4448_v29, %v5677_v60  ;;  %v5737_v38 = vmul.f32 %v4478_v8, %v1231_v10  ;;  %v5739_v21 = vmul.f32 %v4468_v23, %v948_v56  ;;  %v3722_v48 = vld [vmem:[#allocation2 + $0x5c] sm:$0x1]  ;;  %v3725_v30 = vld [vmem:[#allocation2 + $0x6c] sm:$0x1] }
 0x117   : > { %3035 = vst [vmem:[#allocation2 + $0x78] sm:$0x2] %v3034_v42  ;;  %v3610_v4 = vcombine.high %v3609_v61, %v3609_v61  ;;  %v3617_v12 = vrot.slane %v3609_v61, %v4974_v19  ;;  %v3470_v16 = vrot.slane %v3462_v50, %v4974_v19  ;;  %v673_v24 = vpack.c.bf16 %v672_v54, %v672_v54  ;;  %v3728_v53 = vld [vmem:[#allocation2 + $0x7c] sm:$0x1] }
 0x118   : > { %v390_v0 = vpack.c.bf16 %v389_v51, %v389_v51  ;;  %v1239_v33 = vpack.c.bf16 %v5737_v38, %v5737_v38  ;;  %v956_v52 = vpack.c.bf16 %v5739_v21, %v5739_v21  ;;  %v5747_v6 = vmul.f32 %v4498_v46, %v1789_v36 }
 0x119   : > { %v3624_v60 = vrot.slane %v3610_v4, %v4974_v19  ;;  %v3625_v47 = vcombine.high %v3617_v12, %v3617_v12  ;;  %v3628_v28 = vunpack.i.h.s16 %v3617_v12  ;;  %v4564_v55 = vpack.i.b16 %v3617_v12, %v3617_v12 }
 0x11a   : > { %v3471_v10 = vcombine.high %v3470_v16, %v3470_v16  ;;  %v5751_v25 = vrot.slane %v3470_v16, %v4974_v19  ;;  %v5754_v1 = vrot.slane %v673_v24, %v4974_v19  ;;  %v5757_v20 = vrot.slane %v390_v0, %v4974_v19 }
 0x11b   : > { %v3626_v39 = vcombine.high %v3624_v60, %v3624_v60  ;;  %v3630_v40 = vunpack.i.h.s16 %v3624_v60  ;;  %v3632_v7 = vunpack.i.h.s16 %v3625_v47  ;;  %v3636_v11 = vpack.i.b16 %v3628_v28, %v3628_v28 }
 0x11c   : > { %v4565_v9 = vpack.i.b16 %v3624_v60, %v3624_v60  ;;  %v4566_v29 = vpack.i.b16 %v3625_v47, %v3625_v47  ;;  %v3649_v8 = vrot.slane %v4564_v55, %v4997_v43  ;;  %v3485_v23 = vrot.slane %v3471_v10, %v4974_v19  ;;  %v2054_v47 = vld [vmem:[#allocation2 + $0x54] sm:$0x4] }
 0x11d   : > { %v3634_v13 = vunpack.i.h.s16 %v3626_v39  ;;  %v3638_v63 = vpack.i.b16 %v3630_v40, %v3630_v40  ;;  %v3640_v14 = vpack.i.b16 %v3632_v7, %v3632_v7  ;;  %v4567_v15 = vpack.i.b16 %v3626_v39, %v3626_v39  ;;  %v3568_v39 = vld [vmem:[#allocation2 + $0x8] sm:$0x8]  ;;  %v3571_v40 = vld [vmem:[#allocation2 + $0x18] sm:$0x8] }
 0x11e   : > { %v3656_v31 = vrot.slane %v3636_v11, %v4997_v43  ;;  %v3663_v32 = vrot.slane %v4565_v9, %v4997_v43  ;;  %v3677_v44 = vrot.slane %v4566_v29, %v4997_v43  ;;  %v3708_v18 = vsel %vm5057_vm8, %v3649_v8, %v3707_v57  ;;  %v3577_v29 = vld [vmem:[#allocation2 + $0x38] sm:$0x8]  ;;  %v3580_v8 = vld [vmem:[#allocation2 + $0x48] sm:$0x8] }
 0x11f   : > { %v3642_v56 = vpack.i.b16 %v3634_v13, %v3634_v13  ;;  %v3670_v45 = vrot.slane %v3638_v63, %v4997_v43  ;;  %v3684_v34 = vrot.slane %v3640_v14, %v4997_v43  ;;  %v3691_v22 = vrot.slane %v4567_v15, %v4997_v43  ;;  %3709 = vst [vmem:[#allocation2 + $0xc] sm:$0x1] %v3708_v18  ;;  %v3583_v13 = vld [vmem:[#allocation2 + $0x58] sm:$0x8]  ;;  %v3586_v63 = vld [vmem:[#allocation2 + $0x68] sm:$0x8] }
 0x120   : > { %v3711_v41 = vsel %vm5057_vm8, %v3656_v31, %v3710_v26  ;;  %v3714_v49 = vsel %vm5057_vm8, %v3663_v32, %v3713_v27  ;;  %v3720_v59 = vsel %vm5057_vm8, %v3677_v44, %v3719_v3  ;;  %v3486_v61 = vcombine.high %v5751_v25, %v5751_v25  ;;  %v3589_v14 = vld [vmem:[#allocation2 + $0x78] sm:$0x8] }
 0x121   : > { %v3698_v50 = vrot.slane %v3642_v56, %v4997_v43  ;;  %3712 = vst [vmem:[#allocation2 + $0x1c] sm:$0x1] %v3711_v41  ;;  %3715 = vst [vmem:[#allocation2 + $0x2c] sm:$0x1] %v3714_v49  ;;  %v3717_v54 = vsel %vm5057_vm8, %v3670_v45, %v3716_v17  ;;  %v3723_v46 = vsel %vm5057_vm8, %v3684_v34, %v3722_v48  ;;  %v3489_v51 = vunpack.i.h.s16 %v5751_v25 }
 0x122   : > { %3721 = vst [vmem:[#allocation2 + $0x4c] sm:$0x1] %v3720_v59  ;;  %v3726_v36 = vsel %vm5057_vm8, %v3691_v22, %v3725_v30  ;;  %3718 = vst [vmem:[#allocation2 + $0x3c] sm:$0x1] %v3717_v54  ;;  %v3487_v42 = vcombine.high %v3485_v23, %v3485_v23  ;;  %v3491_v4 = vunpack.i.h.s16 %v3485_v23  ;;  %v3493_v12 = vunpack.i.h.s16 %v3486_v61 }
 0x123   : > { %3724 = vst [vmem:[#allocation2 + $0x5c] sm:$0x1] %v3723_v46  ;;  %3727 = vst [vmem:[#allocation2 + $0x6c] sm:$0x1] %v3726_v36  ;;  %v3729_v16 = vsel %vm5057_vm8, %v3698_v50, %v3728_v53  ;;  %v4559_v24 = vpack.i.b16 %v5751_v25, %v5751_v25  ;;  %v4560_v0 = vpack.i.b16 %v3485_v23, %v3485_v23 }
 0x124   : > { %v4561_v60 = vpack.i.b16 %v3486_v61, %v3486_v61  ;;  %3730 = vst [vmem:[#allocation2 + $0x7c] sm:$0x1] %v3729_v16  ;;  %v3495_v28 = vunpack.i.h.s16 %v3487_v42  ;;  %v3497_v55 = vpack.i.b16 %v3489_v51, %v3489_v51  ;;  %v3499_v10 = vpack.i.b16 %v3491_v4, %v3491_v4  ;;  %v781_v51 = vld [vmem:[#allocation2] sm:$0x2] }
 0x125   : > { %v3501_v57 = vpack.i.b16 %v3493_v12, %v3493_v12  ;;  %v4562_v7 = vpack.i.b16 %v3487_v42, %v3487_v42  ;;  %v3510_v11 = vrot.slane %v4559_v24, %v4997_v43  ;;  %v3524_v25 = vrot.slane %v4560_v0, %v4997_v43  ;;  %v784_v0 = vld [vmem:[#allocation2 + $0x10] sm:$0x2] }
 0x126   : > { %v3538_v9 = vrot.slane %v4561_v60, %v4997_v43  ;;  %v3503_v23 = vpack.i.b16 %v3495_v28, %v3495_v28  ;;  %v3517_v26 = vrot.slane %v3497_v55, %v4997_v43  ;;  %v3531_v27 = vrot.slane %v3499_v10, %v4997_v43 }
 0x127   : > { %v3545_v3 = vrot.slane %v3501_v57, %v4997_v43  ;;  %v3552_v15 = vrot.slane %v4562_v7, %v4997_v43  ;;  %v3569_v17 = vsel %vm5791_vm5, %v3510_v11, %v3568_v39  ;;  %v3575_v48 = vsel %vm5791_vm5, %v3524_v25, %v3574_v35  ;;  %v787_v57 = vld [vmem:[#allocation2 + $0x20] sm:$0x2]  ;;  %v790_v11 = vld [vmem:[#allocation2 + $0x30] sm:$0x2] }
 0x128   : > { %v3581_v30 = vsel %vm5791_vm5, %v3538_v9, %v3580_v8  ;;  %v3559_v31 = vrot.slane %v3503_v23, %v4997_v43  ;;  %3570 = vst [vmem:[#allocation2 + $0x8] sm:$0x8] %v3569_v17  ;;  %v3572_v32 = vsel %vm5791_vm5, %v3517_v26, %v3571_v40  ;;  %3576 = vst [vmem:[#allocation2 + $0x28] sm:$0x8] %v3575_v48  ;;  %v793_v25 = vld [vmem:[#allocation2 + $0x40] sm:$0x2] }
 0x129   : > { %v3578_v44 = vsel %vm5791_vm5, %v3531_v27, %v3577_v29  ;;  %3582 = vst [vmem:[#allocation2 + $0x48] sm:$0x8] %v3581_v30  ;;  %v3584_v18 = vsel %vm5791_vm5, %v3545_v3, %v3583_v13  ;;  %3573 = vst [vmem:[#allocation2 + $0x18] sm:$0x8] %v3572_v32  ;;  %v3587_v56 = vsel %vm5791_vm5, %v3552_v15, %v3586_v63  ;;  %v796_v26 = vld [vmem:[#allocation2 + $0x50] sm:$0x2] }
 0x12a   : > { %3579 = vst [vmem:[#allocation2 + $0x38] sm:$0x8] %v3578_v44  ;;  %3585 = vst [vmem:[#allocation2 + $0x58] sm:$0x8] %v3584_v18  ;;  %v682_v45 = vcombine.high %v5754_v1, %v5754_v1  ;;  %v689_v34 = vrot.slane %v5754_v1, %v4974_v19  ;;  %v399_v22 = vcombine.high %v5757_v20, %v5757_v20  ;;  %v799_v27 = vld [vmem:[#allocation2 + $0x60] sm:$0x2] }
 0x12b   : > { %3588 = vst [vmem:[#allocation2 + $0x68] sm:$0x8] %v3587_v56  ;;  %v3590_v53 = vsel %vm5791_vm5, %v3559_v31, %v3589_v14  ;;  %v5827_v41 = vrot.slane %v5757_v20, %v4974_v19  ;;  %v5833_v49 = vrot.slane %v1239_v33, %v4974_v19  ;;  %v5839_v1 = vrot.slane %v956_v52, %v4974_v19  ;;  %v802_v31 = vld [vmem:[#allocation2 + $0x70] sm:$0x2] }
 0x12c   : > { %3591 = vst [vmem:[#allocation2 + $0x78] sm:$0x8] %v3590_v53  ;;  %v696_v59 = vrot.slane %v682_v45, %v4974_v19  ;;  %v697_v61 = vcombine.high %v689_v34, %v689_v34  ;;  %v700_v50 = vunpack.i.h.s16 %v689_v34  ;;  %v4459_v54 = vpack.i.b16 %v689_v34, %v689_v34  ;;  %v497_v34 = vld [vmem:[#allocation2] sm:$0x1] }
 0x12d   : > { %v5843_v20 = vrot.slane %v399_v22, %v4974_v19  ;;  %v5847_v38 = vcombine.high %v5827_v41, %v5827_v41  ;;  %v417_v33 = vunpack.i.h.s16 %v5827_v41  ;;  %v4449_v21 = vpack.i.b16 %v5827_v41, %v5827_v41  ;;  %v500_v22 = vld [vmem:[#allocation2 + $0x10] sm:$0x1] }
 0x12e   : > { %v698_v52 = vcombine.high %v696_v59, %v696_v59  ;;  %v702_v46 = vunpack.i.h.s16 %v696_v59  ;;  %v704_v36 = vunpack.i.h.s16 %v697_v61  ;;  %v708_v42 = vpack.i.b16 %v700_v50, %v700_v50  ;;  %v506_v50 = vld [vmem:[#allocation2 + $0x30] sm:$0x1] }
 0x12f   : > { %v4460_v4 = vpack.i.b16 %v696_v59, %v696_v59  ;;  %v4461_v12 = vpack.i.b16 %v697_v61, %v697_v61  ;;  %v721_v16 = vrot.slane %v4459_v54, %v4997_v43  ;;  %v415_v24 = vcombine.high %v5843_v20, %v5843_v20  ;;  %v503_v61 = vld [vmem:[#allocation2 + $0x20] sm:$0x1] }
 0x130   : > { %v706_v60 = vunpack.i.h.s16 %v698_v52  ;;  %v710_v28 = vpack.i.b16 %v702_v46, %v702_v46  ;;  %v712_v55 = vpack.i.b16 %v704_v36, %v704_v36  ;;  %v4462_v10 = vpack.i.b16 %v698_v52, %v698_v52  ;;  %v509_v36 = vld [vmem:[#allocation2 + $0x40] sm:$0x1] }
 0x131   : > { %v728_v39 = vrot.slane %v708_v42, %v4997_v43  ;;  %v735_v40 = vrot.slane %v4460_v4, %v4997_v43  ;;  %v749_v35 = vrot.slane %v4461_v12, %v4997_v43  ;;  %v782_v7 = vsel %vm5686_vm3, %v721_v16, %v781_v51  ;;  %v512_v12 = vld [vmem:[#allocation2 + $0x50] sm:$0x1]  ;;  %v515_v16 = vld [vmem:[#allocation2 + $0x60] sm:$0x1] }
 0x132   : > { %v714_v9 = vpack.i.b16 %v706_v60, %v706_v60  ;;  %v742_v29 = vrot.slane %v710_v28, %v4997_v43  ;;  %v756_v8 = vrot.slane %v712_v55, %v4997_v43  ;;  %v763_v23 = vrot.slane %v4462_v10, %v4997_v43  ;;  %783 = vst [vmem:[#allocation2] sm:$0x2] %v782_v7  ;;  %v1511_v28 = vpop.permute.xlu0 %1510  ;;  %v518_v55 = vld [vmem:[#allocation2 + $0x70] sm:$0x1] }
 0x133   : > { %v785_v3 = vsel %vm5686_vm3, %v728_v39, %v784_v0  ;;  %v788_v13 = vsel %vm5686_vm3, %v735_v40, %v787_v57  ;;  %v794_v63 = vsel %vm5686_vm3, %v749_v35, %v793_v25  ;;  %v419_v14 = vunpack.i.h.s16 %v5843_v20 }
 0x134   : > { %v770_v15 = vrot.slane %v714_v9, %v4997_v43  ;;  %786 = vst [vmem:[#allocation2 + $0x10] sm:$0x2] %v785_v3  ;;  %789 = vst [vmem:[#allocation2 + $0x20] sm:$0x2] %v788_v13  ;;  %v791_v17 = vsel %vm5686_vm3, %v742_v29, %v790_v11  ;;  %v797_v48 = vsel %vm5686_vm3, %v756_v8, %v796_v26  ;;  %v421_v32 = vunpack.i.h.s16 %v5847_v38 }
 0x135   : > { %795 = vst [vmem:[#allocation2 + $0x40] sm:$0x2] %v794_v63  ;;  %v800_v30 = vsel %vm5686_vm3, %v763_v23, %v799_v27  ;;  %792 = vst [vmem:[#allocation2 + $0x30] sm:$0x2] %v791_v17  ;;  %v423_v44 = vunpack.i.h.s16 %v415_v24  ;;  %v425_v18 = vpack.i.b16 %v417_v33, %v417_v33  ;;  %v4450_v56 = vpack.i.b16 %v5843_v20, %v5843_v20  ;;  %v4488_v20 = vld [vmem:[%s6327_s2 + $0x9] ss:$0 sm:$0xff] }
 0x136   : > { %798 = vst [vmem:[#allocation2 + $0x50] sm:$0x2] %v797_v48  ;;  %801 = vst [vmem:[#allocation2 + $0x60] sm:$0x2] %v800_v30  ;;  %v803_v45 = vsel %vm5686_vm3, %v770_v15, %v802_v31  ;;  %v427_v53 = vpack.i.b16 %v419_v14, %v419_v14  ;;  %v4451_v41 = vpack.i.b16 %v5847_v38, %v5847_v38 }
 0x137   : > { %v4452_v59 = vpack.i.b16 %v415_v24, %v415_v24  ;;  %804 = vst [vmem:[#allocation2 + $0x70] sm:$0x2] %v803_v45  ;;  %v429_v54 = vpack.i.b16 %v421_v32, %v421_v32  ;;  %v431_v52 = vpack.i.b16 %v423_v44, %v423_v44  ;;  %v438_v33 = vrot.slane %v4449_v21, %v4997_v43 }
 0x138   : > { %v445_v46 = vrot.slane %v425_v18, %v4997_v43  ;;  %v452_v42 = vrot.slane %v4450_v56, %v4997_v43  ;;  %v459_v51 = vrot.slane %v427_v53, %v4997_v43  ;;  %v466_v38 = vrot.slane %v4451_v41, %v4997_v43  ;;  %v1347_v56 = vld [vmem:[#allocation2] sm:$0x8] }
 0x139   : > { %v480_v4 = vrot.slane %v4452_v59, %v4997_v43  ;;  %v473_v24 = vrot.slane %v429_v54, %v4997_v43  ;;  %v487_v21 = vrot.slane %v431_v52, %v4997_v43  ;;  %v498_v0 = vsel %vm5566_vm15, %v438_v33, %v497_v34  ;;  %v1350_v54 = vld [vmem:[#allocation2 + $0x10] sm:$0x8]  ;;  %v1353_v52 = vld [vmem:[#allocation2 + $0x20] sm:$0x8] }
 0x13a   : > { %v501_v60 = vsel %vm5566_vm15, %v445_v46, %v500_v22  ;;  %499 = vst [vmem:[#allocation2] sm:$0x1] %v498_v0  ;;  %v504_v10 = vsel %vm5566_vm15, %v452_v42, %v503_v61  ;;  %v507_v57 = vsel %vm5566_vm15, %v459_v51, %v506_v50  ;;  %v510_v39 = vsel %vm5566_vm15, %v466_v38, %v509_v36  ;;  %v1359_v33 = vld [vmem:[#allocation2 + $0x40] sm:$0x8]  ;;  %v1356_v51 = vld [vmem:[#allocation2 + $0x30] sm:$0x8] }
 0x13b   : > { %502 = vst [vmem:[#allocation2 + $0x10] sm:$0x1] %v501_v60  ;;  %v516_v40 = vsel %vm5566_vm15, %v480_v4, %v515_v16  ;;  %505 = vst [vmem:[#allocation2 + $0x20] sm:$0x1] %v504_v10  ;;  %v513_v35 = vsel %vm5566_vm15, %v473_v24, %v512_v12  ;;  %v519_v7 = vsel %vm5566_vm15, %v487_v21, %v518_v55  ;;  %v1362_v38 = vld [vmem:[#allocation2 + $0x50] sm:$0x8] }
 0x13c   : > { %508 = vst [vmem:[#allocation2 + $0x30] sm:$0x1] %v507_v57  ;;  %511 = vst [vmem:[#allocation2 + $0x40] sm:$0x1] %v510_v39  ;;  %v1248_v11 = vcombine.high %v5833_v49, %v5833_v49  ;;  %v1255_v25 = vrot.slane %v5833_v49, %v4974_v19  ;;  %v965_v9 = vcombine.high %v5839_v1, %v5839_v1  ;;  %v1365_v4 = vld [vmem:[#allocation2 + $0x60] sm:$0x8] }
 0x13d   : > { %517 = vst [vmem:[#allocation2 + $0x60] sm:$0x1] %v516_v40  ;;  %514 = vst [vmem:[#allocation2 + $0x50] sm:$0x1] %v513_v35  ;;  %v5919_v29 = vrot.slane %v5839_v1, %v4974_v19  ;;  %v1797_v8 = vpack.c.bf16 %v5747_v6, %v5747_v6  ;;  %v5923_v23 = vmul.f32 %v4488_v20, %v1511_v28  ;;  %v1368_v10 = vld [vmem:[#allocation2 + $0x70] sm:$0x8] }
 0x13e   : > { %520 = vst [vmem:[#allocation2 + $0x70] sm:$0x1] %v519_v7  ;;  %v1262_v26 = vrot.slane %v1248_v11, %v4974_v19  ;;  %v1263_v27 = vcombine.high %v1255_v25, %v1255_v25  ;;  %v1266_v3 = vunpack.i.h.s16 %v1255_v25  ;;  %v4479_v13 = vpack.i.b16 %v1255_v25, %v1255_v25 }
 0x13f   : > { %v5927_v49 = vrot.slane %v965_v9, %v4974_v19  ;;  %v5931_v63 = vcombine.high %v5919_v29, %v5919_v29  ;;  %v983_v1 = vunpack.i.h.s16 %v5919_v29  ;;  %v4469_v14 = vpack.i.b16 %v5919_v29, %v5919_v29  ;;  %v1064_v29 = vld [vmem:[#allocation2] sm:$0x4] }
 0x140   : > { %v1264_v15 = vcombine.high %v1262_v26, %v1262_v26  ;;  %v1268_v17 = vunpack.i.h.s16 %v1262_v26  ;;  %v1270_v48 = vunpack.i.h.s16 %v1263_v27  ;;  %v1274_v30 = vpack.i.b16 %v1266_v3, %v1266_v3 }
 0x141   : > { %v4480_v31 = vpack.i.b16 %v1262_v26, %v1262_v26  ;;  %v4481_v32 = vpack.i.b16 %v1263_v27, %v1263_v27  ;;  %v1287_v44 = vrot.slane %v4479_v13, %v4997_v43  ;;  %v981_v18 = vcombine.high %v5927_v49, %v5927_v49 }
 0x142   : > { %v1272_v45 = vunpack.i.h.s16 %v1264_v15  ;;  %v1276_v34 = vpack.i.b16 %v1268_v17, %v1268_v17  ;;  %v1278_v22 = vpack.i.b16 %v1270_v48, %v1270_v48  ;;  %v4482_v53 = vpack.i.b16 %v1264_v15, %v1264_v15  ;;  %v1067_v15 = vld [vmem:[#allocation2 + $0x10] sm:$0x4]  ;;  %v1070_v17 = vld [vmem:[#allocation2 + $0x20] sm:$0x4] }
 0x143   : > { %v1294_v41 = vrot.slane %v1274_v30, %v4997_v43  ;;  %v1301_v59 = vrot.slane %v4480_v31, %v4997_v43  ;;  %v1315_v61 = vrot.slane %v4481_v32, %v4997_v43  ;;  %v1348_v50 = vsel %vm5791_vm5, %v1287_v44, %v1347_v56  ;;  %v1073_v48 = vld [vmem:[#allocation2 + $0x30] sm:$0x4]  ;;  %v1076_v44 = vld [vmem:[#allocation2 + $0x40] sm:$0x4] }
 0x144   : > { %v1280_v46 = vpack.i.b16 %v1272_v45, %v1272_v45  ;;  %v1308_v20 = vrot.slane %v1276_v34, %v4997_v43  ;;  %v1322_v36 = vrot.slane %v1278_v22, %v4997_v43  ;;  %v1329_v42 = vrot.slane %v4482_v53, %v4997_v43  ;;  %1349 = vst [vmem:[#allocation2] sm:$0x8] %v1348_v50  ;;  %v1082_v56 = vld [vmem:[#allocation2 + $0x60] sm:$0x4] }
 0x145   : > { %v1351_v12 = vsel %vm5791_vm5, %v1294_v41, %v1350_v54  ;;  %v1354_v16 = vsel %vm5791_vm5, %v1301_v59, %v1353_v52  ;;  %v1360_v24 = vsel %vm5791_vm5, %v1315_v61, %v1359_v33  ;;  %v985_v21 = vunpack.i.h.s16 %v5927_v49  ;;  %v2342_v41 = vpop.permute.xlu1 %2341  ;;  %v2064_v59 = vpop.permute.xlu0 %2063  ;;  %v1085_v61 = vld [vmem:[#allocation2 + $0x70] sm:$0x4] }
 0x146   : > { %v1336_v0 = vrot.slane %v1280_v46, %v4997_v43  ;;  %1352 = vst [vmem:[#allocation2 + $0x10] sm:$0x8] %v1351_v12  ;;  %1355 = vst [vmem:[#allocation2 + $0x20] sm:$0x8] %v1354_v16  ;;  %v1357_v60 = vsel %vm5791_vm5, %v1308_v20, %v1356_v51  ;;  %v1363_v28 = vsel %vm5791_vm5, %v1322_v36, %v1362_v38  ;;  %v987_v57 = vunpack.i.h.s16 %v5931_v63  ;;  %v4714_v46 = vld [vmem:[#allocation2 + $0x48] sm:$0xff]   ;;  %v4715_v20 = vld [vmem:[#allocation2 + $0x38] sm:$0xff]  }
 0x147   : > { %1361 = vst [vmem:[#allocation2 + $0x40] sm:$0x8] %v1360_v24  ;;  %v1366_v55 = vsel %vm5791_vm5, %v1329_v42, %v1365_v4  ;;  %1358 = vst [vmem:[#allocation2 + $0x30] sm:$0x8] %v1357_v60  ;;  %v989_v39 = vunpack.i.h.s16 %v981_v18  ;;  %v991_v40 = vpack.i.b16 %v983_v1, %v983_v1  ;;  %v4470_v35 = vpack.i.b16 %v5927_v49, %v5927_v49  ;;  %v4518_v49 = vld [vmem:[%s6327_s2 + $0xf] ss:$0 sm:$0xff] }
 0x148   : > { %1364 = vst [vmem:[#allocation2 + $0x50] sm:$0x8] %v1363_v28  ;;  %1367 = vst [vmem:[#allocation2 + $0x60] sm:$0x8] %v1366_v55  ;;  %v1369_v7 = vsel %vm5791_vm5, %v1336_v0, %v1368_v10  ;;  %v993_v11 = vpack.i.b16 %v985_v21, %v985_v21  ;;  %v4471_v25 = vpack.i.b16 %v5931_v63, %v5931_v63  ;;  %v4503_v1 = vld [vmem:[%s6327_s2 + $0xc] ss:$0 sm:$0xff] }
 0x149   : > { %v4472_v9 = vpack.i.b16 %v981_v18, %v981_v18  ;;  %1370 = vst [vmem:[#allocation2 + $0x70] sm:$0x8] %v1369_v7  ;;  %v995_v26 = vpack.i.b16 %v987_v57, %v987_v57  ;;  %v997_v27 = vpack.i.b16 %v989_v39, %v989_v39  ;;  %v1004_v3 = vrot.slane %v4469_v14, %v4997_v43  ;;  %v4508_v63 = vld [vmem:[%s6327_s2 + $0xd] ss:$0 sm:$0xff]  ;;  %v1079_v18 = vld [vmem:[#allocation2 + $0x50] sm:$0x4] }
 0x14a   : > { %v1011_v13 = vrot.slane %v991_v40, %v4997_v43  ;;  %v1018_v30 = vrot.slane %v4470_v35, %v4997_v43  ;;  %v1025_v14 = vrot.slane %v993_v11, %v4997_v43  ;;  %v1032_v31 = vrot.slane %v4471_v25, %v4997_v43  ;;  %v6008_v12 = vld [vmem:[%s4949_s11] sm:$0xff] }
 0x14b   : > { %v1046_v32 = vrot.slane %v4472_v9, %v4997_v43  ;;  %v1039_v45 = vrot.slane %v995_v26, %v4997_v43  ;;  %v1053_v34 = vrot.slane %v997_v27, %v4997_v43  ;;  %v1065_v22 = vsel %vm5646_vm2, %v1004_v3, %v1064_v29  ;;  %v6016_v21 = vld [vmem:[%s6325_s0 + $0x4] ss:$8 sps:$4 sm:$0xff]  }
 0x14c   : > { %v1068_v53 = vsel %vm5646_vm2, %v1011_v13, %v1067_v15  ;;  %1066 = vst [vmem:[#allocation2] sm:$0x4] %v1065_v22  ;;  %v1071_v50 = vsel %vm5646_vm2, %v1018_v30, %v1070_v17  ;;  %v1074_v54 = vsel %vm5646_vm2, %v1025_v14, %v1073_v48  ;;  %v1077_v52 = vsel %vm5646_vm2, %v1032_v31, %v1076_v44  ;;  %v3733_v35 = vld [vmem:[%s6326_s1] sm:$0xff]  ;;  %v3734_v29 = vld [vmem:[%s6326_s1 + $0x8] sm:$0xff]  ;;  %v1906_v48 = vld [vmem:[#allocation2 + $0x14] sm:$0x2] }
 0x14d   : > { %1069 = vst [vmem:[#allocation2 + $0x10] sm:$0x4] %v1068_v53  ;;  %v1083_v33 = vsel %vm5646_vm2, %v1046_v32, %v1082_v56  ;;  %1072 = vst [vmem:[#allocation2 + $0x20] sm:$0x4] %v1071_v50  ;;  %v1080_v36 = vsel %vm5646_vm2, %v1039_v45, %v1079_v18  ;;  %v1086_v42 = vsel %vm5646_vm2, %v1053_v34, %v1085_v61  ;;  %4593 = vmatprep.mubr.msk.bf16.mxu1 %vm524_vm6, %v6016_v21  ;;  %v1903_v26 = vld [vmem:[#allocation2 + $0x4] sm:$0x2] }
 0x14e   : > { %1075 = vst [vmem:[#allocation2 + $0x30] sm:$0x4] %v1074_v54  ;;  %1078 = vst [vmem:[#allocation2 + $0x40] sm:$0x4] %v1077_v52  ;;  %v1805_v51 = vrot.slane %v1797_v8, %v4974_v19  ;;  %v1519_v38 = vpack.c.bf16 %v5923_v23, %v5923_v23  ;;  %v2349_v4 = vmul.f32 %v4518_v49, %v2342_v41  ;;  %v4856_v23 = vmov 0   ;;  %4580 = vmatprep.mubr.msk.bf16.mxu0 %vm524_vm6, %v6016_v21 }
 0x14f   : > { %1084 = vst [vmem:[#allocation2 + $0x60] sm:$0x4] %v1083_v33  ;;  %1081 = vst [vmem:[#allocation2 + $0x50] sm:$0x4] %v1080_v36  ;;  %v1932_v16 = vmul.f32 %v6008_v12, %v4503_v1  ;;  %v6011_v24 = vmul.f32 %v4508_v63, %v2064_v59  ;;  %3979 = vmatprep.subr.bf16.mxu1 %v4856_v23  ;;  %3837 = vmatprep.subr.bf16.mxu0 %v4856_v23  ;;  %v1909_v30 = vld [vmem:[#allocation2 + $0x24] sm:$0x2] }
 0x150   : > { %1087 = vst [vmem:[#allocation2 + $0x70] sm:$0x4] %v1086_v42  ;;  %v1806_v0 = vcombine.high %v1805_v51, %v1805_v51  ;;  %v1813_v6 = vrot.slane %v1805_v51, %v4974_v19  ;;  %v1527_v8 = vrot.slane %v1519_v38, %v4974_v19  ;;  %v2350_v60 = vpack.c.bf16 %v2349_v4, %v2349_v4  ;;  %v1915_v14 = vld [vmem:[#allocation2 + $0x44] sm:$0x2]  ;;  %v1912_v56 = vld [vmem:[#allocation2 + $0x34] sm:$0x2] }
 0x151   : > { %v1933_v28 = vpack.c.bf16 %v1932_v16, %v1932_v16  ;;  %v2072_v55 = vpack.c.bf16 %v6011_v24, %v6011_v24  ;;  %3980 = vmatpush1.bf16.msra.mxu1 %v4714_v46  ;;  %3838 = vmatpush1.bf16.msra.mxu0 %v4715_v20  ;;  %v1918_v45 = vld [vmem:[#allocation2 + $0x54] sm:$0x2]  ;;  %v1921_v34 = vld [vmem:[#allocation2 + $0x64] sm:$0x2] }
 0x152   : > { %v1820_v10 = vrot.slane %v1806_v0, %v4974_v19  ;;  %v1821_v57 = vcombine.high %v1813_v6, %v1813_v6  ;;  %v1824_v39 = vunpack.i.h.s16 %v1813_v6  ;;  %v4499_v40 = vpack.i.b16 %v1813_v6, %v1813_v6  ;;  %3981 = vmatprep.subr.bf16.mxu1 %v4856_v23  ;;  %3839 = vmatprep.subr.bf16.mxu0 %v4856_v23  ;;  %v1924_v16 = vld [vmem:[#allocation2 + $0x74] sm:$0x2] }
 0x153   : > { %v1528_v7 = vcombine.high %v1527_v8, %v1527_v8  ;;  %v6031_v11 = vrot.slane %v1527_v8, %v4974_v19  ;;  %v6034_v25 = vrot.slane %v2350_v60, %v4974_v19  ;;  %v6037_v9 = vrot.slane %v1933_v28, %v4974_v19  ;;  %4712 = vset.pattern.permute.xlu0 %v4856_v23 }
 0x154   : > { %v1822_v27 = vcombine.high %v1820_v10, %v1820_v10  ;;  %v1826_v3 = vunpack.i.h.s16 %v1820_v10  ;;  %v1828_v13 = vunpack.i.h.s16 %v1821_v57  ;;  %v1832_v49 = vpack.i.b16 %v1824_v39, %v1824_v39  ;;  %3757 = vperm.xlu0 %4712, %v3733_v35   ;;  %4713 = vset.pattern.permute.xlu1 %v4856_v23 }
 0x155   : > { %v4500_v1 = vpack.i.b16 %v1820_v10, %v1820_v10  ;;  %v4501_v63 = vpack.i.b16 %v1821_v57, %v1821_v57  ;;  %v1845_v15 = vrot.slane %v4499_v40, %v4997_v43  ;;  %v1542_v17 = vrot.slane %v1528_v7, %v4974_v19  ;;  %3762 = vperm.xlu1 %4713, %v3734_v29  }
 0x156   : > { %v1830_v31 = vunpack.i.h.s16 %v1822_v27  ;;  %v1834_v32 = vpack.i.b16 %v1826_v3, %v1826_v3  ;;  %v1836_v44 = vpack.i.b16 %v1828_v13, %v1828_v13  ;;  %v4502_v18 = vpack.i.b16 %v1822_v27, %v1822_v27 }
 0x157   : > { %v1852_v22 = vrot.slane %v1832_v49, %v4997_v43  ;;  %v1859_v53 = vrot.slane %v4500_v1, %v4997_v43  ;;  %v1873_v41 = vrot.slane %v4501_v63, %v4997_v43  ;;  %v1904_v59 = vsel %vm5686_vm3, %v1845_v15, %v1903_v26  ;;  %v1625_v49 = vld [vmem:[#allocation2 + $0x4] sm:$0x1] }
 0x158   : > { %v1838_v61 = vpack.i.b16 %v1830_v31, %v1830_v31  ;;  %v1866_v50 = vrot.slane %v1834_v32, %v4997_v43  ;;  %v1880_v54 = vrot.slane %v1836_v44, %v4997_v43  ;;  %v1887_v52 = vrot.slane %v4502_v18, %v4997_v43  ;;  %1905 = vst [vmem:[#allocation2 + $0x4] sm:$0x2] %v1904_v59  ;;  %v1637_v1 = vld [vmem:[#allocation2 + $0x44] sm:$0x1] }
 0x159   : > { %v1907_v33 = vsel %vm5686_vm3, %v1852_v22, %v1906_v48  ;;  %v1910_v46 = vsel %vm5686_vm3, %v1859_v53, %v1909_v30  ;;  %v1916_v20 = vsel %vm5686_vm3, %v1873_v41, %v1915_v14  ;;  %v1543_v36 = vcombine.high %v6031_v11, %v6031_v11  ;;  %v1628_v48 = vld [vmem:[#allocation2 + $0x14] sm:$0x1] }
 0x15a   : > { %v1894_v42 = vrot.slane %v1838_v61, %v4997_v43  ;;  %1908 = vst [vmem:[#allocation2 + $0x14] sm:$0x2] %v1907_v33  ;;  %1911 = vst [vmem:[#allocation2 + $0x24] sm:$0x2] %v1910_v46  ;;  %v1913_v51 = vsel %vm5686_vm3, %v1866_v50, %v1912_v56  ;;  %v1919_v38 = vsel %vm5686_vm3, %v1880_v54, %v1918_v45  ;;  %v1546_v6 = vunpack.i.h.s16 %v6031_v11  ;;  %v1634_v30 = vld [vmem:[#allocation2 + $0x34] sm:$0x1] }
 0x15b   : > { %1917 = vst [vmem:[#allocation2 + $0x44] sm:$0x2] %v1916_v20  ;;  %v1922_v4 = vsel %vm5686_vm3, %v1887_v52, %v1921_v34  ;;  %1914 = vst [vmem:[#allocation2 + $0x34] sm:$0x2] %v1913_v51  ;;  %v1544_v0 = vcombine.high %v1542_v17, %v1542_v17  ;;  %v1548_v8 = vunpack.i.h.s16 %v1542_v17  ;;  %v1550_v60 = vunpack.i.h.s16 %v1543_v36  ;;  %v1640_v14 = vld [vmem:[#allocation2 + $0x54] sm:$0x1] }
 0x15c   : > { %1920 = vst [vmem:[#allocation2 + $0x54] sm:$0x2] %v1919_v38  ;;  %1923 = vst [vmem:[#allocation2 + $0x64] sm:$0x2] %v1922_v4  ;;  %v1925_v28 = vsel %vm5686_vm3, %v1894_v42, %v1924_v16  ;;  %v4489_v10 = vpack.i.b16 %v6031_v11, %v6031_v11  ;;  %v4490_v57 = vpack.i.b16 %v1542_v17, %v1542_v17  ;;  %v1643_v56 = vld [vmem:[#allocation2 + $0x64] sm:$0x1] }
 0x15d   : > { %v4491_v39 = vpack.i.b16 %v1543_v36, %v1543_v36  ;;  %1926 = vst [vmem:[#allocation2 + $0x74] sm:$0x2] %v1925_v28  ;;  %v1552_v40 = vunpack.i.h.s16 %v1544_v0  ;;  %v1554_v35 = vpack.i.b16 %v1546_v6, %v1546_v6  ;;  %v1556_v7 = vpack.i.b16 %v1548_v8, %v1548_v8  ;;  %v1646_v41 = vld [vmem:[#allocation2 + $0x74] sm:$0x1] }
 0x15e   : > { %v1558_v29 = vpack.i.b16 %v1550_v60, %v1550_v60  ;;  %v4492_v26 = vpack.i.b16 %v1544_v0, %v1544_v0  ;;  %v1567_v27 = vrot.slane %v4489_v10, %v4997_v43  ;;  %v1581_v3 = vrot.slane %v4490_v57, %v4997_v43 }
 0x15f   : > { %v1595_v13 = vrot.slane %v4491_v39, %v4997_v43  ;;  %v1560_v63 = vpack.i.b16 %v1552_v40, %v1552_v40  ;;  %v1574_v11 = vrot.slane %v1554_v35, %v4997_v43  ;;  %v1588_v15 = vrot.slane %v1556_v7, %v4997_v43  ;;  %v2456_v40 = vld [vmem:[#allocation2 + $0x4] sm:$0x8] }
 0x160   : > { %v1602_v17 = vrot.slane %v1558_v29, %v4997_v43  ;;  %v1609_v31 = vrot.slane %v4492_v26, %v4997_v43  ;;  %v1626_v32 = vsel %vm5566_vm15, %v1567_v27, %v1625_v49  ;;  %v1632_v44 = vsel %vm5566_vm15, %v1581_v3, %v1631_v2  ;;  %v2459_v2 = vld [vmem:[#allocation2 + $0x14] sm:$0x8] }
 0x161   : > { %v1638_v18 = vsel %vm5566_vm15, %v1595_v13, %v1637_v1  ;;  %v1616_v45 = vrot.slane %v1560_v63, %v4997_v43  ;;  %1627 = vst [vmem:[#allocation2 + $0x4] sm:$0x1] %v1626_v32  ;;  %v1629_v34 = vsel %vm5566_vm15, %v1574_v11, %v1628_v48  ;;  %1633 = vst [vmem:[#allocation2 + $0x24] sm:$0x1] %v1632_v44  ;;  %v2462_v1 = vld [vmem:[#allocation2 + $0x24] sm:$0x8] }
 0x162   : > { %v1635_v22 = vsel %vm5566_vm15, %v1588_v15, %v1634_v30  ;;  %1639 = vst [vmem:[#allocation2 + $0x44] sm:$0x1] %v1638_v18  ;;  %v1641_v53 = vsel %vm5566_vm15, %v1602_v17, %v1640_v14  ;;  %1630 = vst [vmem:[#allocation2 + $0x14] sm:$0x1] %v1629_v34  ;;  %v1644_v59 = vsel %vm5566_vm15, %v1609_v31, %v1643_v56  ;;  %v2468_v63 = vld [vmem:[#allocation2 + $0x44] sm:$0x8] }
 0x163   : > { %1636 = vst [vmem:[#allocation2 + $0x34] sm:$0x1] %v1635_v22  ;;  %1642 = vst [vmem:[#allocation2 + $0x54] sm:$0x1] %v1641_v53  ;;  %v2359_v61 = vcombine.high %v6034_v25, %v6034_v25  ;;  %v2366_v50 = vrot.slane %v6034_v25, %v4974_v19  ;;  %v1942_v54 = vcombine.high %v6037_v9, %v6037_v9  ;;  %v2465_v17 = vld [vmem:[#allocation2 + $0x34] sm:$0x8] }
 0x164   : > { %1645 = vst [vmem:[#allocation2 + $0x64] sm:$0x1] %v1644_v59  ;;  %v1647_v52 = vsel %vm5566_vm15, %v1616_v45, %v1646_v41  ;;  %v6110_v33 = vrot.slane %v6037_v9, %v4974_v19  ;;  %v6116_v46 = vrot.slane %v2072_v55, %v4974_v19  ;;  %v2471_v30 = vld [vmem:[#allocation2 + $0x54] sm:$0x8]  ;;  %v2474_v14 = vld [vmem:[#allocation2 + $0x64] sm:$0x8] }
 0x165   : > { %1648 = vst [vmem:[#allocation2 + $0x74] sm:$0x1] %v1647_v52  ;;  %v2373_v25 = vrot.slane %v2359_v61, %v4974_v19  ;;  %v2374_v20 = vcombine.high %v2366_v50, %v2366_v50  ;;  %v2377_v36 = vunpack.i.h.s16 %v2366_v50  ;;  %v4519_v42 = vpack.i.b16 %v2366_v50, %v2366_v50  ;;  %v2477_v45 = vld [vmem:[#allocation2 + $0x74] sm:$0x8]  ;;  %v2039_v61 = vld [vmem:[#allocation2 + $0x4] sm:$0x4] }
 0x166   : > { %v6120_v51 = vrot.slane %v1942_v54, %v4974_v19  ;;  %v6124_v37 = vcombine.high %v6110_v33, %v6110_v33  ;;  %v1960_v9 = vunpack.i.h.s16 %v6110_v33  ;;  %v4504_v24 = vpack.i.b16 %v6110_v33, %v6110_v33  ;;  %v2042_v50 = vld [vmem:[#allocation2 + $0x14] sm:$0x4]  ;;  %v2045_v54 = vld [vmem:[#allocation2 + $0x24] sm:$0x4] }
 0x167   : > { %v2375_v55 = vcombine.high %v2373_v25, %v2373_v25  ;;  %v2379_v38 = vunpack.i.h.s16 %v2373_v25  ;;  %v2381_v4 = vunpack.i.h.s16 %v2374_v20  ;;  %v2385_v16 = vpack.i.b16 %v2377_v36, %v2377_v36  ;;  %v2051_v36 = vld [vmem:[#allocation2 + $0x44] sm:$0x4] }
 0x168   : > { %v4520_v0 = vpack.i.b16 %v2373_v25, %v2373_v25  ;;  %v4521_v6 = vpack.i.b16 %v2374_v20, %v2374_v20  ;;  %v2398_v8 = vrot.slane %v4519_v42, %v4997_v43  ;;  %v1958_v60 = vcombine.high %v6120_v51, %v6120_v51  ;;  %v2048_v20 = vld [vmem:[#allocation2 + $0x34] sm:$0x4]  ;;  %v2057_v42 = vld [vmem:[#allocation2 + $0x64] sm:$0x4] }
 0x169   : > { %v2383_v28 = vunpack.i.h.s16 %v2375_v55  ;;  %v2387_v10 = vpack.i.b16 %v2379_v38, %v2379_v38  ;;  %v2389_v57 = vpack.i.b16 %v2381_v4, %v2381_v4  ;;  %v4522_v39 = vpack.i.b16 %v2375_v55, %v2375_v55  ;;  %v2060_v4 = vld [vmem:[#allocation2 + $0x74] sm:$0x4] }
 0x16a   : > { %v2405_v35 = vrot.slane %v2385_v16, %v4997_v43  ;;  %v2412_v7 = vrot.slane %v4520_v0, %v4997_v43  ;;  %v2426_v29 = vrot.slane %v4521_v6, %v4997_v43  ;;  %v2457_v26 = vsel %vm5791_vm5, %v2398_v8, %v2456_v40 }
 0x16b   : > { %v2391_v27 = vpack.i.b16 %v2383_v28, %v2383_v28  ;;  %v2419_v3 = vrot.slane %v2387_v10, %v4997_v43  ;;  %v2433_v13 = vrot.slane %v2389_v57, %v4997_v43  ;;  %v2440_v49 = vrot.slane %v4522_v39, %v4997_v43  ;;  %2458 = vst [vmem:[#allocation2 + $0x4] sm:$0x8] %v2457_v26 }
 0x16c   : > { %v2460_v11 = vsel %vm5791_vm5, %v2405_v35, %v2459_v2  ;;  %v2463_v15 = vsel %vm5791_vm5, %v2412_v7, %v2462_v1  ;;  %v2469_v48 = vsel %vm5791_vm5, %v2426_v29, %v2468_v63  ;;  %v1962_v31 = vunpack.i.h.s16 %v6120_v51 }
 0x16d   : > { %v2447_v32 = vrot.slane %v2391_v27, %v4997_v43  ;;  %2461 = vst [vmem:[#allocation2 + $0x14] sm:$0x8] %v2460_v11  ;;  %2464 = vst [vmem:[#allocation2 + $0x24] sm:$0x8] %v2463_v15  ;;  %v2466_v44 = vsel %vm5791_vm5, %v2419_v3, %v2465_v17  ;;  %v2472_v18 = vsel %vm5791_vm5, %v2433_v13, %v2471_v30  ;;  %v1964_v34 = vunpack.i.h.s16 %v6124_v37 }
 0x16e   : > { %2470 = vst [vmem:[#allocation2 + $0x44] sm:$0x8] %v2469_v48  ;;  %v2475_v56 = vsel %vm5791_vm5, %v2440_v49, %v2474_v14  ;;  %2467 = vst [vmem:[#allocation2 + $0x34] sm:$0x8] %v2466_v44  ;;  %v1966_v22 = vunpack.i.h.s16 %v1958_v60  ;;  %v1968_v53 = vpack.i.b16 %v1960_v9, %v1960_v9  ;;  %v4505_v41 = vpack.i.b16 %v6120_v51, %v6120_v51 }
 0x16f   : > { %2473 = vst [vmem:[#allocation2 + $0x54] sm:$0x8] %v2472_v18  ;;  %2476 = vst [vmem:[#allocation2 + $0x64] sm:$0x8] %v2475_v56  ;;  %v2478_v59 = vsel %vm5791_vm5, %v2447_v32, %v2477_v45  ;;  %v1970_v52 = vpack.i.b16 %v1962_v31, %v1962_v31  ;;  %v4506_v33 = vpack.i.b16 %v6124_v37, %v6124_v37 }
 0x170   : > { %v4507_v25 = vpack.i.b16 %v1958_v60, %v1958_v60  ;;  %2479 = vst [vmem:[#allocation2 + $0x74] sm:$0x8] %v2478_v59  ;;  %v1972_v55 = vpack.i.b16 %v1964_v34, %v1964_v34  ;;  %v1974_v9 = vpack.i.b16 %v1966_v22, %v1966_v22  ;;  %v1981_v38 = vrot.slane %v4504_v24, %v4997_v43 }
 0x171   : > { %v1988_v51 = vrot.slane %v1968_v53, %v4997_v43  ;;  %v1995_v16 = vrot.slane %v4505_v41, %v4997_v43  ;;  %v2002_v0 = vrot.slane %v1970_v52, %v4997_v43  ;;  %v2009_v6 = vrot.slane %v4506_v33, %v4997_v43 }
 0x172   : > { %v2023_v37 = vrot.slane %v4507_v25, %v4997_v43  ;;  %v2016_v8 = vrot.slane %v1972_v55, %v4997_v43  ;;  %v2030_v60 = vrot.slane %v1974_v9, %v4997_v43  ;;  %v2040_v28 = vsel %vm5020_vm7, %v1981_v38, %v2039_v61 }
 0x173   : > { %v2043_v24 = vsel %vm5020_vm7, %v1988_v51, %v2042_v50  ;;  %2041 = vst [vmem:[#allocation2 + $0x4] sm:$0x4] %v2040_v28  ;;  %v2046_v10 = vsel %vm5020_vm7, %v1995_v16, %v2045_v54  ;;  %v2049_v57 = vsel %vm5020_vm7, %v2002_v0, %v2048_v20  ;;  %v2052_v39 = vsel %vm5020_vm7, %v2009_v6, %v2051_v36  ;;  %v4722_v0 = vld [vmem:[#allocation2 + $0x28] sm:$0xff]   ;;  %v4723_v6 = vld [vmem:[#allocation2 + $0x18] sm:$0xff]  }
 0x174   : > { %2044 = vst [vmem:[#allocation2 + $0x14] sm:$0x4] %v2043_v24  ;;  %v2058_v40 = vsel %vm5020_vm7, %v2023_v37, %v2057_v42  ;;  %2047 = vst [vmem:[#allocation2 + $0x24] sm:$0x4] %v2046_v10  ;;  %v2055_v35 = vsel %vm5020_vm7, %v2016_v8, %v2054_v47  ;;  %v2061_v7 = vsel %vm5020_vm7, %v2030_v60, %v2060_v4  ;;  %v4718_v47 = vld [vmem:[#allocation2 + $0x38] sm:$0xff]   ;;  %v4719_v4 = vld [vmem:[#allocation2 + $0x28] sm:$0xff]  }
 0x175   : > { %2050 = vst [vmem:[#allocation2 + $0x34] sm:$0x4] %v2049_v57  ;;  %2053 = vst [vmem:[#allocation2 + $0x44] sm:$0x4] %v2052_v39  ;;  %v2081_v29 = vcombine.high %v6116_v46, %v6116_v46  ;;  %v2088_v26 = vrot.slane %v6116_v46, %v4974_v19  ;;  %v4726_v60 = vld [vmem:[#allocation2 + $0x18] sm:$0xff]   ;;  %v4727_v28 = vld [vmem:[#allocation2 + $0x8] sm:$0xff]  }
 0x176   : > { %2059 = vst [vmem:[#allocation2 + $0x64] sm:$0x4] %v2058_v40  ;;  %2056 = vst [vmem:[#allocation2 + $0x54] sm:$0x4] %v2055_v35  ;;  %v4730_v57 = vld [vmem:[#allocation2 + $0x58] sm:$0xff]   ;;  %v4731_v39 = vld [vmem:[#allocation2 + $0x48] sm:$0xff]  }
 0x177   : > { %2062 = vst [vmem:[#allocation2 + $0x74] sm:$0x4] %v2061_v7  ;;  %v2095_v27 = vrot.slane %v2081_v29, %v4974_v19  ;;  %v2096_v3 = vcombine.high %v2088_v26, %v2088_v26  ;;  %v2099_v13 = vunpack.i.h.s16 %v2088_v26  ;;  %v4509_v49 = vpack.i.b16 %v2088_v26, %v2088_v26  ;;  %v6233_v7 = vld [vmem:[%s6325_s0] ss:$8 sps:$4 sm:$0xff]   ;;  %v4738_v26 = vld [vmem:[#allocation2 + $0x58] sm:$0xff]  }
 0x178   : > { %v4737_v29 = vld [vmem:[#allocation2 + $0x68] sm:$0xff]  }
 0x179   : > { %v2097_v2 = vcombine.high %v2095_v27, %v2095_v27  ;;  %v2101_v1 = vunpack.i.h.s16 %v2095_v27  ;;  %v2103_v63 = vunpack.i.h.s16 %v2096_v3  ;;  %v2107_v11 = vpack.i.b16 %v2099_v13, %v2099_v13  ;;  %v4741_v13 = vld [vmem:[#allocation2 + $0x58] sm:$0xff]  }
 0x17a   : > { %v4510_v15 = vpack.i.b16 %v2095_v27, %v2095_v27  ;;  %v4511_v58 = vpack.i.b16 %v2096_v3, %v2096_v3  ;;  %v2120_v17 = vrot.slane %v4509_v49, %v4997_v43  ;;  %v2178_v46 = vld [vmem:[#allocation2 + $0x4] sm:$0x4]  ;;  %v4742_v49 = vld [vmem:[#allocation2 + $0x48] sm:$0xff]  }
 0x17b   : > { %v2105_v48 = vunpack.i.h.s16 %v2097_v2  ;;  %v2109_v30 = vpack.i.b16 %v2101_v1, %v2101_v1  ;;  %v2111_v14 = vpack.i.b16 %v2103_v63, %v2103_v63  ;;  %v4512_v31 = vpack.i.b16 %v2097_v2, %v2097_v2  ;;  %v2181_v32 = vld [vmem:[#allocation2 + $0x14] sm:$0x4]  ;;  %v2184_v45 = vld [vmem:[#allocation2 + $0x24] sm:$0x4]  ;;  %v4746_v63 = vld [vmem:[#allocation2 + $0x38] sm:$0xff]  }
 0x17c   : > { %v2127_v44 = vrot.slane %v2107_v11, %v4997_v43  ;;  %v2134_v19 = vrot.slane %v4510_v15, %v4997_v43  ;;  %v2148_v18 = vrot.slane %v4511_v58, %v4997_v43  ;;  %v2179_v56 = vsel %vm5646_vm2, %v2120_v17, %v2178_v46  ;;  %v2187_v34 = vld [vmem:[#allocation2 + $0x34] sm:$0x4]  ;;  %v2190_v22 = vld [vmem:[#allocation2 + $0x44] sm:$0x4]  ;;  %v4749_v58 = vld [vmem:[#allocation2 + $0x38] sm:$0xff]  }
 0x17d   : > { %v2113_v53 = vpack.i.b16 %v2105_v48, %v2105_v48  ;;  %v2141_v41 = vrot.slane %v2109_v30, %v4997_v43  ;;  %v2155_v59 = vrot.slane %v2111_v14, %v4997_v43  ;;  %v2162_v61 = vrot.slane %v4512_v31, %v4997_v43  ;;  %2180 = vst [vmem:[#allocation2 + $0x4] sm:$0x4] %v2179_v56  ;;  %v2193_v50 = vld [vmem:[#allocation2 + $0x54] sm:$0x4]  ;;  %v2196_v54 = vld [vmem:[#allocation2 + $0x64] sm:$0x4] }
 0x17e   : > { %v2182_v52 = vsel %vm5646_vm2, %v2127_v44, %v2181_v32  ;;  %v2185_v33 = vsel %vm5646_vm2, %v2134_v19, %v2184_v45  ;;  %v2191_v25 = vsel %vm5646_vm2, %v2148_v18, %v2190_v22  ;;  %v2199_v20 = vld [vmem:[#allocation2 + $0x74] sm:$0x4]  ;;  %v4750_v17 = vld [vmem:[#allocation2 + $0x28] sm:$0xff]   ;;  %v4753_v14 = vld [vmem:[#allocation2 + $0x78] sm:$0xff]   ;;  %v4022_v44 = vsub.s32 3, %v4952_v5 }
 0x17f   : > { %v2169_v36 = vrot.slane %v2113_v53, %v4997_v43  ;;  %2183 = vst [vmem:[#allocation2 + $0x14] sm:$0x4] %v2182_v52  ;;  %2186 = vst [vmem:[#allocation2 + $0x24] sm:$0x4] %v2185_v33  ;;  %v2188_v42 = vsel %vm5646_vm2, %v2141_v41, %v2187_v34  ;;  %v2194_v55 = vsel %vm5646_vm2, %v2155_v59, %v2193_v50  ;;  %v4754_v31 = vld [vmem:[#allocation2 + $0x68] sm:$0xff]   ;;  %v3880_v19 = vsub.s32 2, %v4952_v5 }
 0x180   : > { %2192 = vst [vmem:[#allocation2 + $0x44] sm:$0x4] %v2191_v25  ;;  %v2197_v9 = vsel %vm5646_vm2, %v2162_v61, %v2196_v54  ;;  %2189 = vst [vmem:[#allocation2 + $0x34] sm:$0x4] %v2188_v42  ;;  %v4023_v56 = vrot.slane %v6008_v12, %v4022_v44 }
 0x181   : > { %2195 = vst [vmem:[#allocation2 + $0x54] sm:$0x4] %v2194_v55  ;;  %2198 = vst [vmem:[#allocation2 + $0x64] sm:$0x4] %v2197_v9  ;;  %v2200_v38 = vsel %vm5646_vm2, %v2169_v36, %v2199_v20  ;;  %v3881_v34 = vrot.slane %v6008_v12, %v3880_v19 }
 0x182   : > { %2201 = vst [vmem:[#allocation2 + $0x74] sm:$0x4] %v2200_v38 }
 0x184   : > { %v4729_v10 = vld [vmem:[#allocation2] sm:$0xff]  }
 0x186   : > { %v4721_v62 = vld [vmem:[#allocation2 + $0x20] sm:$0xff]   ;;  %v4725_v8 = vld [vmem:[#allocation2 + $0x10] sm:$0xff]  }
 0x187   : > { %v4716_v43 = vld [vmem:[#allocation2 + $0x40] sm:$0xff]   ;;  %v4717_v51 = vld [vmem:[#allocation2 + $0x30] sm:$0xff]  }
 0x188   : > { %3982 = vmatpush1.bf16.msra.mxu1 %v4716_v43  ;;  %3840 = vmatpush1.bf16.msra.mxu0 %v4717_v51  ;;  %v4720_v16 = vld [vmem:[#allocation2 + $0x30] sm:$0xff]   ;;  %v4724_v37 = vld [vmem:[#allocation2 + $0x20] sm:$0xff]  }
 0x189   : > { %3983 = vmatprep.subr.bf16.mxu1 %v4856_v23  ;;  %3841 = vmatprep.subr.bf16.mxu0 %v4856_v23  ;;  %v4728_v24 = vld [vmem:[#allocation2 + $0x10] sm:$0xff]   ;;  %v4733_v35 = vld [vmem:[#allocation2 + $0x40] sm:$0xff]  }
 0x18a   : > { %v4732_v40 = vld [vmem:[#allocation2 + $0x50] sm:$0xff]   ;;  %v4739_v27 = vld [vmem:[#allocation2 + $0x60] sm:$0xff]  }
 0x18b   : > { %v4740_v3 = vld [vmem:[#allocation2 + $0x50] sm:$0xff]   ;;  %v4744_v1 = vld [vmem:[#allocation2 + $0x40] sm:$0xff]  }
 0x18c   : > { %3984 = vmatpush1.bf16.msra.mxu1 %v4718_v47  ;;  %3842 = vmatpush1.bf16.msra.mxu0 %v4719_v4  ;;  %v4743_v2 = vld [vmem:[#allocation2 + $0x50] sm:$0xff]   ;;  %v4747_v11 = vld [vmem:[#allocation2 + $0x40] sm:$0xff]  }
 0x18d   : > { %3985 = vmatprep.subr.bf16.mxu1 %v4856_v23  ;;  %3843 = vmatprep.subr.bf16.mxu0 %v4856_v23  ;;  %v4748_v15 = vld [vmem:[#allocation2 + $0x30] sm:$0xff]   ;;  %v4752_v30 = vld [vmem:[#allocation2 + $0x20] sm:$0xff]  }
 0x18e   : > { %v4751_v48 = vld [vmem:[#allocation2 + $0x30] sm:$0xff]   ;;  %v4756_v32 = vld [vmem:[#allocation2 + $0x60] sm:$0xff]  }
 0x18f   : > { %v4755_v46 = vld [vmem:[#allocation2 + $0x70] sm:$0xff]  }
 0x190   : > { %3986 = vmatpush1.bf16.msra.mxu1 %v4720_v16  ;;  %3844 = vmatpush1.bf16.msra.mxu0 %v4721_v62 }
 0x191   : > { %3987 = vmatprep.subr.bf16.mxu1 %v4856_v23  ;;  %3845 = vmatprep.subr.bf16.mxu0 %v4856_v23 }
 0x194   : > { %3988 = vmatpush1.bf16.msra.mxu1 %v4722_v0  ;;  %3846 = vmatpush1.bf16.msra.mxu0 %v4723_v6 }
 0x195   : > { %3989 = vmatprep.subr.bf16.mxu1 %v4856_v23  ;;  %3847 = vmatprep.subr.bf16.mxu0 %v4856_v23 }
 0x198   : > { %3990 = vmatpush1.bf16.msra.mxu1 %v4724_v37  ;;  %3848 = vmatpush1.bf16.msra.mxu0 %v4725_v8 }
 0x199   : > { %3991 = vmatprep.subr.bf16.mxu1 %v4856_v23  ;;  %3849 = vmatprep.subr.bf16.mxu0 %v4856_v23 }
 0x19c   : > { %3992 = vmatpush1.bf16.msra.mxu1 %v4726_v60  ;;  %3850 = vmatpush1.bf16.msra.mxu0 %v4727_v28 }
 0x19d   : > { %3993 = vmatprep.subr.bf16.mxu1 %v4856_v23  ;;  %3851 = vmatprep.subr.bf16.mxu0 %v4856_v23 }
 0x1a0   : > { %3994 = vmatpush1.bf16.msra.mxu1 %v4728_v24  ;;  %3852 = vmatpush1.bf16.msra.mxu0 %v4729_v10 }
 0x1a1   : > { %4007 = vmatprep.subr.bf16.mxu1 %v4856_v23  ;;  %3865 = vmatprep.subr.bf16.mxu0 %v4856_v23 }
 0x1a4   : > { %4008 = vmatpush2.bf16.msra.mxu1 %v4730_v57  ;;  %3866 = vmatpush2.bf16.msra.mxu0 %v4731_v39 }
 0x1a5   : > { %4009 = vmatprep.subr.bf16.mxu1 %v4856_v23  ;;  %3867 = vmatprep.subr.bf16.mxu0 %v4856_v23 }
 0x1a8   : > { %4010 = vmatpush2.bf16.msra.mxu1 %v4732_v40  ;;  %3868 = vmatpush2.bf16.msra.mxu0 %v4733_v35 }
 0x1a9   : > { %4263 = vmatprep.subr.bf16.mxu1 %v4856_v23  ;;  %4121 = vmatprep.subr.bf16.mxu0 %v4856_v23 }
 0x1ab   : > { %4012 = vmatmul.mubr.bf16.vlgmr.msra.gmra.mxu1 %v6233_v7  ;;  %3870 = vmatmul.mubr.bf16.vlgmr.msra.gmra.mxu0 %v6233_v7 }
 0x1ac   : > { %4264 = vmatpush1.bf16.msra.mxu1 %v4737_v29  ;;  %4122 = vmatpush1.bf16.msra.mxu0 %v4738_v26  ;;  %v4306_v29 = vsub.s32 5, %v4952_v5  ;;  %v4164_v26 = vsub.s32 4, %v4952_v5 }
 0x1ad   : > { %4265 = vmatprep.subr.bf16.mxu1 %v4856_v23  ;;  %4123 = vmatprep.subr.bf16.mxu0 %v4856_v23 }
 0x1ae   : > { %4619 = vmatprep.mubr.msk.bf16.mxu1 %vm524_vm6, %v6016_v21  ;;  %4606 = vmatprep.mubr.msk.bf16.mxu0 %vm524_vm6, %v6016_v21  ;;  %v4745_v21 = vld [vmem:[#allocation2 + $0x48] sm:$0xff]  }
 0x1b0   : > { %4266 = vmatpush1.bf16.msra.mxu1 %v4739_v27  ;;  %4124 = vmatpush1.bf16.msra.mxu0 %v4740_v3  ;;  %v4307_v27 = vrot.slane %v6008_v12, %v4306_v29 }
 0x1b1   : > { %4267 = vmatprep.subr.bf16.mxu1 %v4856_v23  ;;  %4125 = vmatprep.subr.bf16.mxu0 %v4856_v23 }
 0x1b4   : > { %4268 = vmatpush1.bf16.msra.mxu1 %v4741_v13  ;;  %4126 = vmatpush1.bf16.msra.mxu0 %v4742_v49  ;;  %v4165_v13 = vrot.slane %v6008_v12, %v4164_v26 }
 0x1b5   : > { %4269 = vmatprep.subr.bf16.mxu1 %v4856_v23  ;;  %4127 = vmatprep.subr.bf16.mxu0 %v4856_v23 }
 0x1b8   : > { %4270 = vmatpush1.bf16.msra.mxu1 %v4743_v2  ;;  %4128 = vmatpush1.bf16.msra.mxu0 %v4744_v1 }
 0x1b9   : > { %4271 = vmatprep.subr.bf16.mxu1 %v4856_v23  ;;  %4129 = vmatprep.subr.bf16.mxu0 %v4856_v23 }
 0x1bc   : > { %4272 = vmatpush1.bf16.msra.mxu1 %v4745_v21  ;;  %4130 = vmatpush1.bf16.msra.mxu0 %v4746_v63 }
 0x1bd   : > { %4273 = vmatprep.subr.bf16.mxu1 %v4856_v23  ;;  %4131 = vmatprep.subr.bf16.mxu0 %v4856_v23 }
 0x1c0   : > { %4274 = vmatpush1.bf16.msra.mxu1 %v4747_v11  ;;  %4132 = vmatpush1.bf16.msra.mxu0 %v4748_v15 }
 0x1c1   : > { %4275 = vmatprep.subr.bf16.mxu1 %v4856_v23  ;;  %4133 = vmatprep.subr.bf16.mxu0 %v4856_v23 }
 0x1c4   : > { %4276 = vmatpush1.bf16.msra.mxu1 %v4749_v58  ;;  %4134 = vmatpush1.bf16.msra.mxu0 %v4750_v17 }
 0x1c5   : > { %4277 = vmatprep.subr.bf16.mxu1 %v4856_v23  ;;  %4135 = vmatprep.subr.bf16.mxu0 %v4856_v23 }
 0x1c8   : > { %4278 = vmatpush1.bf16.msra.mxu1 %v4751_v48  ;;  %4136 = vmatpush1.bf16.msra.mxu0 %v4752_v30 }
 0x1c9   : > { %4291 = vmatprep.subr.bf16.mxu1 %v4856_v23  ;;  %4149 = vmatprep.subr.bf16.mxu0 %v4856_v23 }
 0x1cc   : > { %4292 = vmatpush2.bf16.msra.mxu1 %v4753_v14  ;;  %4150 = vmatpush2.bf16.msra.mxu0 %v4754_v31 }
 0x1cd   : > { %4293 = vmatprep.subr.bf16.mxu1 %v4856_v23  ;;  %4151 = vmatprep.subr.bf16.mxu0 %v4856_v23 }
 0x1cf   : > { %v3758_v18 = vpop.permute.xlu0 %3757 }
 0x1d0   : > { %4294 = vmatpush2.bf16.msra.mxu1 %v4755_v46  ;;  %4152 = vmatpush2.bf16.msra.mxu0 %v4756_v32  ;;  %v6267_v59 = vpop.permute.xlu1 %3762 }
 0x1d3   : > { %4296 = vmatmul.mubr.bf16.vlgmr.msra.gmra.mxu1 %v6233_v7  ;;  %4154 = vmatmul.mubr.bf16.vlgmr.msra.gmra.mxu0 %v6233_v7 }
 0x26b   : > { %v4013_v45 = vpop.f32.mrf.mxu1  ;;  %v3871_v53 = vpop.f32.mrf.mxu0 }
 0x26c   : > { %v4014_v22 = vadd.f32 %v4013_v45, %v3758_v18  ;;  %v3872_v23 = vadd.f32 %v3871_v53, %v3758_v18 }
 0x26d   : > { %v4015_v41 = vpop.f32.mrf.mxu1  ;;  %v3873_v50 = vpop.f32.mrf.mxu0 }
 0x26e   : > { %v4024_v61 = vadd.f32 %v4023_v56, %v4014_v22  ;;  %v3882_v54 = vadd.f32 %v3881_v34, %v3872_v23 }
 0x26f   : > { %v4016_v52 = vpop.f32.mrf.mxu1  ;;  %v3874_v20 = vpop.f32.mrf.mxu0 }
 0x270   : > { %v4028_v33 = vmin.f32 %v4024_v61, 0.0  ;;  %v4017_v25 = vadd.f32 %v4016_v52, %v6267_v59  ;;  %v3886_v36 = vmin.f32 %v3882_v54, 0.0  ;;  %v3875_v42 = vadd.f32 %v3874_v20, %v6267_v59 }
 0x271   : > { %v4018_v55 = vpop.f32.mrf.mxu1  ;;  %v3876_v43 = vpop.f32.mrf.mxu0  ;;  %vm4026_vm7 = vcmp.gt.f32.partialorder %v4024_v61, 0.0  ;;  %vm3884_vm8 = vcmp.gt.f32.partialorder %v3882_v54, 0.0 }
 0x272   : > { %v4030_v9 = vmul.f32 1.442695, %v4028_v33  ;;  %v4025_v38 = vadd.f32 %v4023_v56, %v4017_v25  ;;  %v3888_v51 = vmul.f32 1.442695, %v3886_v36  ;;  %v3883_v47 = vadd.f32 %v3881_v34, %v3875_v42 }
 0x274   : > { %4757 = vpow2.f32 %v4030_v9  ;;  %v4029_v4 = vmin.f32 %v4025_v38, 0.0  ;;  %v3887_v16 = vmin.f32 %v3883_v47, 0.0  ;;  %vm4027_vm9 = vcmp.gt.f32.partialorder %v4025_v38, 0.0 }
 0x275   : > { %4759 = vpow2.f32 %v3888_v51  ;;  %vm3885_vm10 = vcmp.gt.f32.partialorder %v3883_v47, 0.0 }
 0x276   : > { %v4032_v62 = vmul.f32 1.442695, %v4029_v4  ;;  %v3890_v0 = vmul.f32 1.442695, %v3887_v16 }
 0x278   : > { %4761 = vpow2.f32 %v4032_v62 }
 0x279   : > { %4763 = vpow2.f32 %v3890_v0 }
 0x281   : > { %v4758_v6 = vpop.eup %4757 }
 0x282   : > { %v4760_v37 = vpop.eup %4759  ;;  %v4594_v8 = vadd.f32 -1.0, %v4758_v6 }
 0x283   : > { %v4581_v60 = vadd.f32 -1.0, %v4760_v37 }
 0x284   : > { %v4036_v28 = vsel %vm4026_vm7, %v4024_v61, %v4594_v8 }
 0x285   : > { %v4762_v24 = vpop.eup %4761  ;;  %4038 = vst [vmem:[%s6272_s27 + $0x8] sm:$0xff] %v4036_v28  ;;  %v3894_v10 = vsel %vm3884_vm8, %v3882_v54, %v4581_v60 }
 0x286   : > { %v4764_v57 = vpop.eup %4763  ;;  %3896 = vst [vmem:[%s6272_s27] sm:$0xff] %v3894_v10  ;;  %v4595_v39 = vadd.f32 -1.0, %v4762_v24 }
 0x287   : > { %v4582_v40 = vadd.f32 -1.0, %v4764_v57 }
 0x288   : > { %v4037_v35 = vsel %vm4027_vm9, %v4025_v38, %v4595_v39 }
 0x289   : > { %4039 = vst [vmem:[%s6272_s27 + $0x28] sm:$0xff] %v4037_v35  ;;  %v3895_v7 = vsel %vm3885_vm10, %v3883_v47, %v4582_v40 }
 0x28a   : > { %3897 = vst [vmem:[%s6272_s27 + $0x20] sm:$0xff] %v3895_v7 }
 0x28c   : > { %v4350_v42 = vld [vmem:[%s6272_s27 + $0x8] sm:$0xff] (%p4928_p5) }
 0x28d   : > { %v4348_v36 = vld [vmem:[%s6272_s27] sm:$0xff] (%p4928_p5)  ;;  %4351 = vst [vmem:[%s4335_s7 + $0x8] sm:$0xff] (%p4928_p5), %v4350_v42 }
 0x28e   : > { %4349 = vst [vmem:[%s4335_s7] sm:$0xff] (%p4928_p5), %v4348_v36 }
 0x290   : > { %v4358_v43 = vld [vmem:[%s6272_s27 + $0x28] sm:$0xff] (%p4928_p5) }
 0x291   : > { %v4356_v38 = vld [vmem:[%s6272_s27 + $0x20] sm:$0xff] (%p4928_p5)  ;;  %4359 = vst [vmem:[%s4335_s7 + $0x48] sm:$0xff] (%p4928_p5), %v4358_v43 }
 0x292   : > { %4357 = vst [vmem:[%s4335_s7 + $0x40] sm:$0xff] (%p4928_p5), %v4356_v38 }
 0x293   : > { %v4297_v3 = vpop.f32.mrf.mxu1  ;;  %v4155_v2 = vpop.f32.mrf.mxu0 }
 0x294   : > { %v4298_v49 = vadd.f32 %v4297_v3, %v3758_v18  ;;  %v4156_v1 = vadd.f32 %v4155_v2, %v3758_v18 }
 0x295   : > { %v4299_v21 = vpop.f32.mrf.mxu1  ;;  %v4157_v11 = vpop.f32.mrf.mxu0 }
 0x296   : > { %v4308_v63 = vadd.f32 %v4307_v27, %v4298_v49  ;;  %v4166_v15 = vadd.f32 %v4165_v13, %v4156_v1 }
 0x297   : > { %v4300_v58 = vpop.f32.mrf.mxu1  ;;  %v4158_v30 = vpop.f32.mrf.mxu0 }
 0x298   : > { %v4312_v17 = vmin.f32 %v4308_v63, 0.0  ;;  %v4301_v48 = vadd.f32 %v4300_v58, %v6267_v59  ;;  %v4170_v14 = vmin.f32 %v4166_v15, 0.0  ;;  %v4159_v5 = vadd.f32 %v4158_v30, %v6267_v59 }
 0x299   : > { %v4302_v31 = vpop.f32.mrf.mxu1  ;;  %v4160_v44 = vpop.f32.mrf.mxu0  ;;  %vm4310_vm11 = vcmp.gt.f32.partialorder %v4308_v63, 0.0  ;;  %vm4168_vm12 = vcmp.gt.f32.partialorder %v4166_v15, 0.0 }
 0x29a   : > { %v4314_v46 = vmul.f32 1.442695, %v4312_v17  ;;  %v4309_v32 = vadd.f32 %v4307_v27, %v4301_v48  ;;  %v4172_v12 = vmul.f32 1.442695, %v4170_v14  ;;  %v4167_v19 = vadd.f32 %v4165_v13, %v4159_v5 }
 0x29c   : > { %4765 = vpow2.f32 %v4314_v46  ;;  %v4313_v18 = vmin.f32 %v4309_v32, 0.0  ;;  %v4171_v56 = vmin.f32 %v4167_v19, 0.0  ;;  %vm4311_vm13 = vcmp.gt.f32.partialorder %v4309_v32, 0.0 }
 0x29d   : > { %4767 = vpow2.f32 %v4172_v12  ;;  %vm4169_vm14 = vcmp.gt.f32.partialorder %v4167_v19, 0.0 }
 0x29e   : > { %v4316_v45 = vmul.f32 1.442695, %v4313_v18  ;;  %v4174_v34 = vmul.f32 1.442695, %v4171_v56 }
 0x2a0   : > { %4769 = vpow2.f32 %v4316_v45 }
 0x2a1   : > { %4771 = vpow2.f32 %v4174_v34 }
 0x2a9   : > { %v4766_v22 = vpop.eup %4765 }
 0x2aa   : > { %v4768_v53 = vpop.eup %4767  ;;  %v4620_v23 = vadd.f32 -1.0, %v4766_v22 }
 0x2ab   : > { %v4607_v41 = vadd.f32 -1.0, %v4768_v53 }
 0x2ac   : > { %v4320_v59 = vsel %vm4310_vm11, %v4308_v63, %v4620_v23 }
 0x2ad   : > { %v4770_v61 = vpop.eup %4769  ;;  %4322 = vst [vmem:[%s6272_s27 + $0x18] sm:$0xff] %v4320_v59  ;;  %v4178_v50 = vsel %vm4168_vm12, %v4166_v15, %v4607_v41 }
 0x2ae   : > { %v4772_v54 = vpop.eup %4771  ;;  %4180 = vst [vmem:[%s6272_s27 + $0x10] sm:$0xff] %v4178_v50  ;;  %v4621_v52 = vadd.f32 -1.0, %v4770_v61  ;;  %4330 = sbr.rel (!%p4928_p5) target bundleno = 699 (0x2bb), region = 40 }
 0x2af   : > { %v4608_v33 = vadd.f32 -1.0, %v4772_v54 }
 0x2b0   : > { %v4321_v25 = vsel %vm4311_vm13, %v4309_v32, %v4621_v52 }
 0x2b1   : > { %4323 = vst [vmem:[%s6272_s27 + $0x38] sm:$0xff] %v4321_v25  ;;  %v4179_v20 = vsel %vm4169_vm14, %v4167_v19, %v4608_v33 }
 0x2b2   : > { %4181 = vst [vmem:[%s6272_s27 + $0x30] sm:$0xff] %v4179_v20 }
 0x2b4   : > { %v4354_v9 = vld [vmem:[%s6272_s27 + $0x18] sm:$0xff] }
 0x2b5   : > { %v4352_v55 = vld [vmem:[%s6272_s27 + $0x10] sm:$0xff]  ;;  %4355 = vst [vmem:[%s4335_s7 + $0x18] sm:$0xff] %v4354_v9 }
 0x2b6   : > { %4353 = vst [vmem:[%s4335_s7 + $0x10] sm:$0xff] %v4352_v55 }
 0x2b8   : > { %v4362_v47 = vld [vmem:[%s6272_s27 + $0x38] sm:$0xff] }
 0x2b9   : > { %v4360_v51 = vld [vmem:[%s6272_s27 + $0x30] sm:$0xff]  ;;  %4363 = vst [vmem:[%s4335_s7 + $0x58] sm:$0xff] %v4362_v47 }
 0x2ba   : > { %4361 = vst [vmem:[%s4335_s7 + $0x50] sm:$0xff] %v4360_v51 }
 0x2bb PF: > { %s14_s21 = sadd.s32 1, %s4828_s21   ;;  %s6349_s15 = smov %s4808_s16 }
 0x2bc   : > { %p11_p10 = scmp.ge.s32.totalorder %s14_s21, 6   ;;  %s6350_s16 = smov %s4939_s30 }
 0x2bd   : > { %s6351_s17 = smov %s4820_s19  ;;  %s6352_s18 = smov %s4824_s20 }
 0x2be   : > { %s6353_s19 = smov %s6356_s22  ;;  %s6354_s20 = smov %s6360_s23 }
 0x2bf   :  { %13 = sbr.rel (!%p11_p10) target bundleno = 4 (0x4), region = 93 }

</bundles_post_ra>
